<compile_context>
chip_gen: v5e
topology: v5e:2x2
jax: 0.10.0
libtpu: 0.0.40
codegen_flags: <defaults>
</compile_context>

<pallas_src>
import numpy as np
import jax
import jax.numpy as jnp
from jax.experimental import pallas as pl
from jax.experimental.pallas import tpu as pltpu

BN_EPS = 1e-5
LEAKY_SLOPE = 0.2


# ----------------------- host-side weight preprocessing ----------------------

def _round_up(n, m):
    return (n + m - 1) // m * m


def _pad2d(a, rows, cols):
    out = np.zeros((rows, cols), np.float32)
    out[: a.shape[0], : a.shape[1]] = a
    return out


def conv_to_matrix(w_oihw, H, W, stride=2, pad=2):
    """Lower Conv2d(k=5,s=2,p=2) to a dense matrix acting on NCHW-flattened x.

    Row index  = ci*H*W  + ih*W  + iw   (unpadded input; zero padding folded away)
    Col index  = co*Ho*Wo + oh*Wo + ow  (NCHW-flattened output)
    """
    Cout, Cin, KH, KW = w_oihw.shape
    Ho = (H + 2 * pad - KH) // stride + 1
    Wo = (W + 2 * pad - KW) // stride + 1
    w = np.asarray(w_oihw, np.float32)
    M = np.zeros((Cin * H * W, Cout * Ho * Wo), np.float32)
    rows_c = np.arange(Cin) * H * W
    cols_c = np.arange(Cout) * Ho * Wo
    for oh in range(Ho):
        for ow in range(Wo):
            col_s = oh * Wo + ow
            for kh in range(KH):
                ih = stride * oh + kh - pad
                if ih < 0 or ih >= H:
                    continue
                for kw in range(KW):
                    iw = stride * ow + kw - pad
                    if iw < 0 or iw >= W:
                        continue
                    M[np.ix_(rows_c + ih * W + iw, cols_c + col_s)] += w[:, :, kh, kw].T
    return M, Ho, Wo


def prepare_params(params, img_hw=28):
    """One-time (outside jit) lowering of PyTorch-layout params to kernel operands.

    Returns (prep, meta): prep = dict of device arrays (conv matrices in bf16,
    everything 128-lane padded), meta = static python ints needed by the kernel.
    """
    H = W = img_hw
    m1, H1, W1 = conv_to_matrix(params["conv1_w"], H, W)
    m2, H2, W2 = conv_to_matrix(params["conv2_w"], H1, W1)
    m3, H3, W3 = conv_to_matrix(params["conv3_w"], H2, W2)
    c2 = params["conv2_w"].shape[0]
    c3 = params["conv3_w"].shape[0]

    kp = _round_up(m1.shape[0], 128)    # 896
    n1p = _round_up(m1.shape[1], 128)   # 512
    n2p = _round_up(m2.shape[1], 128)   # 256
    n3p = _round_up(m3.shape[1], 128)   # 128

    m1p = _pad2d(m1, kp, n1p)
    m2p = _pad2d(m2, n1p, n2p)
    m3p = _pad2d(m3, n2p, n3p)

    def sel(C, HW, rows_pad):           # (rows_pad, C) one-hot channel selection
        s = np.kron(np.eye(C, dtype=np.float32), np.ones((HW, 1), np.float32))
        return _pad2d(s, rows_pad, C)

    s2 = sel(c2, H2 * W2, n2p)
    s3 = sel(c3, H3 * W3, n3p)

    def rep(b, hw, width):              # per-channel bias tiled to padded NCHW-flat layout
        v = np.zeros((1, width), np.float32)
        bb = np.asarray(b, np.float32)
        v[0, : bb.shape[0] * hw] = np.repeat(bb, hw)
        return jnp.asarray(v)

    fc_w = np.asarray(params["fc_w"], np.float32)
    fc_w = np.pad(fc_w, ((0, n3p - fc_w.shape[0]), (0, 0)))

    prep = dict(
        m1=jnp.asarray(m1p, jnp.bfloat16), b1=rep(params["conv1_b"], H1 * W1, n1p),
        m2=jnp.asarray(m2p, jnp.bfloat16), b2=rep(params["conv2_b"], H2 * W2, n2p),
        m3=jnp.asarray(m3p, jnp.bfloat16), b3=rep(params["conv3_b"], H3 * W3, n3p),
        s2=jnp.asarray(s2), s2t=jnp.asarray(s2.T),
        s3=jnp.asarray(s3), s3t=jnp.asarray(s3.T),
        g2=jnp.asarray(np.asarray(params["bn2_g"], np.float32))[None, :],
        beta2=jnp.asarray(np.asarray(params["bn2_b"], np.float32))[None, :],
        g3=jnp.asarray(np.asarray(params["bn3_g"], np.float32))[None, :],
        beta3=jnp.asarray(np.asarray(params["bn3_b"], np.float32))[None, :],
        fc_w=jnp.asarray(fc_w),
        fc_b=jnp.asarray(np.asarray(params["fc_b"], np.float32)).reshape(1, 1),
    )
    meta = dict(hw2=H2 * W2, hw3=H3 * W3)
    return prep, meta


# ------------------------------- Pallas kernel --------------------------------

def _make_kernel(real_b, hw2, hw3):
    """Kernel closure over static batch size / per-layer spatial sizes."""

    def kernel(x_ref, m1_ref, b1_ref,
               m2_ref, b2_ref, s2_ref, s2t_ref, g2_ref, bt2_ref,
               m3_ref, b3_ref, s3_ref, s3t_ref, g3_ref, bt3_ref,
               fcw_ref, fcb_ref, o_ref):

        def leaky(v):
            return jnp.where(v > 0, v, LEAKY_SLOPE * v)

        def bn_leaky(y, sel, sel_t, gamma, beta, hw):
            # Training-mode BatchNorm2d (batch stats, biased variance) on the
            # padded NCHW-flat layout.  Stats use only the real batch rows.
            # Per-channel sums go through small MXU sel-matmuls (review: move the
            # big cross-sublane reduction onto the MXU); variance is two-pass.
            n = float(real_b * hw)
            yr = y[:real_b, :]
            mean = jnp.sum(jnp.dot(yr, sel, preferred_element_type=jnp.float32),
                           axis=0, keepdims=True) * (1.0 / n)            # (1, C)
            mean_b = jnp.dot(mean, sel_t, preferred_element_type=jnp.float32)
            yc = yr - mean_b
            var = jnp.sum(jnp.dot(yc * yc, sel, preferred_element_type=jnp.float32),
                          axis=0, keepdims=True) * (1.0 / n)             # (1, C)
            scale = jax.lax.rsqrt(var + BN_EPS) * gamma                  # (1, C)
            shift = beta - mean * scale                                  # (1, C)
            # (The two broadcasts below could be fused into one (2,C)@(C,HW) dot;
            #  negligible at this size, kept separate for lowering simplicity.)
            scale_b = jnp.dot(scale, sel_t, preferred_element_type=jnp.float32)
            shift_b = jnp.dot(shift, sel_t, preferred_element_type=jnp.float32)
            return leaky(y * scale_b + shift_b)

        x = x_ref[...]                                                   # (Bp, 896) bf16
        # conv1 + LeakyReLU
        h = leaky(jnp.dot(x, m1_ref[...], preferred_element_type=jnp.float32)
                  + b1_ref[...])
        # conv2 + BN2 + LeakyReLU
        h = jnp.dot(h.astype(jnp.bfloat16), m2_ref[...],
                    preferred_element_type=jnp.float32) + b2_ref[...]
        h = bn_leaky(h, s2_ref[...], s2t_ref[...], g2_ref[...], bt2_ref[...], hw2)
        # conv3 + BN3 + LeakyReLU
        h = jnp.dot(h.astype(jnp.bfloat16), m3_ref[...],
                    preferred_element_type=jnp.float32) + b3_ref[...]
        h = bn_leaky(h, s3_ref[...], s3t_ref[...], g3_ref[...], bt3_ref[...], hw3)
        # fc + sigmoid   (is_linear_output=False branch of the PyTorch module)
        logit = (jnp.dot(h, fcw_ref[...], preferred_element_type=jnp.float32)
                 + fcb_ref[...])
        o_ref[...] = (pl.reciprocal(1.0 + jnp.exp(-logit), approx=True)
                      ).astype(o_ref.dtype)

    return kernel


def discriminator_pallas(x_flat, prep, meta):
    B, D = x_flat.shape
    Bp = _round_up(B, 8)                     # sublane-aligned batch
    Kp = prep["m1"].shape[0]                 # 128-padded input features
    # Pad batch + feature dims; feed bf16 (accumulation stays f32 in-kernel).
    xp = jnp.zeros((Bp, Kp), jnp.bfloat16).at[:B, :D].set(x_flat.astype(jnp.bfloat16))

    args = (xp,
            prep["m1"], prep["b1"],
            prep["m2"], prep["b2"], prep["s2"], prep["s2t"], prep["g2"], prep["beta2"],
            prep["m3"], prep["b3"], prep["s3"], prep["s3t"], prep["g3"], prep["beta3"],
            prep["fc_w"], prep["fc_b"])
    in_specs = [pl.BlockSpec(a.shape, lambda i: (0, 0)) for a in args]  # all 2-D, full blocks

    out = pl.pallas_call(
        _make_kernel(B, meta["hw2"], meta["hw3"]),
        out_shape=jax.ShapeDtypeStruct((Bp, 1), jnp.float32),
        grid=(1,),
        in_specs=in_specs,
        out_specs=pl.BlockSpec((Bp, 1), lambda i: (0, 0)),
        compiler_params=pltpu.CompilerParams(
            dimension_semantics=("arbitrary",),
            vmem_limit_bytes=32 * 1024 * 1024),
    )(*args)
    return out[:B]


def build_forward(meta):
    @jax.jit
    def forward(x_nchw, prep):
        B = x_nchw.shape[0]
        return discriminator_pallas(x_nchw.reshape(B, -1), prep, meta)
    return forward


# ------------------------------ parameter init --------------------------------

def init_params(key, feature_map_dim=8, n_channel=1):
    fd = feature_map_dim
    ks = jax.random.split(key, 12)

    def u(k, shape, fan_in):
        b = 1.0 / np.sqrt(fan_in)
        return jax.random.uniform(k, shape, jnp.float32, -b, b)

    return dict(
        conv1_w=u(ks[0], (fd // 4, n_channel, 5, 5), n_channel * 25),
        conv1_b=u(ks[1], (fd // 4,), n_channel * 25),
        conv2_w=u(ks[2], (fd // 2, fd // 4, 5, 5), (fd // 4) * 25),
        conv2_b=u(ks[3], (fd // 2,), (fd // 4) * 25),
        bn2_g=1.0 + 0.1 * jax.random.normal(ks[4], (fd // 2,), jnp.float32),
        bn2_b=0.1 * jax.random.normal(ks[5], (fd // 2,), jnp.float32),
        conv3_w=u(ks[6], (fd, fd // 2, 5, 5), (fd // 2) * 25),
        conv3_b=u(ks[7], (fd,), (fd // 2) * 25),
        bn3_g=1.0 + 0.1 * jax.random.normal(ks[8], (fd,), jnp.float32),
        bn3_b=0.1 * jax.random.normal(ks[9], (fd,), jnp.float32),
        fc_w=u(ks[10], (fd * 4 * 4, 1), fd * 4 * 4),
        fc_b=u(ks[11], (1,), fd * 4 * 4),
    )


# ------------------------- pure-JAX reference (NCHW) ---------------------------

def reference_forward(x, params):
    def conv(x, w, b):
        y = jax.lax.conv_general_dilated(
            x, w, window_strides=(2, 2), padding=[(2, 2), (2, 2)],
            dimension_numbers=("NCHW", "OIHW", "NCHW"),
            precision=jax.lax.Precision.HIGHEST)
        return y + b.reshape(1, -1, 1, 1)

    def bn(x, g, b):
        mean = x.mean(axis=(0, 2, 3), keepdims=True)
        var = ((x - mean) ** 2).mean(axis=(0, 2, 3), keepdims=True)
        return (x - mean) / jnp.sqrt(var + BN_EPS) * g.reshape(1, -1, 1, 1) + b.reshape(1, -1, 1, 1)

    def leaky(v):
        return jnp.where(v > 0, v, LEAKY_SLOPE * v)

    h = leaky(conv(x, params["conv1_w"], params["conv1_b"]))
    h = leaky(bn(conv(h, params["conv2_w"], params["conv2_b"]), params["bn2_g"], params["bn2_b"]))
    h = leaky(bn(conv(h, params["conv3_w"], params["conv3_b"]), params["bn3_g"], params["bn3_b"]))
    flat = h.reshape(h.shape[0], -1)
    logit = flat @ params["fc_w"] + params["fc_b"]
    return 1.0 / (1.0 + jnp.exp(-logit))


# ----------------------------------- main --------------------------------------

if __name__ == "__main__":
    key = jax.random.PRNGKey(0)
    kx, kp = jax.random.split(key)
    B, FD, NC, IMG = 2, 8, 1, 28          # 28 -> 14 -> 7 -> 4, fc in_features = 8*4*4

    x = jax.random.normal(kx, (B, NC, IMG, IMG), jnp.float32)
    params = init_params(kp, FD, NC)
    prep, meta = prepare_params(params, IMG)   # hoisted weight preprocessing (done once)

    forward = build_forward(meta)
    out = forward(x, prep)
    out = jax.block_until_ready(out)
    assert out.shape == (B, 1), out.shape

    ref = reference_forward(x, params)
    max_err = float(jnp.max(jnp.abs(out - ref)))
    # bf16 weights + bf16 input feed (f32 accumulation) vs f32 HIGHEST reference.
    assert jnp.allclose(out, ref, atol=3e-2, rtol=3e-2), f"max_err={max_err}"

    print("KERNEL_OK")
</pallas_src>

<mosaic_0001>
module attributes {stable_mosaic.version = 11 : i64} {
  func.func @kernel(%arg0: i32, %arg1: memref<8x896xbf16, #tpu.memory_space<vmem>>, %arg2: memref<896x512xbf16, #tpu.memory_space<vmem>>, %arg3: memref<1x512xf32, #tpu.memory_space<vmem>>, %arg4: memref<512x256xbf16, #tpu.memory_space<vmem>>, %arg5: memref<1x256xf32, #tpu.memory_space<vmem>>, %arg6: memref<256x4xf32, #tpu.memory_space<vmem>>, %arg7: memref<4x256xf32, #tpu.memory_space<vmem>>, %arg8: memref<1x4xf32, #tpu.memory_space<vmem>>, %arg9: memref<1x4xf32, #tpu.memory_space<vmem>>, %arg10: memref<256x128xbf16, #tpu.memory_space<vmem>>, %arg11: memref<1x128xf32, #tpu.memory_space<vmem>>, %arg12: memref<128x8xf32, #tpu.memory_space<vmem>>, %arg13: memref<8x128xf32, #tpu.memory_space<vmem>>, %arg14: memref<1x8xf32, #tpu.memory_space<vmem>>, %arg15: memref<1x8xf32, #tpu.memory_space<vmem>>, %arg16: memref<128x1xf32, #tpu.memory_space<vmem>>, %arg17: memref<1x1xf32, #tpu.memory_space<vmem>>, %arg18: memref<8x1xf32, #tpu.memory_space<vmem>>) attributes {dimension_semantics = [#tpu.dimension_semantics<arbitrary>], iteration_bounds = array<i64: 1>, scalar_prefetch = 0 : i64, scratch_operands = 0 : i64, tpu.core_type = #tpu.core_type<tc>, window_params = [{pipeline_mode = #tpu.pipeline_mode<synchronous>, transform_indices = @transform_0, window_bounds = array<i64: 8, 896>}, {pipeline_mode = #tpu.pipeline_mode<synchronous>, transform_indices = @transform_1, window_bounds = array<i64: 896, 512>}, {pipeline_mode = #tpu.pipeline_mode<synchronous>, transform_indices = @transform_2, window_bounds = array<i64: 1, 512>}, {pipeline_mode = #tpu.pipeline_mode<synchronous>, transform_indices = @transform_3, window_bounds = array<i64: 512, 256>}, {pipeline_mode = #tpu.pipeline_mode<synchronous>, transform_indices = @transform_4, window_bounds = array<i64: 1, 256>}, {pipeline_mode = #tpu.pipeline_mode<synchronous>, transform_indices = @transform_5, window_bounds = array<i64: 256, 4>}, {pipeline_mode = #tpu.pipeline_mode<synchronous>, transform_indices = @transform_6, window_bounds = array<i64: 4, 256>}, {pipeline_mode = #tpu.pipeline_mode<synchronous>, transform_indices = @transform_7, window_bounds = array<i64: 1, 4>}, {pipeline_mode = #tpu.pipeline_mode<synchronous>, transform_indices = @transform_8, window_bounds = array<i64: 1, 4>}, {pipeline_mode = #tpu.pipeline_mode<synchronous>, transform_indices = @transform_9, window_bounds = array<i64: 256, 128>}, {pipeline_mode = #tpu.pipeline_mode<synchronous>, transform_indices = @transform_10, window_bounds = array<i64: 1, 128>}, {pipeline_mode = #tpu.pipeline_mode<synchronous>, transform_indices = @transform_11, window_bounds = array<i64: 128, 8>}, {pipeline_mode = #tpu.pipeline_mode<synchronous>, transform_indices = @transform_12, window_bounds = array<i64: 8, 128>}, {pipeline_mode = #tpu.pipeline_mode<synchronous>, transform_indices = @transform_13, window_bounds = array<i64: 1, 8>}, {pipeline_mode = #tpu.pipeline_mode<synchronous>, transform_indices = @transform_14, window_bounds = array<i64: 1, 8>}, {pipeline_mode = #tpu.pipeline_mode<synchronous>, transform_indices = @transform_15, window_bounds = array<i64: 128, 1>}, {pipeline_mode = #tpu.pipeline_mode<synchronous>, transform_indices = @transform_16, window_bounds = array<i64: 1, 1>}, {pipeline_mode = #tpu.pipeline_mode<synchronous>, transform_indices = @transform_17, window_bounds = array<i64: 8, 1>}]} {
    %c0 = arith.constant 0 : index
    %c0_0 = arith.constant 0 : index
    %0 = vector.load %arg1[%c0, %c0_0] : memref<8x896xbf16, #tpu.memory_space<vmem>>, vector<8x896xbf16>
    %c0_1 = arith.constant 0 : index
    %c0_2 = arith.constant 0 : index
    %1 = vector.load %arg2[%c0_1, %c0_2] : memref<896x512xbf16, #tpu.memory_space<vmem>>, vector<896x512xbf16>
    %cst = arith.constant dense<0.000000e+00> : vector<8x512xf32>
    %2 = tpu.matmul %0, %1, %cst {dimension_numbers = #tpu.dot_dimension_numbers<[1], [0], [0], [1], [0, 0, 1, 1], [], []>} : vector<8x896xbf16>, vector<896x512xbf16>, vector<8x512xf32> -> vector<8x512xf32>
    %c0_3 = arith.constant 0 : index
    %c0_4 = arith.constant 0 : index
    %3 = vector.load %arg3[%c0_3, %c0_4] : memref<1x512xf32, #tpu.memory_space<vmem>>, vector<1x512xf32>
    %4 = vector.broadcast %3 : vector<1x512xf32> to vector<8x512xf32>
    %5 = arith.addf %2, %4 : vector<8x512xf32>
    %cst_5 = arith.constant 0.000000e+00 : f32
    %6 = vector.broadcast %cst_5 : f32 to vector<8x512xf32>
    %7 = arith.cmpf ogt, %5, %6 : vector<8x512xf32>
    %cst_6 = arith.constant 2.000000e-01 : f32
    %8 = vector.broadcast %cst_6 : f32 to vector<8x512xf32>
    %9 = arith.mulf %8, %5 : vector<8x512xf32>
    %10 = arith.select %7, %5, %9 : vector<8x512xi1>, vector<8x512xf32>
    %11 = arith.truncf %10 : vector<8x512xf32> to vector<8x512xbf16>
    %c0_7 = arith.constant 0 : index
    %c0_8 = arith.constant 0 : index
    %12 = vector.load %arg4[%c0_7, %c0_8] : memref<512x256xbf16, #tpu.memory_space<vmem>>, vector<512x256xbf16>
    %cst_9 = arith.constant dense<0.000000e+00> : vector<8x256xf32>
    %13 = tpu.matmul %11, %12, %cst_9 {dimension_numbers = #tpu.dot_dimension_numbers<[1], [0], [0], [1], [0, 0, 1, 1], [], []>} : vector<8x512xbf16>, vector<512x256xbf16>, vector<8x256xf32> -> vector<8x256xf32>
    %c0_10 = arith.constant 0 : index
    %c0_11 = arith.constant 0 : index
    %14 = vector.load %arg5[%c0_10, %c0_11] : memref<1x256xf32, #tpu.memory_space<vmem>>, vector<1x256xf32>
    %15 = vector.broadcast %14 : vector<1x256xf32> to vector<8x256xf32>
    %16 = arith.addf %13, %15 : vector<8x256xf32>
    %c0_12 = arith.constant 0 : index
    %c0_13 = arith.constant 0 : index
    %17 = vector.load %arg6[%c0_12, %c0_13] : memref<256x4xf32, #tpu.memory_space<vmem>>, vector<256x4xf32>
    %c0_14 = arith.constant 0 : index
    %c0_15 = arith.constant 0 : index
    %18 = vector.load %arg7[%c0_14, %c0_15] : memref<4x256xf32, #tpu.memory_space<vmem>>, vector<4x256xf32>
    %c0_16 = arith.constant 0 : index
    %c0_17 = arith.constant 0 : index
    %19 = vector.load %arg8[%c0_16, %c0_17] : memref<1x4xf32, #tpu.memory_space<vmem>>, vector<1x4xf32>
    %c0_18 = arith.constant 0 : index
    %c0_19 = arith.constant 0 : index
    %20 = vector.load %arg9[%c0_18, %c0_19] : memref<1x4xf32, #tpu.memory_space<vmem>>, vector<1x4xf32>
    %21 = vector.extract_strided_slice %16 {offsets = [0, 0], sizes = [2, 256], strides = [1, 1]} : vector<8x256xf32> to vector<2x256xf32>
    %cst_20 = arith.constant dense<0.000000e+00> : vector<2x4xf32>
    %22 = tpu.matmul %21, %17, %cst_20 {dimension_numbers = #tpu.dot_dimension_numbers<[1], [0], [0], [1], [0, 0, 1, 1], [], []>} : vector<2x256xf32>, vector<256x4xf32>, vector<2x4xf32> -> vector<2x4xf32>
    %cst_21 = arith.constant dense<0.000000e+00> : vector<4xf32>
    %23 = vector.multi_reduction <add>, %22, %cst_21 [0] : vector<2x4xf32> to vector<4xf32>
    %24 = vector.shape_cast %23 : vector<4xf32> to vector<1x4xf32>
    %cst_22 = arith.constant 0.0102040814 : f32
    %25 = vector.broadcast %cst_22 : f32 to vector<1x4xf32>
    %26 = arith.mulf %24, %25 : vector<1x4xf32>
    %cst_23 = arith.constant dense<0.000000e+00> : vector<1x256xf32>
    %27 = tpu.matmul %26, %18, %cst_23 {dimension_numbers = #tpu.dot_dimension_numbers<[1], [0], [0], [1], [0, 0, 1, 1], [], []>} : vector<1x4xf32>, vector<4x256xf32>, vector<1x256xf32> -> vector<1x256xf32>
    %28 = vector.broadcast %27 : vector<1x256xf32> to vector<2x256xf32>
    %29 = arith.subf %21, %28 : vector<2x256xf32>
    %30 = arith.mulf %29, %29 : vector<2x256xf32>
    %cst_24 = arith.constant dense<0.000000e+00> : vector<2x4xf32>
    %31 = tpu.matmul %30, %17, %cst_24 {dimension_numbers = #tpu.dot_dimension_numbers<[1], [0], [0], [1], [0, 0, 1, 1], [], []>} : vector<2x256xf32>, vector<256x4xf32>, vector<2x4xf32> -> vector<2x4xf32>
    %cst_25 = arith.constant dense<0.000000e+00> : vector<4xf32>
    %32 = vector.multi_reduction <add>, %31, %cst_25 [0] : vector<2x4xf32> to vector<4xf32>
    %33 = vector.shape_cast %32 : vector<4xf32> to vector<1x4xf32>
    %cst_26 = arith.constant 0.0102040814 : f32
    %34 = vector.broadcast %cst_26 : f32 to vector<1x4xf32>
    %35 = arith.mulf %33, %34 : vector<1x4xf32>
    %cst_27 = arith.constant 9.99999974E-6 : f32
    %36 = vector.broadcast %cst_27 : f32 to vector<1x4xf32>
    %37 = arith.addf %35, %36 : vector<1x4xf32>
    %38 = math.rsqrt %37 : vector<1x4xf32>
    %39 = arith.mulf %38, %19 : vector<1x4xf32>
    %40 = arith.mulf %26, %39 : vector<1x4xf32>
    %41 = arith.subf %20, %40 : vector<1x4xf32>
    %cst_28 = arith.constant dense<0.000000e+00> : vector<1x256xf32>
    %42 = tpu.matmul %39, %18, %cst_28 {dimension_numbers = #tpu.dot_dimension_numbers<[1], [0], [0], [1], [0, 0, 1, 1], [], []>} : vector<1x4xf32>, vector<4x256xf32>, vector<1x256xf32> -> vector<1x256xf32>
    %cst_29 = arith.constant dense<0.000000e+00> : vector<1x256xf32>
    %43 = tpu.matmul %41, %18, %cst_29 {dimension_numbers = #tpu.dot_dimension_numbers<[1], [0], [0], [1], [0, 0, 1, 1], [], []>} : vector<1x4xf32>, vector<4x256xf32>, vector<1x256xf32> -> vector<1x256xf32>
    %44 = vector.broadcast %42 : vector<1x256xf32> to vector<8x256xf32>
    %45 = arith.mulf %16, %44 : vector<8x256xf32>
    %46 = vector.broadcast %43 : vector<1x256xf32> to vector<8x256xf32>
    %47 = arith.addf %45, %46 : vector<8x256xf32>
    %cst_30 = arith.constant 0.000000e+00 : f32
    %48 = vector.broadcast %cst_30 : f32 to vector<8x256xf32>
    %49 = arith.cmpf ogt, %47, %48 : vector<8x256xf32>
    %cst_31 = arith.constant 2.000000e-01 : f32
    %50 = vector.broadcast %cst_31 : f32 to vector<8x256xf32>
    %51 = arith.mulf %50, %47 : vector<8x256xf32>
    %52 = arith.select %49, %47, %51 : vector<8x256xi1>, vector<8x256xf32>
    %53 = arith.truncf %52 : vector<8x256xf32> to vector<8x256xbf16>
    %c0_32 = arith.constant 0 : index
    %c0_33 = arith.constant 0 : index
    %54 = vector.load %arg10[%c0_32, %c0_33] : memref<256x128xbf16, #tpu.memory_space<vmem>>, vector<256x128xbf16>
    %cst_34 = arith.constant dense<0.000000e+00> : vector<8x128xf32>
    %55 = tpu.matmul %53, %54, %cst_34 {dimension_numbers = #tpu.dot_dimension_numbers<[1], [0], [0], [1], [0, 0, 1, 1], [], []>} : vector<8x256xbf16>, vector<256x128xbf16>, vector<8x128xf32> -> vector<8x128xf32>
    %c0_35 = arith.constant 0 : index
    %c0_36 = arith.constant 0 : index
    %56 = vector.load %arg11[%c0_35, %c0_36] : memref<1x128xf32, #tpu.memory_space<vmem>>, vector<1x128xf32>
    %57 = vector.broadcast %56 : vector<1x128xf32> to vector<8x128xf32>
    %58 = arith.addf %55, %57 : vector<8x128xf32>
    %c0_37 = arith.constant 0 : index
    %c0_38 = arith.constant 0 : index
    %59 = vector.load %arg12[%c0_37, %c0_38] : memref<128x8xf32, #tpu.memory_space<vmem>>, vector<128x8xf32>
    %c0_39 = arith.constant 0 : index
    %c0_40 = arith.constant 0 : index
    %60 = vector.load %arg13[%c0_39, %c0_40] : memref<8x128xf32, #tpu.memory_space<vmem>>, vector<8x128xf32>
    %c0_41 = arith.constant 0 : index
    %c0_42 = arith.constant 0 : index
    %61 = vector.load %arg14[%c0_41, %c0_42] : memref<1x8xf32, #tpu.memory_space<vmem>>, vector<1x8xf32>
    %c0_43 = arith.constant 0 : index
    %c0_44 = arith.constant 0 : index
    %62 = vector.load %arg15[%c0_43, %c0_44] : memref<1x8xf32, #tpu.memory_space<vmem>>, vector<1x8xf32>
    %63 = vector.extract_strided_slice %58 {offsets = [0, 0], sizes = [2, 128], strides = [1, 1]} : vector<8x128xf32> to vector<2x128xf32>
    %cst_45 = arith.constant dense<0.000000e+00> : vector<2x8xf32>
    %64 = tpu.matmul %63, %59, %cst_45 {dimension_numbers = #tpu.dot_dimension_numbers<[1], [0], [0], [1], [0, 0, 1, 1], [], []>} : vector<2x128xf32>, vector<128x8xf32>, vector<2x8xf32> -> vector<2x8xf32>
    %cst_46 = arith.constant dense<0.000000e+00> : vector<8xf32>
    %65 = vector.multi_reduction <add>, %64, %cst_46 [0] : vector<2x8xf32> to vector<8xf32>
    %66 = vector.shape_cast %65 : vector<8xf32> to vector<1x8xf32>
    %cst_47 = arith.constant 3.125000e-02 : f32
    %67 = vector.broadcast %cst_47 : f32 to vector<1x8xf32>
    %68 = arith.mulf %66, %67 : vector<1x8xf32>
    %cst_48 = arith.constant dense<0.000000e+00> : vector<1x128xf32>
    %69 = tpu.matmul %68, %60, %cst_48 {dimension_numbers = #tpu.dot_dimension_numbers<[1], [0], [0], [1], [0, 0, 1, 1], [], []>} : vector<1x8xf32>, vector<8x128xf32>, vector<1x128xf32> -> vector<1x128xf32>
    %70 = vector.broadcast %69 : vector<1x128xf32> to vector<2x128xf32>
    %71 = arith.subf %63, %70 : vector<2x128xf32>
    %72 = arith.mulf %71, %71 : vector<2x128xf32>
    %cst_49 = arith.constant dense<0.000000e+00> : vector<2x8xf32>
    %73 = tpu.matmul %72, %59, %cst_49 {dimension_numbers = #tpu.dot_dimension_numbers<[1], [0], [0], [1], [0, 0, 1, 1], [], []>} : vector<2x128xf32>, vector<128x8xf32>, vector<2x8xf32> -> vector<2x8xf32>
    %cst_50 = arith.constant dense<0.000000e+00> : vector<8xf32>
    %74 = vector.multi_reduction <add>, %73, %cst_50 [0] : vector<2x8xf32> to vector<8xf32>
    %75 = vector.shape_cast %74 : vector<8xf32> to vector<1x8xf32>
    %cst_51 = arith.constant 3.125000e-02 : f32
    %76 = vector.broadcast %cst_51 : f32 to vector<1x8xf32>
    %77 = arith.mulf %75, %76 : vector<1x8xf32>
    %cst_52 = arith.constant 9.99999974E-6 : f32
    %78 = vector.broadcast %cst_52 : f32 to vector<1x8xf32>
    %79 = arith.addf %77, %78 : vector<1x8xf32>
    %80 = math.rsqrt %79 : vector<1x8xf32>
    %81 = arith.mulf %80, %61 : vector<1x8xf32>
    %82 = arith.mulf %68, %81 : vector<1x8xf32>
    %83 = arith.subf %62, %82 : vector<1x8xf32>
    %cst_53 = arith.constant dense<0.000000e+00> : vector<1x128xf32>
    %84 = tpu.matmul %81, %60, %cst_53 {dimension_numbers = #tpu.dot_dimension_numbers<[1], [0], [0], [1], [0, 0, 1, 1], [], []>} : vector<1x8xf32>, vector<8x128xf32>, vector<1x128xf32> -> vector<1x128xf32>
    %cst_54 = arith.constant dense<0.000000e+00> : vector<1x128xf32>
    %85 = tpu.matmul %83, %60, %cst_54 {dimension_numbers = #tpu.dot_dimension_numbers<[1], [0], [0], [1], [0, 0, 1, 1], [], []>} : vector<1x8xf32>, vector<8x128xf32>, vector<1x128xf32> -> vector<1x128xf32>
    %86 = vector.broadcast %84 : vector<1x128xf32> to vector<8x128xf32>
    %87 = arith.mulf %58, %86 : vector<8x128xf32>
    %88 = vector.broadcast %85 : vector<1x128xf32> to vector<8x128xf32>
    %89 = arith.addf %87, %88 : vector<8x128xf32>
    %cst_55 = arith.constant 0.000000e+00 : f32
    %90 = vector.broadcast %cst_55 : f32 to vector<8x128xf32>
    %91 = arith.cmpf ogt, %89, %90 : vector<8x128xf32>
    %cst_56 = arith.constant 2.000000e-01 : f32
    %92 = vector.broadcast %cst_56 : f32 to vector<8x128xf32>
    %93 = arith.mulf %92, %89 : vector<8x128xf32>
    %94 = arith.select %91, %89, %93 : vector<8x128xi1>, vector<8x128xf32>
    %c0_57 = arith.constant 0 : index
    %c0_58 = arith.constant 0 : index
    %95 = vector.load %arg16[%c0_57, %c0_58] : memref<128x1xf32, #tpu.memory_space<vmem>>, vector<128x1xf32>
    %cst_59 = arith.constant dense<0.000000e+00> : vector<8x1xf32>
    %96 = tpu.matmul %94, %95, %cst_59 {dimension_numbers = #tpu.dot_dimension_numbers<[1], [0], [0], [1], [0, 0, 1, 1], [], []>} : vector<8x128xf32>, vector<128x1xf32>, vector<8x1xf32> -> vector<8x1xf32>
    %c0_60 = arith.constant 0 : index
    %c0_61 = arith.constant 0 : index
    %97 = vector.load %arg17[%c0_60, %c0_61] : memref<1x1xf32, #tpu.memory_space<vmem>>, vector<1x1xf32>
    %98 = vector.broadcast %97 : vector<1x1xf32> to vector<8x1xf32>
    %99 = arith.addf %96, %98 : vector<8x1xf32>
    %cst_62 = arith.constant 0.000000e+00 : f32
    %100 = vector.broadcast %cst_62 : f32 to vector<8x1xf32>
    %101 = arith.subf %100, %99 : vector<8x1xf32>
    %102 = math.exp %101 : vector<8x1xf32>
    %cst_63 = arith.constant 1.000000e+00 : f32
    %103 = vector.broadcast %cst_63 : f32 to vector<8x1xf32>
    %104 = arith.addf %103, %102 : vector<8x1xf32>
    %105 = tpu.reciprocal %104 {approx = true} : vector<8x1xf32> -> vector<8x1xf32>
    %c0_64 = arith.constant 0 : index
    %c0_65 = arith.constant 0 : index
    %106 = vector.load %arg18[%c0_64, %c0_65] : memref<8x1xf32, #tpu.memory_space<vmem>>, vector<8x1xf32>
    tpu.vector_store %arg18[%c0_64, %c0_65], %105 {strides = array<i32>} : memref<8x1xf32, #tpu.memory_space<vmem>>, vector<8x1xf32>,
    return
  }
  func.func @transform_0(%arg0: i32) -> (i32, i32) {
    %c0_i32 = arith.constant 0 : i32
    %c0_i32_0 = arith.constant 0 : i32
    %c0_i32_1 = arith.constant 0 : i32
    return %c0_i32, %c0_i32_0 : i32, i32
  }
  func.func @transform_1(%arg0: i32) -> (i32, i32) {
    %c0_i32 = arith.constant 0 : i32
    %c0_i32_0 = arith.constant 0 : i32
    %c0_i32_1 = arith.constant 0 : i32
    return %c0_i32, %c0_i32_0 : i32, i32
  }
  func.func @transform_2(%arg0: i32) -> (i32, i32) {
    %c0_i32 = arith.constant 0 : i32
    %c0_i32_0 = arith.constant 0 : i32
    %c0_i32_1 = arith.constant 0 : i32
    return %c0_i32, %c0_i32_0 : i32, i32
  }
  func.func @transform_3(%arg0: i32) -> (i32, i32) {
    %c0_i32 = arith.constant 0 : i32
    %c0_i32_0 = arith.constant 0 : i32
    %c0_i32_1 = arith.constant 0 : i32
    return %c0_i32, %c0_i32_0 : i32, i32
  }
  func.func @transform_4(%arg0: i32) -> (i32, i32) {
    %c0_i32 = arith.constant 0 : i32
    %c0_i32_0 = arith.constant 0 : i32
    %c0_i32_1 = arith.constant 0 : i32
    return %c0_i32, %c0_i32_0 : i32, i32
  }
  func.func @transform_5(%arg0: i32) -> (i32, i32) {
    %c0_i32 = arith.constant 0 : i32
    %c0_i32_0 = arith.constant 0 : i32
    %c0_i32_1 = arith.constant 0 : i32
    return %c0_i32, %c0_i32_0 : i32, i32
  }
  func.func @transform_6(%arg0: i32) -> (i32, i32) {
    %c0_i32 = arith.constant 0 : i32
    %c0_i32_0 = arith.constant 0 : i32
    %c0_i32_1 = arith.constant 0 : i32
    return %c0_i32, %c0_i32_0 : i32, i32
  }
  func.func @transform_7(%arg0: i32) -> (i32, i32) {
    %c0_i32 = arith.constant 0 : i32
    %c0_i32_0 = arith.constant 0 : i32
    %c0_i32_1 = arith.constant 0 : i32
    return %c0_i32, %c0_i32_0 : i32, i32
  }
  func.func @transform_8(%arg0: i32) -> (i32, i32) {
    %c0_i32 = arith.constant 0 : i32
    %c0_i32_0 = arith.constant 0 : i32
    %c0_i32_1 = arith.constant 0 : i32
    return %c0_i32, %c0_i32_0 : i32, i32
  }
  func.func @transform_9(%arg0: i32) -> (i32, i32) {
    %c0_i32 = arith.constant 0 : i32
    %c0_i32_0 = arith.constant 0 : i32
    %c0_i32_1 = arith.constant 0 : i32
    return %c0_i32, %c0_i32_0 : i32, i32
  }
  func.func @transform_10(%arg0: i32) -> (i32, i32) {
    %c0_i32 = arith.constant 0 : i32
    %c0_i32_0 = arith.constant 0 : i32
    %c0_i32_1 = arith.constant 0 : i32
    return %c0_i32, %c0_i32_0 : i32, i32
  }
  func.func @transform_11(%arg0: i32) -> (i32, i32) {
    %c0_i32 = arith.constant 0 : i32
    %c0_i32_0 = arith.constant 0 : i32
    %c0_i32_1 = arith.constant 0 : i32
    return %c0_i32, %c0_i32_0 : i32, i32
  }
  func.func @transform_12(%arg0: i32) -> (i32, i32) {
    %c0_i32 = arith.constant 0 : i32
    %c0_i32_0 = arith.constant 0 : i32
    %c0_i32_1 = arith.constant 0 : i32
    return %c0_i32, %c0_i32_0 : i32, i32
  }
  func.func @transform_13(%arg0: i32) -> (i32, i32) {
    %c0_i32 = arith.constant 0 : i32
    %c0_i32_0 = arith.constant 0 : i32
    %c0_i32_1 = arith.constant 0 : i32
    return %c0_i32, %c0_i32_0 : i32, i32
  }
  func.func @transform_14(%arg0: i32) -> (i32, i32) {
    %c0_i32 = arith.constant 0 : i32
    %c0_i32_0 = arith.constant 0 : i32
    %c0_i32_1 = arith.constant 0 : i32
    return %c0_i32, %c0_i32_0 : i32, i32
  }
  func.func @transform_15(%arg0: i32) -> (i32, i32) {
    %c0_i32 = arith.constant 0 : i32
    %c0_i32_0 = arith.constant 0 : i32
    %c0_i32_1 = arith.constant 0 : i32
    return %c0_i32, %c0_i32_0 : i32, i32
  }
  func.func @transform_16(%arg0: i32) -> (i32, i32) {
    %c0_i32 = arith.constant 0 : i32
    %c0_i32_0 = arith.constant 0 : i32
    %c0_i32_1 = arith.constant 0 : i32
    return %c0_i32, %c0_i32_0 : i32, i32
  }
  func.func @transform_17(%arg0: i32) -> (i32, i32) {
    %c0_i32 = arith.constant 0 : i32
    %c0_i32_0 = arith.constant 0 : i32
    %c0_i32_1 = arith.constant 0 : i32
    return %c0_i32, %c0_i32_0 : i32, i32
  }
}

</mosaic_0001>

<bundles_post_ra>
// kernel: forward.1
= control target key start
LH: loop header
LB: loop body
LE: loop exit
PB: predicated region body
PF: predicated region fallthrough
CT: control target
= control target key end

     0   :  { %s5280_s0 = inlined_call_operand.vmem [shape: bf16[8,896], index: 0, kind: input, shape index: {}]   ;;  %s5281_s1 = inlined_call_operand.hbm [shape: bf16[896,512], index: 1, kind: input, shape index: {}]   ;;  %s5282_s2 = inlined_call_operand.vmem [shape: f32[1,512], index: 2, kind: input, shape index: {}]   ;;  %s5283_s3 = inlined_call_operand.hbm [shape: bf16[512,256], index: 3, kind: input, shape index: {}]   ;;  %s5284_s4 = inlined_call_operand.vmem [shape: f32[1,256], index: 4, kind: input, shape index: {}]   ;;  %s5285_s5 = inlined_call_operand.vmem [shape: f32[256,4], index: 5, kind: input, shape index: {}]   ;;  %s5286_s6 = inlined_call_operand.vmem [shape: f32[4,256], index: 6, kind: input, shape index: {}]   ;;  %s5287_s7 = inlined_call_operand.vmem [shape: f32[1,4], index: 7, kind: input, shape index: {}]   ;;  %s5288_s8 = inlined_call_operand.vmem [shape: f32[1,4], index: 8, kind: input, shape index: {}]   ;;  %s5289_s9 = inlined_call_operand.vmem [shape: bf16[256,128], index: 9, kind: input, shape index: {}]   ;;  %s5290_s10 = inlined_call_operand.vmem [shape: f32[1,128], index: 10, kind: input, shape index: {}]   ;;  %s5291_s11 = inlined_call_operand.vmem [shape: f32[128,8], index: 11, kind: input, shape index: {}]   ;;  %s5292_s12 = inlined_call_operand.vmem [shape: f32[8,128], index: 12, kind: input, shape index: {}]   ;;  %s5293_s13 = inlined_call_operand.vmem [shape: f32[1,8], index: 13, kind: input, shape index: {}]   ;;  %s5294_s14 = inlined_call_operand.vmem [shape: f32[1,8], index: 14, kind: input, shape index: {}]   ;;  %s5295_s15 = inlined_call_operand.vmem [shape: f32[128,1], index: 15, kind: input, shape index: {}]   ;;  %s5296_s16 = inlined_call_operand.<no memory space> [shape: f32[1,1], index: 16, kind: input, shape index: {}]   ;;  %s5297_s17 = inlined_call_operand.vmem [shape: f32[8,1], index: 17, kind: output, shape index: {}]  }
   0x1   :  { %5299 = sst [smem:[#allocation9_spill]] %s5280_s0  ;;  %v22_v0 = vstv %s5296_s16 }
   0x2   :  { %5300 = sst [smem:[#allocation10_spill]] %s5281_s1  ;;  %23 = vst [vmem:[#allocation2] sm:$0x1] %v22_v0 }
   0x3   :  { %24 = vsyncpa [#allocation4], 0  ;;  %s5301_s28 = sld [smem:[#allocation10_spill]] }
   0x9   :  { %s32_s29 = sshll.u32 %s5301_s28, 4  ;;  %s33_s29 = int_to_ptr.hbm [resolvable:$true] %s32_s29 }
   0xa   :  { %25 = vsyncpa [#allocation6], 0  ;;  %s4652_s0 = smov [#allocation3]   ;;  %s47_s1 = sshll.u32 %s5283_s3, 4  ;;  %s48_s1 = int_to_ptr.hbm [resolvable:$true] %s47_s1 }
   0xb   :  { %s34_s30 = sshll.u32 %s4652_s0, 4  ;;  %s4653_s20 = smov 256   ;;  %s35_s30 = int_to_ptr.vmem [resolvable:$true] %s34_s30 }
   0xc   :  { %s4654_s21 = smov 16   ;;  %s4655_s16 = smov [#allocation5]  }
   0xd   :  { %40 = dma.hbm_to_vmem [thread:$0]  %s33_s29, 28672, %s35_s30, [#allocation4], %s4653_s20, %s4653_s20, %s4654_s21  }
   0xe   :  { %s49_s22 = sshll.u32 %s4655_s16, 4  ;;  %s4656_s23 = smov 128   ;;  %s50_s22 = int_to_ptr.vmem [resolvable:$true] %s49_s22 }
   0xf   :  { %s4657_s24 = smov 8  }
  0x10   :  { %55 = dma.hbm_to_vmem [thread:$0]  %s48_s1, 8192, %s50_s22, [#allocation6], %s4656_s23, %s4656_s23, %s4657_s24  }
  0x11   :  { %4648 = dma.done.wait [#allocation4], 28672  }
  0x12   :  { %4649 = vsyncadd [#allocation4], 4294938624 }
  0x13   :  { %4650 = dma.done.wait [#allocation6], 8192  }
  0x14   :  { %4651 = vsyncadd [#allocation6], 4294959104  ;;  %v3163_v1 = vld [vmem:[#allocation3 + $0xe0] sm:$0xf]  ;;  %v4310_v2 = vld [vmem:[#allocation3 + $0xec] sm:$0xf0] }
  0x15   :  { %v3291_v3 = vld [vmem:[#allocation3 + $0x1e0] sm:$0xf]  ;;  %v3164_v4 = vor.u32 %v4310_v2, %v3163_v1  ;;  %v4342_v5 = vld [vmem:[#allocation3 + $0x1ec] sm:$0xf0]  ;;  %s5302_s26 = sld [smem:[#allocation9_spill]]  ;;  %vm2439_vm4 = vcmask 1043456  }
  0x16   :  { %v3419_v6 = vld [vmem:[#allocation3 + $0x2e0] sm:$0xf]  ;;  %v4374_v7 = vld [vmem:[#allocation3 + $0x2ec] sm:$0xf0]  ;;  %v3292_v8 = vor.u32 %v4342_v5, %v3291_v3  ;;  %vm2422_vm5 = vcmask 25600   ;;  %vm2435_vm6 = vcmask 31744  }
  0x17   :  { %v3420_v9 = vor.u32 %v4374_v7, %v3419_v6  ;;  %v3547_v10 = vld [vmem:[#allocation3 + $0x3e0] sm:$0xf]  ;;  %v4406_v11 = vld [vmem:[#allocation3 + $0x3ec] sm:$0xf0]  ;;  %1473 = vmatpush.bf16.msra.mxu0 %v3164_v4  ;;  %vm2865_vm12 = vcmask 58368   ;;  %vm2874_vm13 = vcmask 64512  }
  0x18   :  { %v3147_v12 = vld [vmem:[#allocation3 + $0xc0] sm:$0xf]  ;;  %v3548_v13 = vor.u32 %v4406_v11, %v3547_v10  ;;  %v4306_v14 = vld [vmem:[#allocation3 + $0xcc] sm:$0xf0]  ;;  %1486 = vmatpush.bf16.msra.mxu1 %v3292_v8 }
  0x19   :  { %v3275_v15 = vld [vmem:[#allocation3 + $0x1c0] sm:$0xf]  ;;  %v4338_v16 = vld [vmem:[#allocation3 + $0x1cc] sm:$0xf0]  ;;  %1499 = vmatpush.bf16.msra.mxu2 %v3420_v9  ;;  %v3148_v17 = vor.u32 %v4306_v14, %v3147_v12 }
  0x1a   :  { %v3276_v18 = vor.u32 %v4338_v16, %v3275_v15  ;;  %v3403_v19 = vld [vmem:[#allocation3 + $0x2c0] sm:$0xf]  ;;  %v4370_v20 = vld [vmem:[#allocation3 + $0x2cc] sm:$0xf0]  ;;  %1512 = vmatpush.bf16.msra.mxu3 %v3548_v13 }
  0x1b   :  { %v3531_v21 = vld [vmem:[#allocation3 + $0x3c0] sm:$0xf]  ;;  %v3404_v22 = vor.u32 %v4370_v20, %v3403_v19  ;;  %v4402_v23 = vld [vmem:[#allocation3 + $0x3cc] sm:$0xf0]  ;;  %1474 = vmatpush.bf16.msra.mxu0 %v3148_v17 }
  0x1c   :  { %v3131_v24 = vld [vmem:[#allocation3 + $0xa0] sm:$0xf]  ;;  %v4302_v25 = vld [vmem:[#allocation3 + $0xac] sm:$0xf0]  ;;  %v3532_v26 = vor.u32 %v4402_v23, %v3531_v21  ;;  %1487 = vmatpush.bf16.msra.mxu1 %v3276_v18 }
  0x1d   :  { %v3259_v27 = vld [vmem:[#allocation3 + $0x1a0] sm:$0xf]  ;;  %v4334_v28 = vld [vmem:[#allocation3 + $0x1ac] sm:$0xf0]  ;;  %v3132_v30 = vor.u32 %v4302_v25, %v3131_v24  ;;  %1500 = vmatpush.bf16.msra.mxu2 %v3404_v22 }
  0x1e   :  { %v3387_v29 = vld [vmem:[#allocation3 + $0x2a0] sm:$0xf]  ;;  %v4366_v31 = vld [vmem:[#allocation3 + $0x2ac] sm:$0xf0]  ;;  %v3260_v34 = vor.u32 %v4334_v28, %v3259_v27  ;;  %1513 = vmatpush.bf16.msra.mxu3 %v3532_v26 }
  0x1f   :  { %v3515_v32 = vld [vmem:[#allocation3 + $0x3a0] sm:$0xf]  ;;  %v4398_v33 = vld [vmem:[#allocation3 + $0x3ac] sm:$0xf0]  ;;  %v3388_v35 = vor.u32 %v4366_v31, %v3387_v29  ;;  %1475 = vmatpush.bf16.msra.mxu0 %v3132_v30 }
  0x20   :  { %v3115_v36 = vld [vmem:[#allocation3 + $0x80] sm:$0xf]  ;;  %v4298_v37 = vld [vmem:[#allocation3 + $0x8c] sm:$0xf0]  ;;  %v3516_v39 = vor.u32 %v4398_v33, %v3515_v32  ;;  %1488 = vmatpush.bf16.msra.mxu1 %v3260_v34 }
  0x21   :  { %v3243_v38 = vld [vmem:[#allocation3 + $0x180] sm:$0xf]  ;;  %v4330_v40 = vld [vmem:[#allocation3 + $0x18c] sm:$0xf0]  ;;  %v3116_v45 = vor.u32 %v4298_v37, %v3115_v36  ;;  %1501 = vmatpush.bf16.msra.mxu2 %v3388_v35 }
  0x22   :  { %v3371_v41 = vld [vmem:[#allocation3 + $0x280] sm:$0xf]  ;;  %v4362_v42 = vld [vmem:[#allocation3 + $0x28c] sm:$0xf0]  ;;  %v3244_v46 = vor.u32 %v4330_v40, %v3243_v38  ;;  %1514 = vmatpush.bf16.msra.mxu3 %v3516_v39  ;;  %v4308_v38 = vld [vmem:[#allocation3 + $0xe4] sm:$0xf] }
  0x23   :  { %v3499_v43 = vld [vmem:[#allocation3 + $0x380] sm:$0xf]  ;;  %v4394_v44 = vld [vmem:[#allocation3 + $0x38c] sm:$0xf0]  ;;  %v3372_v47 = vor.u32 %v4362_v42, %v3371_v41  ;;  %1476 = vmatpush.bf16.msra.mxu0 %v3116_v45  ;;  %v3165_v39 = vld [vmem:[#allocation3 + $0xf0] sm:$0xf0] }
  0x24   :  { %v3099_v48 = vld [vmem:[#allocation3 + $0x60] sm:$0xf]  ;;  %v4294_v49 = vld [vmem:[#allocation3 + $0x6c] sm:$0xf0]  ;;  %v3500_v51 = vor.u32 %v4394_v44, %v3499_v43  ;;  %1489 = vmatpush.bf16.msra.mxu1 %v3244_v46 }
  0x25   :  { %v3227_v50 = vld [vmem:[#allocation3 + $0x160] sm:$0xf]  ;;  %v4326_v52 = vld [vmem:[#allocation3 + $0x16c] sm:$0xf0]  ;;  %v3100_v57 = vor.u32 %v4294_v49, %v3099_v48  ;;  %1502 = vmatpush.bf16.msra.mxu2 %v3372_v47  ;;  %v3168_v47 = vor.u32 %v4308_v38, %v3165_v39 }
  0x26   :  { %v3355_v53 = vld [vmem:[#allocation3 + $0x260] sm:$0xf]  ;;  %v4358_v54 = vld [vmem:[#allocation3 + $0x26c] sm:$0xf0]  ;;  %v3228_v58 = vor.u32 %v4326_v52, %v3227_v50  ;;  %1515 = vmatpush.bf16.msra.mxu3 %v3500_v51  ;;  %v4304_v51 = vld [vmem:[#allocation3 + $0xc4] sm:$0xf] }
  0x27   :  { %v3483_v55 = vld [vmem:[#allocation3 + $0x360] sm:$0xf]  ;;  %v4390_v56 = vld [vmem:[#allocation3 + $0x36c] sm:$0xf0]  ;;  %v3356_v59 = vor.u32 %v4358_v54, %v3355_v53  ;;  %1477 = vmatpush.bf16.msra.mxu0 %v3100_v57  ;;  %v3149_v52 = vld [vmem:[#allocation3 + $0xd0] sm:$0xf0] }
  0x28   :  { %v3083_v60 = vld [vmem:[#allocation3 + $0x40] sm:$0xf]  ;;  %v4290_v61 = vld [vmem:[#allocation3 + $0x4c] sm:$0xf0]  ;;  %v3484_v63 = vor.u32 %v4390_v56, %v3483_v55  ;;  %1490 = vmatpush.bf16.msra.mxu1 %v3228_v58 }
  0x29   :  { %v3211_v62 = vld [vmem:[#allocation3 + $0x140] sm:$0xf]  ;;  %v4322_v0 = vld [vmem:[#allocation3 + $0x14c] sm:$0xf0]  ;;  %v3084_v5 = vor.u32 %v4290_v61, %v3083_v60  ;;  %1503 = vmatpush.bf16.msra.mxu2 %v3356_v59  ;;  %v3152_v60 = vor.u32 %v4304_v51, %v3149_v52 }
  0x2a   :  { %v3339_v1 = vld [vmem:[#allocation3 + $0x240] sm:$0xf]  ;;  %v4354_v2 = vld [vmem:[#allocation3 + $0x24c] sm:$0xf0]  ;;  %v3212_v6 = vor.u32 %v4322_v0, %v3211_v62  ;;  %1516 = vmatpush.bf16.msra.mxu3 %v3484_v63 }
  0x2b   :  { %v3467_v3 = vld [vmem:[#allocation3 + $0x340] sm:$0xf]  ;;  %v4386_v4 = vld [vmem:[#allocation3 + $0x34c] sm:$0xf0]  ;;  %v3340_v7 = vor.u32 %v4354_v2, %v3339_v1  ;;  %1478 = vmatpush.bf16.msra.mxu0 %v3084_v5  ;;  %v4300_v2 = vld [vmem:[#allocation3 + $0xa4] sm:$0xf] }
  0x2c   :  { %v3067_v8 = vld [vmem:[#allocation3 + $0x20] sm:$0xf]  ;;  %v4286_v9 = vld [vmem:[#allocation3 + $0x2c] sm:$0xf0]  ;;  %v3468_v11 = vor.u32 %v4386_v4, %v3467_v3  ;;  %1491 = vmatpush.bf16.msra.mxu1 %v3212_v6  ;;  %v3133_v3 = vld [vmem:[#allocation3 + $0xb0] sm:$0xf0] }
  0x2d   :  { %v3195_v10 = vld [vmem:[#allocation3 + $0x120] sm:$0xf]  ;;  %v4318_v12 = vld [vmem:[#allocation3 + $0x12c] sm:$0xf0]  ;;  %v3068_v17 = vor.u32 %v4286_v9, %v3067_v8  ;;  %1504 = vmatpush.bf16.msra.mxu2 %v3340_v7  ;;  %v90_v6 = vld [vmem:[%s5302_s26] sm:$0xff] }
  0x2e   :  { %v3323_v13 = vld [vmem:[#allocation3 + $0x220] sm:$0xf]  ;;  %v4350_v14 = vld [vmem:[#allocation3 + $0x22c] sm:$0xf0]  ;;  %v3196_v20 = vor.u32 %v4318_v12, %v3195_v10  ;;  %1517 = vmatpush.bf16.msra.mxu3 %v3468_v11 }
  0x2f   :  { %v3451_v15 = vld [vmem:[#allocation3 + $0x320] sm:$0xf]  ;;  %v4382_v16 = vld [vmem:[#allocation3 + $0x32c] sm:$0xf0]  ;;  %v3324_v21 = vor.u32 %v4350_v14, %v3323_v13  ;;  %1479 = vmatpush.bf16.msra.mxu0 %v3068_v17  ;;  %v332_v13 = vunpack.c.l.b16 %v90_v6  ;;  %v333_v14 = vunpack.c.h.b16 %v90_v6 }
  0x30   :  { %v3051_v18 = vld [vmem:[#allocation3] sm:$0xf]  ;;  %v4282_v19 = vld [vmem:[#allocation3 + $0xc] sm:$0xf0]  ;;  %v3452_v25 = vor.u32 %v4382_v16, %v3451_v15  ;;  %1492 = vmatpush.bf16.msra.mxu1 %v3196_v20  ;;  %v3136_v15 = vor.u32 %v4300_v2, %v3133_v3  ;;  %v3117_v20 = vld [vmem:[#allocation3 + $0x90] sm:$0xf0] }
  0x31   :  { %v3179_v22 = vld [vmem:[#allocation3 + $0x100] sm:$0xf]  ;;  %v4314_v23 = vld [vmem:[#allocation3 + $0x10c] sm:$0xf0]  ;;  %v3052_v32 = vor.u32 %v4282_v19, %v3051_v18  ;;  %1505 = vmatpush.bf16.msra.mxu2 %v3324_v21  ;;  %v4296_v19 = vld [vmem:[#allocation3 + $0x84] sm:$0xf]  ;;  %v4768_v21 = vpack.c.b16 %v332_v13, %v332_v13 }
  0x32   :  { %v3307_v24 = vld [vmem:[#allocation3 + $0x200] sm:$0xf]  ;;  %v4346_v26 = vld [vmem:[#allocation3 + $0x20c] sm:$0xf0]  ;;  %v3180_v36 = vor.u32 %v4314_v23, %v3179_v22  ;;  %1518 = vmatpush.bf16.msra.mxu3 %v3452_v25  ;;  %v4770_v22 = vpack.c.b16 %v333_v14, %v333_v14  ;;  %v4372_v13 = vld [vmem:[#allocation3 + $0x2e4] sm:$0xf] }
  0x33   :  { %v3435_v27 = vld [vmem:[#allocation3 + $0x300] sm:$0xf]  ;;  %v4378_v28 = vld [vmem:[#allocation3 + $0x30c] sm:$0xf0]  ;;  %v3308_v37 = vor.u32 %v4346_v26, %v3307_v24  ;;  %1480 = vmatpush.bf16.msra.mxu0 %v3052_v32 }
  0x34   :  { %v3675_v29 = vld [vmem:[#allocation3 + $0x4e0] sm:$0xf]  ;;  %v4438_v30 = vld [vmem:[#allocation3 + $0x4ec] sm:$0xf0]  ;;  %v3436_v40 = vor.u32 %v4378_v28, %v3435_v27  ;;  %1493 = vmatpush.bf16.msra.mxu1 %v3180_v36 }
  0x35   :  { %v3803_v31 = vld [vmem:[#allocation3 + $0x5e0] sm:$0xf]  ;;  %v4470_v33 = vld [vmem:[#allocation3 + $0x5ec] sm:$0xf0]  ;;  %v3676_v41 = vor.u32 %v4438_v30, %v3675_v29  ;;  %1506 = vmatpush.bf16.msra.mxu2 %v3308_v37  ;;  %v3120_v29 = vor.u32 %v4296_v19, %v3117_v20 }
  0x36   :  { %v3931_v34 = vld [vmem:[#allocation3 + $0x6e0] sm:$0xf]  ;;  %v4502_v35 = vld [vmem:[#allocation3 + $0x6ec] sm:$0xf0]  ;;  %v3804_v42 = vor.u32 %v4470_v33, %v3803_v31  ;;  %1519 = vmatpush.bf16.msra.mxu3 %v3436_v40  ;;  %1481 = vmatmul.bf16.vlgmr.msra.gmra.mxu0 %v4768_v21  ;;  %v4292_v33 = vld [vmem:[#allocation3 + $0x64] sm:$0xf] }
  0x37   :  { %v3932_v43 = vor.u32 %v4502_v35, %v3931_v34  ;;  %v3659_v44 = vld [vmem:[#allocation3 + $0x4c0] sm:$0xf]  ;;  %v4434_v45 = vld [vmem:[#allocation3 + $0x4cc] sm:$0xf0]  ;;  %1525 = vmatpush.bf16.msrb.mxu0 %v3676_v41  ;;  %v3101_v34 = vld [vmem:[#allocation3 + $0x70] sm:$0xf0]  ;;  %1494 = vmatmul.bf16.vlgmr.msra.gmra.mxu1 %v4770_v22 }
  0x38   :  { %v3787_v46 = vld [vmem:[#allocation3 + $0x5c0] sm:$0xf]  ;;  %v4466_v48 = vld [vmem:[#allocation3 + $0x5cc] sm:$0xf0]  ;;  %v3660_v53 = vor.u32 %v4434_v45, %v3659_v44  ;;  %1538 = vmatpush.bf16.msrb.mxu1 %v3804_v42  ;;  %v3104_v41 = vor.u32 %v4292_v33, %v3101_v34  ;;  %v4288_v45 = vld [vmem:[#allocation3 + $0x44] sm:$0xf] }
  0x39   :  { %v3915_v49 = vld [vmem:[#allocation3 + $0x6c0] sm:$0xf]  ;;  %v4498_v50 = vld [vmem:[#allocation3 + $0x6cc] sm:$0xf0]  ;;  %1551 = vmatpush.bf16.msrb.mxu2 %v3932_v43  ;;  %v3788_v55 = vor.u32 %v4466_v48, %v3787_v46  ;;  %v3085_v46 = vld [vmem:[#allocation3 + $0x50] sm:$0xf0] }
  0x3a   :  { %v3643_v54 = vld [vmem:[#allocation3 + $0x4a0] sm:$0xf]  ;;  %v3916_v56 = vor.u32 %v4498_v50, %v3915_v49  ;;  %v4430_v57 = vld [vmem:[#allocation3 + $0x4ac] sm:$0xf0]  ;;  %1564 = vmatpush.bf16.msrb.mxu3 %v3168_v47  ;;  %v4368_v33 = vld [vmem:[#allocation3 + $0x2c4] sm:$0xf] }
  0x3b   :  { %v3771_v58 = vld [vmem:[#allocation3 + $0x5a0] sm:$0xf]  ;;  %v4462_v61 = vld [vmem:[#allocation3 + $0x5ac] sm:$0xf0]  ;;  %1526 = vmatpush.bf16.msrb.mxu0 %v3660_v53  ;;  %v3644_v4 = vor.u32 %v4430_v57, %v3643_v54  ;;  %v3088_v53 = vor.u32 %v4288_v45, %v3085_v46  ;;  %v4284_v57 = vld [vmem:[#allocation3 + $0x24] sm:$0xf] }
  0x3c   :  { %v91_v59 = vld [vmem:[%s5302_s26 + $0x8] sm:$0xff]  ;;  %v4494_v63 = vld [vmem:[#allocation3 + $0x6ac] sm:$0xf0]  ;;  %1539 = vmatpush.bf16.msrb.mxu1 %v3788_v55  ;;  %v3772_v8 = vor.u32 %v4462_v61, %v3771_v58  ;;  %v3069_v58 = vld [vmem:[#allocation3 + $0x30] sm:$0xf0] }
  0x3d   :  { %v3899_v62 = vld [vmem:[#allocation3 + $0x6a0] sm:$0xf]  ;;  %v334_v0 = vunpack.c.l.b16 %v91_v59  ;;  %v335_v1 = vunpack.c.h.b16 %v91_v59  ;;  %1552 = vmatpush.bf16.msrb.mxu2 %v3916_v56  ;;  %v4426_v11 = vld [vmem:[#allocation3 + $0x48c] sm:$0xf0]  ;;  %v3072_v6 = vor.u32 %v4284_v57, %v3069_v58  ;;  %v4332_v46 = vld [vmem:[#allocation3 + $0x1a4] sm:$0xf] }
  0x3e   :  { %v3900_v9 = vor.u32 %v4494_v63, %v3899_v62  ;;  %v3627_v10 = vld [vmem:[#allocation3 + $0x480] sm:$0xf]  ;;  %1565 = vmatpush.bf16.msrb.mxu3 %v3152_v60  ;;  %v4458_v16 = vld [vmem:[#allocation3 + $0x58c] sm:$0xf0]  ;;  %v4328_v58 = vld [vmem:[#allocation3 + $0x184] sm:$0xf] }
  0x3f   :  { %v4760_v5 = vpack.c.b16 %v334_v0, %v334_v0  ;;  %v4765_v7 = vpack.c.b16 %v335_v1, %v335_v1  ;;  %v3755_v12 = vld [vmem:[#allocation3 + $0x580] sm:$0xf]  ;;  %v4490_v18 = vld [vmem:[#allocation3 + $0x68c] sm:$0xf0]  ;;  %1527 = vmatpush.bf16.msrb.mxu0 %v3644_v4  ;;  %v3628_v23 = vor.u32 %v4426_v11, %v3627_v10  ;;  %v92_v10 = vld [vmem:[%s5302_s26 + $0x10] sm:$0xff] }
  0x40   :  { %v3883_v17 = vld [vmem:[#allocation3 + $0x680] sm:$0xf]  ;;  %1540 = vmatpush.bf16.msrb.mxu1 %v3772_v8  ;;  %v3756_v24 = vor.u32 %v4458_v16, %v3755_v12  ;;  %v4422_v27 = vld [vmem:[#allocation3 + $0x46c] sm:$0xf0]  ;;  %v4280_v8 = vld [vmem:[#allocation3 + $0x4] sm:$0xf] }
  0x41   :  { %1507 = vmatmul.bf16.vlgmr.msra.gmra.mxu2 %v4760_v5  ;;  %1520 = vmatmul.bf16.vlgmr.msra.gmra.mxu3 %v4765_v7  ;;  %v3884_v25 = vor.u32 %v4490_v18, %v3883_v17  ;;  %v3611_v26 = vld [vmem:[#allocation3 + $0x460] sm:$0xf]  ;;  %v4454_v30 = vld [vmem:[#allocation3 + $0x56c] sm:$0xf0]  ;;  %v4340_v11 = vld [vmem:[#allocation3 + $0x1e4] sm:$0xf] }
  0x42   :  { %1553 = vmatpush.bf16.msrb.mxu2 %v3900_v9  ;;  %v3739_v28 = vld [vmem:[#allocation3 + $0x560] sm:$0xf]  ;;  %1566 = vmatpush.bf16.msrb.mxu3 %v3136_v15  ;;  %v4486_v32 = vld [vmem:[#allocation3 + $0x66c] sm:$0xf0]  ;;  %v3612_v35 = vor.u32 %v4422_v27, %v3611_v26  ;;  %v3053_v9 = vld [vmem:[#allocation3 + $0x10] sm:$0xf0]  ;;  %v337_v26 = vunpack.c.h.b16 %v92_v10 }
  0x43   :  { %v3867_v31 = vld [vmem:[#allocation3 + $0x660] sm:$0xf]  ;;  %1528 = vmatpush.bf16.msrb.mxu0 %v3628_v23  ;;  %v3740_v36 = vor.u32 %v4454_v30, %v3739_v28  ;;  %v4418_v39 = vld [vmem:[#allocation3 + $0x44c] sm:$0xf0]  ;;  %v3293_v12 = vld [vmem:[#allocation3 + $0x1f0] sm:$0xf0]  ;;  %v3056_v27 = vor.u32 %v4280_v8, %v3053_v9 }
  0x44   :  { %1541 = vmatpush.bf16.msrb.mxu1 %v3756_v24  ;;  %v3868_v37 = vor.u32 %v4486_v32, %v3867_v31  ;;  %v3595_v38 = vld [vmem:[#allocation3 + $0x440] sm:$0xf]  ;;  %v4450_v42 = vld [vmem:[#allocation3 + $0x54c] sm:$0xf0]  ;;  %v3421_v15 = vld [vmem:[#allocation3 + $0x2f0] sm:$0xf0]  ;;  %v3296_v28 = vor.u32 %v4340_v11, %v3293_v12 }
  0x45   :  { %v3723_v40 = vld [vmem:[#allocation3 + $0x540] sm:$0xf]  ;;  %v4482_v44 = vld [vmem:[#allocation3 + $0x64c] sm:$0xf0]  ;;  %v3596_v47 = vor.u32 %v4418_v39, %v3595_v38  ;;  %v4404_v16 = vld [vmem:[#allocation3 + $0x3e4] sm:$0xf] }
  0x46   :  { %1554 = vmatpush.bf16.msrb.mxu2 %v3884_v25  ;;  %1567 = vmatpush.bf16.msrb.mxu3 %v3120_v29  ;;  %v3851_v43 = vld [vmem:[#allocation3 + $0x640] sm:$0xf]  ;;  %v3724_v48 = vor.u32 %v4450_v42, %v3723_v40  ;;  %v4414_v51 = vld [vmem:[#allocation3 + $0x42c] sm:$0xf0]  ;;  %v3549_v17 = vld [vmem:[#allocation3 + $0x3f0] sm:$0xf0]  ;;  %v336_v25 = vunpack.c.l.b16 %v92_v10  ;;  %v3424_v29 = vor.u32 %v4372_v13, %v3421_v15  ;;  %v4785_v42 = vpack.c.b16 %v337_v26, %v337_v26 }
  0x47   :  { %1529 = vmatpush.bf16.msrb.mxu0 %v3612_v35  ;;  %v3852_v49 = vor.u32 %v4482_v44, %v3851_v43  ;;  %v3579_v50 = vld [vmem:[#allocation3 + $0x420] sm:$0xf]  ;;  %v4446_v54 = vld [vmem:[#allocation3 + $0x52c] sm:$0xf0]  ;;  %v4436_v23 = vld [vmem:[#allocation3 + $0x4e4] sm:$0xf]  ;;  %v3552_v30 = vor.u32 %v4404_v16, %v3549_v17 }
  0x48   :  { %1542 = vmatpush.bf16.msrb.mxu1 %v3740_v36  ;;  %v3707_v52 = vld [vmem:[#allocation3 + $0x520] sm:$0xf]  ;;  %v4478_v56 = vld [vmem:[#allocation3 + $0x62c] sm:$0xf0]  ;;  %v3580_v60 = vor.u32 %v4414_v51, %v3579_v50  ;;  %v3677_v24 = vld [vmem:[#allocation3 + $0x4f0] sm:$0xf0] }
  0x49   :  { %v3835_v55 = vld [vmem:[#allocation3 + $0x620] sm:$0xf]  ;;  %v4410_v61 = vld [vmem:[#allocation3 + $0x40c] sm:$0xf0]  ;;  %v3708_v0 = vor.u32 %v4446_v54, %v3707_v52  ;;  %v4336_v31 = vld [vmem:[#allocation3 + $0x1c4] sm:$0xf]  ;;  %v3680_v34 = vor.u32 %v4436_v23, %v3677_v24 }
  0x4a   :  { %1555 = vmatpush.bf16.msrb.mxu2 %v3868_v37  ;;  %1568 = vmatpush.bf16.msrb.mxu3 %v3104_v41  ;;  %v3563_v59 = vld [vmem:[#allocation3 + $0x400] sm:$0xf]  ;;  %v4442_v63 = vld [vmem:[#allocation3 + $0x50c] sm:$0xf0]  ;;  %v3836_v1 = vor.u32 %v4478_v56, %v3835_v55  ;;  %v3277_v32 = vld [vmem:[#allocation3 + $0x1d0] sm:$0xf0]  ;;  %v4783_v41 = vpack.c.b16 %v336_v25, %v336_v25 }
  0x4b   :  { %1530 = vmatpush.bf16.msrb.mxu0 %v3596_v47  ;;  %v3691_v62 = vld [vmem:[#allocation3 + $0x500] sm:$0xf]  ;;  %v4474_v3 = vld [vmem:[#allocation3 + $0x60c] sm:$0xf0]  ;;  %v3564_v14 = vor.u32 %v4410_v61, %v3563_v59  ;;  %v3405_v35 = vld [vmem:[#allocation3 + $0x2d0] sm:$0xf0]  ;;  %v3280_v43 = vor.u32 %v4336_v31, %v3277_v32 }
  0x4c   :  { %1543 = vmatpush.bf16.msrb.mxu1 %v3724_v48  ;;  %v3819_v2 = vld [vmem:[#allocation3 + $0x600] sm:$0xf]  ;;  %v93_v4 = vld [vmem:[%s5302_s26 + $0x18] sm:$0xf]  ;;  %v3692_v19 = vor.u32 %v4442_v63, %v3691_v62  ;;  %v4400_v36 = vld [vmem:[#allocation3 + $0x3c4] sm:$0xf]  ;;  %v3408_v44 = vor.u32 %v4368_v33, %v3405_v35 }
  0x4d   :  { %v338_v18 = vunpack.c.l.b16 %v93_v4  ;;  %v3820_v20 = vor.u32 %v4474_v3, %v3819_v2  ;;  %v3533_v37 = vld [vmem:[#allocation3 + $0x3d0] sm:$0xf0]  ;;  %v4432_v39 = vld [vmem:[#allocation3 + $0x4c4] sm:$0xf] }
  0x4e   :  { %1556 = vmatpush.bf16.msrb.mxu2 %v3852_v49  ;;  %1569 = vmatpush.bf16.msrb.mxu3 %v3088_v53  ;;  %v3661_v40 = vld [vmem:[#allocation3 + $0x4d0] sm:$0xf0]  ;;  %v3536_v45 = vor.u32 %v4400_v36, %v3533_v37  ;;  %v4364_v48 = vld [vmem:[#allocation3 + $0x2a4] sm:$0xf] }
  0x4f   :  { %1531 = vmatpush.bf16.msrb.mxu0 %v3580_v60  ;;  %v4781_v38 = vpack.c.b16 %v338_v18, %v338_v18  ;;  %v3261_v47 = vld [vmem:[#allocation3 + $0x1b0] sm:$0xf0]  ;;  %v3664_v49 = vor.u32 %v4432_v39, %v3661_v40  ;;  %v4396_v51 = vld [vmem:[#allocation3 + $0x3a4] sm:$0xf] }
  0x50   :  { %1544 = vmatpush.bf16.msrb.mxu1 %v3708_v0  ;;  %v3389_v50 = vld [vmem:[#allocation3 + $0x2b0] sm:$0xf0]  ;;  %v4428_v53 = vld [vmem:[#allocation3 + $0x4a4] sm:$0xf]  ;;  %v3264_v55 = vor.u32 %v4332_v46, %v3261_v47 }
  0x51   :  { %v3517_v52 = vld [vmem:[#allocation3 + $0x3b0] sm:$0xf0]  ;;  %v3392_v56 = vor.u32 %v4364_v48, %v3389_v50  ;;  %v4360_v60 = vld [vmem:[#allocation3 + $0x284] sm:$0xf] }
  0x52   :  { %1557 = vmatpush.bf16.msrb.mxu2 %v3836_v1  ;;  %1570 = vmatpush.bf16.msrb.mxu3 %v3072_v6  ;;  %v3645_v54 = vld [vmem:[#allocation3 + $0x4b0] sm:$0xf0]  ;;  %v3520_v57 = vor.u32 %v4396_v51, %v3517_v52  ;;  %v4392_v63 = vld [vmem:[#allocation3 + $0x384] sm:$0xf] }
  0x53   :  { %1532 = vmatpush.bf16.msrb.mxu0 %v3564_v14  ;;  %v3245_v59 = vld [vmem:[#allocation3 + $0x190] sm:$0xf0]  ;;  %v3648_v61 = vor.u32 %v4428_v53, %v3645_v54  ;;  %v4424_v1 = vld [vmem:[#allocation3 + $0x484] sm:$0xf] }
  0x54   :  { %1545 = vmatpush.bf16.msrb.mxu1 %v3692_v19  ;;  %v3373_v62 = vld [vmem:[#allocation3 + $0x290] sm:$0xf0]  ;;  %v3248_v3 = vor.u32 %v4328_v58, %v3245_v59  ;;  %v4324_v8 = vld [vmem:[#allocation3 + $0x164] sm:$0xf] }
  0x55   :  { %v3501_v0 = vld [vmem:[#allocation3 + $0x390] sm:$0xf0]  ;;  %v3376_v4 = vor.u32 %v4360_v60, %v3373_v62  ;;  %v4356_v10 = vld [vmem:[#allocation3 + $0x264] sm:$0xf] }
  0x56   :  { %1558 = vmatpush.bf16.msrb.mxu2 %v3820_v20  ;;  %1571 = vmatpush.bf16.msrb.mxu3 %v3056_v27  ;;  %v3629_v2 = vld [vmem:[#allocation3 + $0x490] sm:$0xf0]  ;;  %v3504_v6 = vor.u32 %v4392_v63, %v3501_v0  ;;  %v4388_v13 = vld [vmem:[#allocation3 + $0x364] sm:$0xf]  ;;  %v3171_v63 = vld [vmem:[#allocation3 + $0xe8] sm:$0xf] }
  0x57   :  { %1577 = vmatpush.bf16.msra.mxu0 %v3296_v28  ;;  %1546 = vmatmul.bf16.vlgmr.msrb.gmra.mxu1 %v4785_v42  ;;  %v3229_v9 = vld [vmem:[#allocation3 + $0x170] sm:$0xf0]  ;;  %v3632_v11 = vor.u32 %v4424_v1, %v3629_v2  ;;  %v4420_v15 = vld [vmem:[#allocation3 + $0x464] sm:$0xf]  ;;  %v4311_v0 = vld [vmem:[#allocation3 + $0xf4] sm:$0xf0] }
  0x58   :  { %1590 = vmatpush.bf16.msra.mxu1 %v3424_v29  ;;  %1533 = vmatmul.bf16.vlgmr.msrb.gmra.mxu0 %v4783_v41  ;;  %v3357_v12 = vld [vmem:[#allocation3 + $0x270] sm:$0xf0]  ;;  %v3232_v17 = vor.u32 %v4324_v8, %v3229_v9  ;;  %v4320_v20 = vld [vmem:[#allocation3 + $0x144] sm:$0xf] }
  0x59   :  { %1559 = vmatmul.bf16.vlgmr.msrb.gmra.mxu2 %v4781_v38  ;;  %1572 = vmatmul.bf16.vlgmr.msrb.gmra.mxu3 %v4768_v21  ;;  %v3485_v14 = vld [vmem:[#allocation3 + $0x370] sm:$0xf0]  ;;  %v3360_v18 = vor.u32 %v4356_v10, %v3357_v12  ;;  %v4352_v24 = vld [vmem:[#allocation3 + $0x244] sm:$0xf]  ;;  %v3172_v10 = vor.u32 %v4311_v0, %v3171_v63 }
  0x5a   :  { %1603 = vmatpush.bf16.msra.mxu2 %v3552_v30  ;;  %1616 = vmatpush.bf16.msra.mxu3 %v3680_v34  ;;  %v3613_v16 = vld [vmem:[#allocation3 + $0x470] sm:$0xf0]  ;;  %v3488_v19 = vor.u32 %v4388_v13, %v3485_v14  ;;  %v4384_v27 = vld [vmem:[#allocation3 + $0x344] sm:$0xf] }
  0x5b   :  { %1578 = vmatpush.bf16.msra.mxu0 %v3280_v43  ;;  %v3213_v23 = vld [vmem:[#allocation3 + $0x150] sm:$0xf0]  ;;  %v3616_v25 = vor.u32 %v4420_v15, %v3613_v16  ;;  %v4416_v29 = vld [vmem:[#allocation3 + $0x444] sm:$0xf]  ;;  %v3155_v16 = vld [vmem:[#allocation3 + $0xc8] sm:$0xf] }
  0x5c   :  { %1591 = vmatpush.bf16.msra.mxu1 %v3408_v44  ;;  %v3341_v26 = vld [vmem:[#allocation3 + $0x250] sm:$0xf0]  ;;  %v3216_v31 = vor.u32 %v4320_v20, %v3213_v23  ;;  %v4316_v34 = vld [vmem:[#allocation3 + $0x124] sm:$0xf] }
  0x5d   :  { %v3469_v28 = vld [vmem:[#allocation3 + $0x350] sm:$0xf0]  ;;  %v3344_v32 = vor.u32 %v4352_v24, %v3341_v26  ;;  %v4348_v36 = vld [vmem:[#allocation3 + $0x224] sm:$0xf] }
  0x5e   :  { %1604 = vmatpush.bf16.msra.mxu2 %v3536_v45  ;;  %1617 = vmatpush.bf16.msra.mxu3 %v3664_v49  ;;  %v3597_v30 = vld [vmem:[#allocation3 + $0x450] sm:$0xf0]  ;;  %v3472_v33 = vor.u32 %v4384_v27, %v3469_v28  ;;  %v4380_v40 = vld [vmem:[#allocation3 + $0x324] sm:$0xf] }
  0x5f   :  { %1579 = vmatpush.bf16.msra.mxu0 %v3264_v55  ;;  %v3197_v35 = vld [vmem:[#allocation3 + $0x130] sm:$0xf0]  ;;  %v3600_v37 = vor.u32 %v4416_v29, %v3597_v30  ;;  %v4412_v44 = vld [vmem:[#allocation3 + $0x424] sm:$0xf]  ;;  %v3139_v30 = vld [vmem:[#allocation3 + $0xa8] sm:$0xf] }
  0x60   :  { %1592 = vmatpush.bf16.msra.mxu1 %v3392_v56  ;;  %v3325_v39 = vld [vmem:[#allocation3 + $0x230] sm:$0xf0]  ;;  %v3200_v46 = vor.u32 %v4316_v34, %v3197_v35  ;;  %v4312_v47 = vld [vmem:[#allocation3 + $0x104] sm:$0xf] }
  0x61   :  { %v3453_v43 = vld [vmem:[#allocation3 + $0x330] sm:$0xf0]  ;;  %v3328_v49 = vor.u32 %v4348_v36, %v3325_v39  ;;  %v4344_v51 = vld [vmem:[#allocation3 + $0x204] sm:$0xf] }
  0x62   :  { %1605 = vmatpush.bf16.msra.mxu2 %v3520_v57  ;;  %1618 = vmatpush.bf16.msra.mxu3 %v3648_v61  ;;  %v3581_v45 = vld [vmem:[#allocation3 + $0x430] sm:$0xf0]  ;;  %v3456_v50 = vor.u32 %v4380_v40, %v3453_v43  ;;  %v4376_v53 = vld [vmem:[#allocation3 + $0x304] sm:$0xf] }
  0x63   :  { %1580 = vmatpush.bf16.msra.mxu0 %v3248_v3  ;;  %v3181_v48 = vld [vmem:[#allocation3 + $0x110] sm:$0xf0]  ;;  %v3584_v54 = vor.u32 %v4412_v44, %v3581_v45  ;;  %v4408_v56 = vld [vmem:[#allocation3 + $0x404] sm:$0xf]  ;;  %v3299_v3 = vld [vmem:[#allocation3 + $0x1e8] sm:$0xf] }
  0x64   :  { %1593 = vmatpush.bf16.msra.mxu1 %v3376_v4  ;;  %v3309_v52 = vld [vmem:[#allocation3 + $0x210] sm:$0xf0]  ;;  %v4468_v58 = vld [vmem:[#allocation3 + $0x5e4] sm:$0xf]  ;;  %v3184_v61 = vor.u32 %v4312_v47, %v3181_v48  ;;  %v4343_v4 = vld [vmem:[#allocation3 + $0x1f4] sm:$0xf0] }
  0x65   :  { %v3437_v55 = vld [vmem:[#allocation3 + $0x310] sm:$0xf0]  ;;  %v4500_v60 = vld [vmem:[#allocation3 + $0x6e4] sm:$0xf]  ;;  %v3312_v1 = vor.u32 %v4344_v51, %v3309_v52  ;;  %v3300_v14 = vor.u32 %v4343_v4, %v3299_v3  ;;  %v3123_v45 = vld [vmem:[#allocation3 + $0x88] sm:$0xf] }
  0x66   :  { %1606 = vmatpush.bf16.msra.mxu2 %v3504_v6  ;;  %1619 = vmatpush.bf16.msra.mxu3 %v3632_v11  ;;  %v3565_v57 = vld [vmem:[#allocation3 + $0x410] sm:$0xf0]  ;;  %v3440_v2 = vor.u32 %v4376_v53, %v3437_v55  ;;  %v4464_v11 = vld [vmem:[#allocation3 + $0x5c4] sm:$0xf]  ;;  %v3251_v47 = vld [vmem:[#allocation3 + $0x188] sm:$0xf] }
  0x67   :  { %1581 = vmatpush.bf16.msra.mxu0 %v3232_v17  ;;  %v3805_v59 = vld [vmem:[#allocation3 + $0x5f0] sm:$0xf0]  ;;  %v3568_v6 = vor.u32 %v4408_v56, %v3565_v57  ;;  %v4496_v13 = vld [vmem:[#allocation3 + $0x6c4] sm:$0xf]  ;;  %v4307_v17 = vld [vmem:[#allocation3 + $0xd4] sm:$0xf0] }
  0x68   :  { %1594 = vmatpush.bf16.msra.mxu1 %v3360_v18  ;;  %v3933_v62 = vld [vmem:[#allocation3 + $0x6f0] sm:$0xf0]  ;;  %v3808_v8 = vor.u32 %v4468_v58, %v3805_v59  ;;  %v3283_v18 = vld [vmem:[#allocation3 + $0x1c8] sm:$0xf]  ;;  %v3156_v24 = vor.u32 %v4307_v17, %v3155_v16  ;;  %v4492_v27 = vld [vmem:[#allocation3 + $0x6a4] sm:$0xf] }
  0x69   :  { %v3936_v9 = vor.u32 %v4500_v60, %v3933_v62  ;;  %v3789_v12 = vld [vmem:[#allocation3 + $0x5d0] sm:$0xf0]  ;;  %v4488_v40 = vld [vmem:[#allocation3 + $0x684] sm:$0xf]  ;;  %v4331_v48 = vld [vmem:[#allocation3 + $0x194] sm:$0xf0] }
  0x6a   :  { %1607 = vmatpush.bf16.msra.mxu2 %v3488_v19  ;;  %1620 = vmatpush.bf16.msra.mxu3 %v3616_v25  ;;  %v3917_v15 = vld [vmem:[#allocation3 + $0x6d0] sm:$0xf0]  ;;  %v4339_v19 = vld [vmem:[#allocation3 + $0x1d4] sm:$0xf0]  ;;  %v3792_v20 = vor.u32 %v4464_v11, %v3789_v12  ;;  %v4460_v25 = vld [vmem:[#allocation3 + $0x5a4] sm:$0xf]  ;;  %v3252_v55 = vor.u32 %v4331_v48, %v3251_v47 }
  0x6b   :  { %1582 = vmatpush.bf16.msra.mxu0 %v3216_v31  ;;  %v3920_v23 = vor.u32 %v4496_v13, %v3917_v15  ;;  %v3773_v26 = vld [vmem:[#allocation3 + $0x5b0] sm:$0xf0]  ;;  %v3284_v28 = vor.u32 %v4339_v19, %v3283_v18  ;;  %v4303_v31 = vld [vmem:[#allocation3 + $0xb4] sm:$0xf0]  ;;  %v4452_v52 = vld [vmem:[#allocation3 + $0x564] sm:$0xf] }
  0x6c   :  { %1595 = vmatpush.bf16.msra.mxu1 %v3344_v32  ;;  %v3901_v29 = vld [vmem:[#allocation3 + $0x6b0] sm:$0xf0]  ;;  %v3267_v32 = vld [vmem:[#allocation3 + $0x1a8] sm:$0xf]  ;;  %v3776_v34 = vor.u32 %v4460_v25, %v3773_v26  ;;  %v3140_v36 = vor.u32 %v4303_v31, %v3139_v30  ;;  %v4295_v58 = vld [vmem:[#allocation3 + $0x74] sm:$0xf0] }
  0x6d   :  { %v3904_v35 = vor.u32 %v4492_v27, %v3901_v29  ;;  %v3757_v39 = vld [vmem:[#allocation3 + $0x590] sm:$0xf0]  ;;  %v3107_v57 = vld [vmem:[#allocation3 + $0x68] sm:$0xf]  ;;  %v4327_v60 = vld [vmem:[#allocation3 + $0x174] sm:$0xf0] }
  0x6e   :  { %1608 = vmatpush.bf16.msra.mxu2 %v3472_v33  ;;  %1621 = vmatpush.bf16.msra.mxu3 %v3600_v37  ;;  %v4335_v33 = vld [vmem:[#allocation3 + $0x1b4] sm:$0xf0]  ;;  %v4456_v37 = vld [vmem:[#allocation3 + $0x584] sm:$0xf]  ;;  %v3885_v44 = vld [vmem:[#allocation3 + $0x690] sm:$0xf0]  ;;  %v3108_v63 = vor.u32 %v4295_v58, %v3107_v57 }
  0x6f   :  { %1583 = vmatpush.bf16.msra.mxu0 %v3200_v46  ;;  %v3268_v43 = vor.u32 %v4335_v33, %v3267_v32  ;;  %v4299_v46 = vld [vmem:[#allocation3 + $0x94] sm:$0xf0]  ;;  %v3741_v53 = vld [vmem:[#allocation3 + $0x570] sm:$0xf0]  ;;  %v3235_v59 = vld [vmem:[#allocation3 + $0x168] sm:$0xf] }
  0x70   :  { %1596 = vmatpush.bf16.msra.mxu1 %v3328_v49  ;;  %v3760_v49 = vor.u32 %v4456_v37, %v3757_v39  ;;  %v3124_v51 = vor.u32 %v4299_v46, %v3123_v45  ;;  %v3869_v56 = vld [vmem:[#allocation3 + $0x670] sm:$0xf0]  ;;  %v4448_v0 = vld [vmem:[#allocation3 + $0x544] sm:$0xf]  ;;  %v3236_v3 = vor.u32 %v4327_v60, %v3235_v59  ;;  %v3075_v19 = vld [vmem:[#allocation3 + $0x28] sm:$0xf] }
  0x71   :  { %v3853_v4 = vld [vmem:[#allocation3 + $0x650] sm:$0xf0]  ;;  %v4476_v16 = vld [vmem:[#allocation3 + $0x624] sm:$0xf]  ;;  %v3059_v32 = vld [vmem:[#allocation3 + $0x8] sm:$0xf] }
  0x72   :  { %1609 = vmatpush.bf16.msra.mxu2 %v3456_v50  ;;  %1622 = vmatpush.bf16.msra.mxu3 %v3584_v54  ;;  %v3888_v50 = vor.u32 %v4488_v40, %v3885_v44  ;;  %v4484_v54 = vld [vmem:[#allocation3 + $0x664] sm:$0xf]  ;;  %v3709_v15 = vld [vmem:[#allocation3 + $0x530] sm:$0xf0]  ;;  %v3427_v37 = vld [vmem:[#allocation3 + $0x2e8] sm:$0xf] }
  0x73   :  { %1584 = vmatpush.bf16.msra.mxu0 %v3184_v61  ;;  %v3744_v61 = vor.u32 %v4452_v52, %v3741_v53  ;;  %v3872_v62 = vor.u32 %v4484_v54, %v3869_v56  ;;  %v3837_v18 = vld [vmem:[#allocation3 + $0x630] sm:$0xf0]  ;;  %v4440_v26 = vld [vmem:[#allocation3 + $0x504] sm:$0xf]  ;;  %v4375_v39 = vld [vmem:[#allocation3 + $0x2f4] sm:$0xf0] }
  0x74   :  { %1597 = vmatpush.bf16.msra.mxu1 %v3312_v1  ;;  %v3725_v1 = vld [vmem:[#allocation3 + $0x550] sm:$0xf0]  ;;  %v4472_v30 = vld [vmem:[#allocation3 + $0x604] sm:$0xf]  ;;  %v3555_v40 = vld [vmem:[#allocation3 + $0x3e8] sm:$0xf]  ;;  %v3428_v52 = vor.u32 %v4375_v39, %v3427_v37 }
  0x75   :  { %v3728_v11 = vor.u32 %v4448_v0, %v3725_v1  ;;  %v3693_v27 = vld [vmem:[#allocation3 + $0x510] sm:$0xf0]  ;;  %v4407_v44 = vld [vmem:[#allocation3 + $0x3f4] sm:$0xf0]  ;;  %v3683_v45 = vld [vmem:[#allocation3 + $0x4e8] sm:$0xf] }
  0x76   :  { %1610 = vmatpush.bf16.msra.mxu2 %v3440_v2  ;;  %1623 = vmatpush.bf16.msra.mxu3 %v3568_v6  ;;  %v4480_v2 = vld [vmem:[#allocation3 + $0x644] sm:$0xf]  ;;  %v3091_v6 = vld [vmem:[#allocation3 + $0x48] sm:$0xf]  ;;  %v3821_v31 = vld [vmem:[#allocation3 + $0x610] sm:$0xf0]  ;;  %v3556_v53 = vor.u32 %v4407_v44, %v3555_v40 }
  0x77   :  { %1629 = vmatpush.bf16.msrb.mxu0 %v3808_v8  ;;  %1598 = vmatmul.bf16.vlgmr.msra.gmra.mxu1 %v4760_v5  ;;  %v4291_v8 = vld [vmem:[#allocation3 + $0x54] sm:$0xf0]  ;;  %v3856_v12 = vor.u32 %v4480_v2, %v3853_v4  ;;  %v3824_v47 = vor.u32 %v4472_v30, %v3821_v31  ;;  %v3539_v57 = vld [vmem:[#allocation3 + $0x3c8] sm:$0xf] }
  0x78   :  { %1642 = vmatpush.bf16.msrb.mxu1 %v3936_v9  ;;  %1585 = vmatmul.bf16.vlgmr.msra.gmra.mxu0 %v4770_v22  ;;  %v3219_v9 = vld [vmem:[#allocation3 + $0x148] sm:$0xf]  ;;  %v3092_v13 = vor.u32 %v4291_v8, %v3091_v6  ;;  %v4439_v46 = vld [vmem:[#allocation3 + $0x4f4] sm:$0xf0] }
  0x79   :  { %1611 = vmatmul.bf16.vlgmr.msra.gmra.mxu2 %v4765_v7  ;;  %1624 = vmatmul.bf16.vlgmr.msra.gmra.mxu3 %v4783_v41  ;;  %v3684_v54 = vor.u32 %v4439_v46, %v3683_v45  ;;  %v4371_v56 = vld [vmem:[#allocation3 + $0x2d4] sm:$0xf0]  ;;  %v3667_v60 = vld [vmem:[#allocation3 + $0x4c8] sm:$0xf] }
  0x7a   :  { %1655 = vmatpush.bf16.msrb.mxu2 %v3172_v10  ;;  %1668 = vmatpush.bf16.msrb.mxu3 %v3300_v14  ;;  %v4323_v10 = vld [vmem:[#allocation3 + $0x154] sm:$0xf0]  ;;  %v4444_v14 = vld [vmem:[#allocation3 + $0x524] sm:$0xf]  ;;  %v3523_v6 = vld [vmem:[#allocation3 + $0x3a8] sm:$0xf] }
  0x7b   :  { %1630 = vmatpush.bf16.msrb.mxu0 %v3792_v20  ;;  %v3220_v17 = vor.u32 %v4323_v10, %v3219_v9  ;;  %v4287_v20 = vld [vmem:[#allocation3 + $0x34] sm:$0xf0]  ;;  %v3712_v25 = vor.u32 %v4444_v14, %v3709_v15  ;;  %v3651_v10 = vld [vmem:[#allocation3 + $0x4a8] sm:$0xf] }
  0x7c   :  { %1643 = vmatpush.bf16.msrb.mxu1 %v3920_v23  ;;  %v3203_v23 = vld [vmem:[#allocation3 + $0x128] sm:$0xf]  ;;  %v3076_v29 = vor.u32 %v4287_v20, %v3075_v19  ;;  %v4403_v59 = vld [vmem:[#allocation3 + $0x3d4] sm:$0xf0] }
  0x7d   :  { %v3540_v1 = vor.u32 %v4403_v59, %v3539_v57  ;;  %v4367_v4 = vld [vmem:[#allocation3 + $0x2b4] sm:$0xf0]  ;;  %v3507_v19 = vld [vmem:[#allocation3 + $0x388] sm:$0xf] }
  0x7e   :  { %1656 = vmatpush.bf16.msrb.mxu2 %v3156_v24  ;;  %1669 = vmatpush.bf16.msrb.mxu3 %v3284_v28  ;;  %v4319_v24 = vld [vmem:[#allocation3 + $0x134] sm:$0xf0]  ;;  %v3840_v28 = vor.u32 %v4476_v16, %v3837_v18  ;;  %v3363_v31 = vld [vmem:[#allocation3 + $0x268] sm:$0xf] }
  0x7f   :  { %1631 = vmatpush.bf16.msrb.mxu0 %v3776_v34  ;;  %v3204_v33 = vor.u32 %v4319_v24, %v3203_v23  ;;  %v4283_v34 = vld [vmem:[#allocation3 + $0x14] sm:$0xf0]  ;;  %v3635_v24 = vld [vmem:[#allocation3 + $0x488] sm:$0xf] }
  0x80   :  { %1644 = vmatpush.bf16.msrb.mxu1 %v3904_v35  ;;  %v3187_v35 = vld [vmem:[#allocation3 + $0x108] sm:$0xf]  ;;  %v3060_v48 = vor.u32 %v4283_v34, %v3059_v32  ;;  %v4399_v9 = vld [vmem:[#allocation3 + $0x3b4] sm:$0xf0] }
  0x81   :  { %v3524_v15 = vor.u32 %v4399_v9, %v3523_v6  ;;  %v4363_v18 = vld [vmem:[#allocation3 + $0x294] sm:$0xf0]  ;;  %v3747_v39 = vld [vmem:[#allocation3 + $0x568] sm:$0xf] }
  0x82   :  { %1657 = vmatpush.bf16.msrb.mxu2 %v3140_v36  ;;  %1670 = vmatpush.bf16.msrb.mxu3 %v3268_v43  ;;  %v4315_v36 = vld [vmem:[#allocation3 + $0x114] sm:$0xf0]  ;;  %v3696_v43 = vor.u32 %v4440_v26, %v3693_v27  ;;  %v3763_v26 = vld [vmem:[#allocation3 + $0x588] sm:$0xf] }
  0x83   :  { %1632 = vmatpush.bf16.msrb.mxu0 %v3760_v49  ;;  %v3811_v49 = vld [vmem:[#allocation3 + $0x5e8] sm:$0xf]  ;;  %v4395_v23 = vld [vmem:[#allocation3 + $0x394] sm:$0xf0] }
  0x84   :  { %1645 = vmatpush.bf16.msrb.mxu1 %v3888_v50  ;;  %v4471_v50 = vld [vmem:[#allocation3 + $0x5f4] sm:$0xf0]  ;;  %v3347_v46 = vld [vmem:[#allocation3 + $0x248] sm:$0xf] }
  0x85   :  { %v3812_v58 = vor.u32 %v4471_v50, %v3811_v49  ;;  %v4459_v27 = vld [vmem:[#allocation3 + $0x594] sm:$0xf0] }
  0x86   :  { %1658 = vmatpush.bf16.msrb.mxu2 %v3124_v51  ;;  %1671 = vmatpush.bf16.msrb.mxu3 %v3252_v55  ;;  %v3188_v51 = vor.u32 %v4315_v36, %v3187_v35  ;;  %v3411_v55 = vld [vmem:[#allocation3 + $0x2c8] sm:$0xf]  ;;  %v4359_v32 = vld [vmem:[#allocation3 + $0x274] sm:$0xf0]  ;;  %v3764_v34 = vor.u32 %v4459_v27, %v3763_v26 }
  0x87   :  { %1633 = vmatpush.bf16.msrb.mxu0 %v3744_v61  ;;  %v4435_v61 = vld [vmem:[#allocation3 + $0x4d4] sm:$0xf0]  ;;  %v3412_v0 = vor.u32 %v4371_v56, %v3411_v55  ;;  %v3619_v36 = vld [vmem:[#allocation3 + $0x468] sm:$0xf] }
  0x88   :  { %1646 = vmatpush.bf16.msrb.mxu1 %v3872_v62  ;;  %v3795_v62 = vld [vmem:[#allocation3 + $0x5c8] sm:$0xf]  ;;  %v3668_v2 = vor.u32 %v4435_v61, %v3667_v60  ;;  %v4391_v35 = vld [vmem:[#allocation3 + $0x374] sm:$0xf0] }
  0x89   :  { %v4423_v37 = vld [vmem:[#allocation3 + $0x474] sm:$0xf0]  ;;  %v3459_v60 = vld [vmem:[#allocation3 + $0x328] sm:$0xf] }
  0x8a   :  { %1659 = vmatpush.bf16.msrb.mxu2 %v3108_v63  ;;  %1672 = vmatpush.bf16.msrb.mxu3 %v3236_v3  ;;  %v4467_v63 = vld [vmem:[#allocation3 + $0x5d4] sm:$0xf0]  ;;  %v3395_v3 = vld [vmem:[#allocation3 + $0x2a8] sm:$0xf]  ;;  %v3620_v45 = vor.u32 %v4423_v37, %v3619_v36  ;;  %v4305_v36 = vld [vmem:[#allocation3 + $0xcc] sm:$0xf] }
  0x8b   :  { %1634 = vmatpush.bf16.msrb.mxu0 %v3728_v11  ;;  %v3796_v8 = vor.u32 %v4467_v63, %v3795_v62  ;;  %v4431_v11 = vld [vmem:[#allocation3 + $0x4b4] sm:$0xf0]  ;;  %v3396_v14 = vor.u32 %v4367_v4, %v3395_v3  ;;  %v3587_v63 = vld [vmem:[#allocation3 + $0x428] sm:$0xf] }
  0x8c   :  { %1647 = vmatpush.bf16.msrb.mxu1 %v3856_v12  ;;  %v3779_v12 = vld [vmem:[#allocation3 + $0x5a8] sm:$0xf]  ;;  %v3652_v16 = vor.u32 %v4431_v11, %v3651_v10  ;;  %v4455_v40 = vld [vmem:[#allocation3 + $0x574] sm:$0xf0] }
  0x8d   :  { %v3748_v49 = vor.u32 %v4455_v40, %v3747_v39  ;;  %v4387_v50 = vld [vmem:[#allocation3 + $0x354] sm:$0xf0]  ;;  %v3315_v4 = vld [vmem:[#allocation3 + $0x208] sm:$0xf]  ;;  %v3157_v39 = vld [vmem:[#allocation3 + $0xd8] sm:$0xf0] }
  0x8e   :  { %1660 = vmatpush.bf16.msrb.mxu2 %v3092_v13  ;;  %1673 = vmatpush.bf16.msrb.mxu3 %v3220_v17  ;;  %v4463_v13 = vld [vmem:[#allocation3 + $0x5b4] sm:$0xf0]  ;;  %v3379_v17 = vld [vmem:[#allocation3 + $0x288] sm:$0xf]  ;;  %v4337_v40 = vld [vmem:[#allocation3 + $0x1cc] sm:$0xf] }
  0x8f   :  { %1635 = vmatpush.bf16.msrb.mxu0 %v3712_v25  ;;  %v3780_v20 = vor.u32 %v4463_v13, %v3779_v12  ;;  %v4427_v25 = vld [vmem:[#allocation3 + $0x494] sm:$0xf0]  ;;  %v3443_v10 = vld [vmem:[#allocation3 + $0x308] sm:$0xf] }
  0x90   :  { %1648 = vmatpush.bf16.msrb.mxu1 %v3840_v28  ;;  %v3380_v28 = vor.u32 %v4363_v18, %v3379_v17  ;;  %v3636_v30 = vor.u32 %v4427_v25, %v3635_v24  ;;  %v4351_v59 = vld [vmem:[#allocation3 + $0x234] sm:$0xf0]  ;;  %v3571_v12 = vld [vmem:[#allocation3 + $0x408] sm:$0xf]  ;;  %v4341_v24 = vld [vmem:[#allocation3 + $0x1ec] sm:$0xf] }
  0x91   :  { %v4383_v62 = vld [vmem:[#allocation3 + $0x334] sm:$0xf0]  ;;  %v3939_v17 = vld [vmem:[#allocation3 + $0x6e8] sm:$0xf]  ;;  %v3301_v25 = vld [vmem:[#allocation3 + $0x1f8] sm:$0xf0] }
  0x92   :  { %1661 = vmatpush.bf16.msrb.mxu2 %v3076_v29  ;;  %1674 = vmatpush.bf16.msrb.mxu3 %v3204_v33  ;;  %v3508_v29 = vor.u32 %v4395_v23, %v3507_v19  ;;  %v3491_v33 = vld [vmem:[#allocation3 + $0x368] sm:$0xf]  ;;  %v4347_v6 = vld [vmem:[#allocation3 + $0x214] sm:$0xf0]  ;;  %v4309_v19 = vld [vmem:[#allocation3 + $0xec] sm:$0xf] }
  0x93   :  { %1636 = vmatpush.bf16.msrb.mxu0 %v3696_v43  ;;  %v3364_v43 = vor.u32 %v4359_v32, %v3363_v31  ;;  %v3492_v44 = vor.u32 %v4391_v35, %v3491_v33  ;;  %v4379_v11 = vld [vmem:[#allocation3 + $0x314] sm:$0xf0]  ;;  %v3173_v23 = vld [vmem:[#allocation3 + $0xf8] sm:$0xf0]  ;;  %v3304_v33 = vor.u32 %v4341_v24, %v3301_v25  ;;  %v3859_v25 = vld [vmem:[#allocation3 + $0x648] sm:$0xf] }
  0x94   :  { %1649 = vmatpush.bf16.msrb.mxu1 %v3824_v47  ;;  %v4355_v47 = vld [vmem:[#allocation3 + $0x254] sm:$0xf0]  ;;  %v3444_v26 = vor.u32 %v4379_v11, %v3443_v10  ;;  %v3176_v32 = vor.u32 %v4309_v19, %v3173_v23  ;;  %v3875_v11 = vld [vmem:[#allocation3 + $0x668] sm:$0xf]  ;;  %v3365_v19 = vld [vmem:[#allocation3 + $0x278] sm:$0xf0] }
  0x95   :  { %v3348_v55 = vor.u32 %v4355_v47, %v3347_v46  ;;  %v4503_v18 = vld [vmem:[#allocation3 + $0x6f4] sm:$0xf0]  ;;  %v3160_v47 = vor.u32 %v4305_v36, %v3157_v39 }
  0x96   :  { %1662 = vmatpush.bf16.msrb.mxu2 %v3060_v48  ;;  %1675 = vmatpush.bf16.msrb.mxu3 %v3188_v51  ;;  %v3475_v48 = vld [vmem:[#allocation3 + $0x348] sm:$0xf]  ;;  %v3940_v31 = vor.u32 %v4503_v18, %v3939_v17  ;;  %v4499_v35 = vld [vmem:[#allocation3 + $0x6d4] sm:$0xf0]  ;;  %v3237_v17 = vld [vmem:[#allocation3 + $0x178] sm:$0xf0] }
  0x97   :  { %1681 = vmatpush.bf16.msra.mxu0 %v3428_v52  ;;  %1650 = vmatmul.bf16.vlgmr.msrb.gmra.mxu1 %v4781_v38  ;;  %v3603_v51 = vld [vmem:[#allocation3 + $0x448] sm:$0xf]  ;;  %v4419_v52 = vld [vmem:[#allocation3 + $0x454] sm:$0xf0]  ;;  %v3476_v56 = vor.u32 %v4387_v50, %v3475_v48  ;;  %v4357_v18 = vld [vmem:[#allocation3 + $0x26c] sm:$0xf] }
  0x98   :  { %1694 = vmatpush.bf16.msra.mxu1 %v3556_v53  ;;  %1637 = vmatmul.bf16.vlgmr.msrb.gmra.mxu0 %v4785_v42  ;;  %v3731_v53 = vld [vmem:[#allocation3 + $0x548] sm:$0xf]  ;;  %v3604_v57 = vor.u32 %v4419_v52, %v3603_v51  ;;  %v4495_v50 = vld [vmem:[#allocation3 + $0x6b4] sm:$0xf0]  ;;  %v4301_v51 = vld [vmem:[#allocation3 + $0xac] sm:$0xf] }
  0x99   :  { %1663 = vmatmul.bf16.vlgmr.msrb.gmra.mxu2 %v4768_v21  ;;  %1676 = vmatmul.bf16.vlgmr.msrb.gmra.mxu3 %v4770_v22 }
  0x9a   :  { %1707 = vmatpush.bf16.msra.mxu2 %v3684_v54  ;;  %1720 = vmatpush.bf16.msra.mxu3 %v3812_v58  ;;  %v4451_v54 = vld [vmem:[#allocation3 + $0x554] sm:$0xf0]  ;;  %v3331_v58 = vld [vmem:[#allocation3 + $0x228] sm:$0xf] }
  0x9b   :  { %1682 = vmatpush.bf16.msra.mxu0 %v3412_v0  ;;  %v3732_v61 = vor.u32 %v4451_v54, %v3731_v53  ;;  %v4415_v0 = vld [vmem:[#allocation3 + $0x434] sm:$0xf0]  ;;  %v3332_v3 = vor.u32 %v4351_v59, %v3331_v58  ;;  %v3141_v53 = vld [vmem:[#allocation3 + $0xb8] sm:$0xf0]  ;;  %v4333_v54 = vld [vmem:[#allocation3 + $0x1ac] sm:$0xf] }
  0x9c   :  { %1695 = vmatpush.bf16.msra.mxu1 %v3540_v1  ;;  %v3715_v1 = vld [vmem:[#allocation3 + $0x528] sm:$0xf]  ;;  %v3588_v9 = vor.u32 %v4415_v0, %v3587_v63  ;;  %v3144_v59 = vor.u32 %v4301_v51, %v3141_v53  ;;  %v4297_v63 = vld [vmem:[#allocation3 + $0x8c] sm:$0xf] }
  0x9d   :  { %v4349_v51 = vld [vmem:[#allocation3 + $0x22c] sm:$0xf] }
  0x9e   :  { %1708 = vmatpush.bf16.msra.mxu2 %v3668_v2  ;;  %1721 = vmatpush.bf16.msra.mxu3 %v3796_v8  ;;  %v4447_v2 = vld [vmem:[#allocation3 + $0x534] sm:$0xf0]  ;;  %v3460_v8 = vor.u32 %v4383_v62, %v3459_v60 }
  0x9f   :  { %1683 = vmatpush.bf16.msra.mxu0 %v3396_v14  ;;  %v3716_v13 = vor.u32 %v4447_v2, %v3715_v1  ;;  %v4411_v14 = vld [vmem:[#allocation3 + $0x414] sm:$0xf0]  ;;  %v3125_v1 = vld [vmem:[#allocation3 + $0x98] sm:$0xf0]  ;;  %v4329_v2 = vld [vmem:[#allocation3 + $0x18c] sm:$0xf] }
  0xa0   :  { %1696 = vmatpush.bf16.msra.mxu1 %v3524_v15  ;;  %v3699_v15 = vld [vmem:[#allocation3 + $0x508] sm:$0xf]  ;;  %v3572_v27 = vor.u32 %v4411_v14, %v3571_v12  ;;  %v4491_v62 = vld [vmem:[#allocation3 + $0x694] sm:$0xf0] }
  0xa1   :  { %v4487_v12 = vld [vmem:[#allocation3 + $0x674] sm:$0xf0] }
  0xa2   :  { %1709 = vmatpush.bf16.msra.mxu2 %v3652_v16  ;;  %1722 = vmatpush.bf16.msra.mxu3 %v3780_v20  ;;  %v4443_v16 = vld [vmem:[#allocation3 + $0x514] sm:$0xf0]  ;;  %v3316_v20 = vor.u32 %v4347_v6, %v3315_v4  ;;  %v4361_v4 = vld [vmem:[#allocation3 + $0x28c] sm:$0xf]  ;;  %v3381_v6 = vld [vmem:[#allocation3 + $0x298] sm:$0xf0] }
  0xa3   :  { %1684 = vmatpush.bf16.msra.mxu0 %v3380_v28  ;;  %v4373_v28 = vld [vmem:[#allocation3 + $0x2ec] sm:$0xf]  ;;  %v3384_v14 = vor.u32 %v4361_v4, %v3381_v6 }
  0xa4   :  { %1697 = vmatpush.bf16.msra.mxu1 %v3508_v29  ;;  %v3429_v29 = vld [vmem:[#allocation3 + $0x2f8] sm:$0xf0] }
  0xa5   :  { %v3432_v37 = vor.u32 %v4373_v28, %v3429_v29  ;;  %v3368_v28 = vor.u32 %v4357_v18, %v3365_v19  ;;  %v3093_v29 = vld [vmem:[#allocation3 + $0x58] sm:$0xf0] }
  0xa6   :  { %1710 = vmatpush.bf16.msra.mxu2 %v3636_v30  ;;  %1723 = vmatpush.bf16.msra.mxu3 %v3764_v34  ;;  %v3700_v30 = vor.u32 %v4443_v16, %v3699_v15  ;;  %v3923_v34 = vld [vmem:[#allocation3 + $0x6c8] sm:$0xf]  ;;  %v3109_v15 = vld [vmem:[#allocation3 + $0x78] sm:$0xf0]  ;;  %v4325_v16 = vld [vmem:[#allocation3 + $0x16c] sm:$0xf] }
  0xa7   :  { %1685 = vmatpush.bf16.msra.mxu0 %v3364_v43  ;;  %v3285_v43 = vld [vmem:[#allocation3 + $0x1d8] sm:$0xf0]  ;;  %v3924_v46 = vor.u32 %v4499_v35, %v3923_v34  ;;  %v3240_v24 = vor.u32 %v4325_v16, %v3237_v17 }
  0xa8   :  { %1698 = vmatpush.bf16.msra.mxu1 %v3492_v44  ;;  %v4369_v44 = vld [vmem:[#allocation3 + $0x2cc] sm:$0xf]  ;;  %v3288_v48 = vor.u32 %v4337_v40, %v3285_v43  ;;  %v3843_v40 = vld [vmem:[#allocation3 + $0x628] sm:$0xf]  ;;  %v4479_v43 = vld [vmem:[#allocation3 + $0x634] sm:$0xf0] }
  0xa9   :  { %v3844_v53 = vor.u32 %v4479_v43, %v3843_v40  ;;  %v3525_v40 = vld [vmem:[#allocation3 + $0x3b8] sm:$0xf0]  ;;  %v4429_v43 = vld [vmem:[#allocation3 + $0x4ac] sm:$0xf] }
  0xaa   :  { %1711 = vmatpush.bf16.msra.mxu2 %v3620_v45  ;;  %1724 = vmatpush.bf16.msra.mxu3 %v3748_v49  ;;  %v3413_v45 = vld [vmem:[#allocation3 + $0x2d8] sm:$0xf0]  ;;  %v3907_v49 = vld [vmem:[#allocation3 + $0x6a8] sm:$0xf] }
  0xab   :  { %1686 = vmatpush.bf16.msra.mxu0 %v3348_v55  ;;  %v3416_v52 = vor.u32 %v4369_v44, %v3413_v45  ;;  %v3269_v55 = vld [vmem:[#allocation3 + $0x1b8] sm:$0xf0]  ;;  %v3908_v58 = vor.u32 %v4495_v50, %v3907_v49  ;;  %v4285_v44 = vld [vmem:[#allocation3 + $0x2c] sm:$0xf] }
  0xac   :  { %1699 = vmatpush.bf16.msra.mxu1 %v3476_v56  ;;  %v4365_v56 = vld [vmem:[#allocation3 + $0x2ac] sm:$0xf]  ;;  %v3272_v60 = vor.u32 %v4333_v54, %v3269_v55  ;;  %v3205_v49 = vld [vmem:[#allocation3 + $0x138] sm:$0xf0]  ;;  %v3827_v54 = vld [vmem:[#allocation3 + $0x608] sm:$0xf] }
  0xad   :  { %v4475_v55 = vld [vmem:[#allocation3 + $0x614] sm:$0xf0] }
  0xae   :  { %1712 = vmatpush.bf16.msra.mxu2 %v3604_v57  ;;  %1725 = vmatpush.bf16.msra.mxu3 %v3732_v61  ;;  %v3397_v57 = vld [vmem:[#allocation3 + $0x2b8] sm:$0xf0]  ;;  %v3891_v61 = vld [vmem:[#allocation3 + $0x688] sm:$0xf]  ;;  %v3828_v6 = vor.u32 %v4475_v55, %v3827_v54  ;;  %v4393_v55 = vld [vmem:[#allocation3 + $0x38c] sm:$0xf] }
  0xaf   :  { %1687 = vmatpush.bf16.msra.mxu0 %v3332_v3  ;;  %v3400_v0 = vor.u32 %v4365_v56, %v3397_v57  ;;  %v3253_v3 = vld [vmem:[#allocation3 + $0x198] sm:$0xf0] }
  0xb0   :  { %1700 = vmatpush.bf16.msra.mxu1 %v3460_v8  ;;  %v3892_v8 = vor.u32 %v4491_v62, %v3891_v61  ;;  %v3256_v10 = vor.u32 %v4329_v2, %v3253_v3  ;;  %v3189_v62 = vld [vmem:[#allocation3 + $0x118] sm:$0xf0]  ;;  %v4437_v3 = vld [vmem:[#allocation3 + $0x4ec] sm:$0xf] }
  0xb1   :  { %v3557_v2 = vld [vmem:[#allocation3 + $0x3f8] sm:$0xf0] }
  0xb2   :  { %1713 = vmatpush.bf16.msra.mxu2 %v3588_v9  ;;  %1726 = vmatpush.bf16.msra.mxu3 %v3716_v13  ;;  %v3128_v9 = vor.u32 %v4297_v63, %v3125_v1  ;;  %v4293_v13 = vld [vmem:[#allocation3 + $0x6c] sm:$0xf] }
  0xb3   :  { %1688 = vmatpush.bf16.msra.mxu0 %v3316_v20  ;;  %v3876_v20 = vor.u32 %v4487_v12, %v3875_v11  ;;  %v3112_v23 = vor.u32 %v4293_v13, %v3109_v15  ;;  %v4803_v34 = vpop.f32.mrf.mxu0  ;;  %v4345_v63 = vld [vmem:[#allocation3 + $0x20c] sm:$0xf]  ;;  %v3941_v15 = vld [vmem:[#allocation3 + $0x6f8] sm:$0xf0] }
  0xb4   :  { %1701 = vmatpush.bf16.msra.mxu1 %v3444_v26  ;;  %v4483_v26 = vld [vmem:[#allocation3 + $0x654] sm:$0xf0]  ;;  %v4805_v36 = vpop.f32.mrf.mxu1  ;;  %v4405_v1 = vld [vmem:[#allocation3 + $0x3ec] sm:$0xf] }
  0xb5   :  { %v3860_v35 = vor.u32 %v4483_v26, %v3859_v25  ;;  %v3560_v18 = vor.u32 %v4405_v1, %v3557_v2  ;;  %v3541_v25 = vld [vmem:[#allocation3 + $0x3d8] sm:$0xf0]  ;;  %v4433_v26 = vld [vmem:[#allocation3 + $0x4cc] sm:$0xf] }
  0xb6   :  { %1714 = vmatpush.bf16.msra.mxu2 %v3572_v27  ;;  %1727 = vmatpush.bf16.msra.mxu3 %v3700_v30  ;;  %v4289_v27 = vld [vmem:[#allocation3 + $0x4c] sm:$0xf] }
  0xb7   :  { %1733 = vmatpush.bf16.msrb.mxu0 %v3940_v31  ;;  %1702 = vmatmul.bf16.vlgmr.msra.gmra.mxu1 %v4765_v7  ;;  %v4321_v30 = vld [vmem:[#allocation3 + $0x14c] sm:$0xf]  ;;  %v3221_v31 = vld [vmem:[#allocation3 + $0x158] sm:$0xf0] }
  0xb8   :  { %1746 = vmatpush.bf16.msrb.mxu1 %v3176_v32  ;;  %1689 = vmatmul.bf16.vlgmr.msra.gmra.mxu0 %v4760_v5  ;;  %v4353_v32 = vld [vmem:[#allocation3 + $0x24c] sm:$0xf]  ;;  %v3224_v39 = vor.u32 %v4321_v30, %v3221_v31  ;;  %v3797_v30 = vld [vmem:[#allocation3 + $0x5d8] sm:$0xf0] }
  0xb9   :  { %1715 = vmatmul.bf16.vlgmr.msra.gmra.mxu2 %v4783_v41  ;;  %1728 = vmatmul.bf16.vlgmr.msra.gmra.mxu3 %v4785_v42  ;;  %v4497_v31 = vld [vmem:[#allocation3 + $0x6cc] sm:$0xf] }
  0xba   :  { %1759 = vmatpush.bf16.msrb.mxu2 %v3304_v33  ;;  %1772 = vmatpush.bf16.msrb.mxu3 %v3432_v37  ;;  %v3349_v33 = vld [vmem:[#allocation3 + $0x258] sm:$0xf0]  ;;  %v3096_v37 = vor.u32 %v4289_v27, %v3093_v29  ;;  %v4465_v29 = vld [vmem:[#allocation3 + $0x5cc] sm:$0xf] }
  0xbb   :  { %1734 = vmatpush.bf16.msrb.mxu0 %v3924_v46  ;;  %v3352_v46 = vor.u32 %v4353_v32, %v3349_v33  ;;  %v1484_v4 = vpop.f32.mrf.mxu0  ;;  %v3925_v32 = vld [vmem:[#allocation3 + $0x6d8] sm:$0xf0]  ;;  %v4389_v2 = vld [vmem:[#allocation3 + $0x36c] sm:$0xf] }
  0xbc   :  { %1747 = vmatpush.bf16.msrb.mxu1 %v3160_v47  ;;  %v3077_v47 = vld [vmem:[#allocation3 + $0x38] sm:$0xf0]  ;;  %v1497_v11 = vpop.f32.mrf.mxu1  ;;  %v4421_v4 = vld [vmem:[#allocation3 + $0x46c] sm:$0xf] }
  0xbd   :  { %v3080_v56 = vor.u32 %v4285_v44, %v3077_v47  ;;  %v3928_v44 = vor.u32 %v4497_v31, %v3925_v32  ;;  %v4461_v47 = vld [vmem:[#allocation3 + $0x5ac] sm:$0xf] }
  0xbe   :  { %1760 = vmatpush.bf16.msrb.mxu2 %v3288_v48  ;;  %1773 = vmatpush.bf16.msrb.mxu3 %v3416_v52  ;;  %v4317_v48 = vld [vmem:[#allocation3 + $0x12c] sm:$0xf]  ;;  %v3333_v52 = vld [vmem:[#allocation3 + $0x238] sm:$0xf0] }
  0xbf   :  { %1735 = vmatpush.bf16.msrb.mxu0 %v3908_v58  ;;  %v3208_v57 = vor.u32 %v4317_v48, %v3205_v49  ;;  %v4281_v58 = vld [vmem:[#allocation3 + $0xc] sm:$0xf]  ;;  %v3336_v61 = vor.u32 %v4349_v51, %v3333_v52  ;;  %v3781_v48 = vld [vmem:[#allocation3 + $0x5b8] sm:$0xf0] }
  0xc0   :  { %1748 = vmatpush.bf16.msrb.mxu1 %v3144_v59  ;;  %v3061_v59 = vld [vmem:[#allocation3 + $0x18] sm:$0xf0]  ;;  %v4493_v49 = vld [vmem:[#allocation3 + $0x6ac] sm:$0xf]  ;;  %v3784_v54 = vor.u32 %v4461_v47, %v3781_v48 }
  0xc1   :  { %v3064_v12 = vor.u32 %v4281_v58, %v3061_v59  ;;  %v3909_v51 = vld [vmem:[#allocation3 + $0x6b8] sm:$0xf0]  ;;  %v4485_v11 = vld [vmem:[#allocation3 + $0x66c] sm:$0xf] }
  0xc2   :  { %1761 = vmatpush.bf16.msrb.mxu2 %v3272_v60  ;;  %1774 = vmatpush.bf16.msrb.mxu3 %v3400_v0  ;;  %v4313_v60 = vld [vmem:[#allocation3 + $0x10c] sm:$0xf]  ;;  %v3317_v0 = vld [vmem:[#allocation3 + $0x218] sm:$0xf0]  ;;  %v3912_v58 = vor.u32 %v4493_v49, %v3909_v51 }
  0xc3   :  { %1736 = vmatpush.bf16.msrb.mxu0 %v3892_v8  ;;  %v3685_v8 = vld [vmem:[#allocation3 + $0x4f8] sm:$0xf0]  ;;  %v3192_v13 = vor.u32 %v4313_v60, %v3189_v62  ;;  %v3320_v17 = vor.u32 %v4345_v63, %v3317_v0  ;;  %v4457_v60 = vld [vmem:[#allocation3 + $0x58c] sm:$0xf] }
  0xc4   :  { %1749 = vmatpush.bf16.msrb.mxu1 %v3128_v9  ;;  %v4807_v45 = vpop.f32.mrf.mxu2  ;;  %v4809_v50 = vpop.f32.mrf.mxu3  ;;  %v4469_v9 = vld [vmem:[#allocation3 + $0x5ec] sm:$0xf]  ;;  %v3637_v59 = vld [vmem:[#allocation3 + $0x498] sm:$0xf0] }
  0xc5   :  { %v3893_v62 = vld [vmem:[#allocation3 + $0x698] sm:$0xf0]  ;;  %v4445_v47 = vld [vmem:[#allocation3 + $0x52c] sm:$0xf] }
  0xc6   :  { %1762 = vmatpush.bf16.msrb.mxu2 %v3256_v10  ;;  %1775 = vmatpush.bf16.msrb.mxu3 %v3384_v14  ;;  %v3813_v10 = vld [vmem:[#allocation3 + $0x5f8] sm:$0xf0]  ;;  %v4501_v14 = vld [vmem:[#allocation3 + $0x6ec] sm:$0xf] }
  0xc7   :  { %1737 = vmatpush.bf16.msrb.mxu0 %v3876_v20  ;;  %v3688_v20 = vor.u32 %v4437_v3, %v3685_v8  ;;  %v3944_v27 = vor.u32 %v4501_v14, %v3941_v15  ;;  %v3493_v3 = vld [vmem:[#allocation3 + $0x378] sm:$0xf0]  ;;  %v4477_v49 = vld [vmem:[#allocation3 + $0x62c] sm:$0xf] }
  0xc8   :  { %1750 = vmatpush.bf16.msrb.mxu1 %v3112_v23  ;;  %v3816_v23 = vor.u32 %v4469_v9, %v3813_v10  ;;  %v3621_v8 = vld [vmem:[#allocation3 + $0x478] sm:$0xf0]  ;;  %v4453_v9 = vld [vmem:[#allocation3 + $0x56c] sm:$0xf]  ;;  %v3496_v14 = vor.u32 %v4389_v2, %v3493_v3  ;;  %v4519_v2 = vld [vmem:[#allocation5 + $0x74] sm:$0xf0] }
  0xc9   :  { %v3749_v10 = vld [vmem:[#allocation3 + $0x578] sm:$0xf0]  ;;  %v3624_v15 = vor.u32 %v4421_v4, %v3621_v8  ;;  %v4535_v8 = vld [vmem:[#allocation5 + $0xf4] sm:$0xf0] }
  0xca   :  { %1763 = vmatpush.bf16.msrb.mxu2 %v3240_v24  ;;  %1776 = vmatpush.bf16.msrb.mxu3 %v3368_v28  ;;  %v4401_v24 = vld [vmem:[#allocation3 + $0x3cc] sm:$0xf]  ;;  %v3669_v28 = vld [vmem:[#allocation3 + $0x4d8] sm:$0xf0] }
  0xcb   :  { %1738 = vmatpush.bf16.msrb.mxu0 %v3860_v35  ;;  %v3544_v33 = vor.u32 %v4401_v24, %v3541_v25  ;;  %v3672_v35 = vor.u32 %v4433_v26, %v3669_v28  ;;  %v3605_v24 = vld [vmem:[#allocation3 + $0x458] sm:$0xf0]  ;;  %v4449_v25 = vld [vmem:[#allocation3 + $0x54c] sm:$0xf] }
  0xcc   :  { %1751 = vmatpush.bf16.msrb.mxu1 %v3096_v37  ;;  %v1510_v16 = vpop.f32.mrf.mxu2  ;;  %v1523_v19 = vpop.f32.mrf.mxu3  ;;  %v3800_v37 = vor.u32 %v4465_v29, %v3797_v30  ;;  %v3733_v26 = vld [vmem:[#allocation3 + $0x558] sm:$0xf0] }
  0xcd   :  { %v3752_v16 = vor.u32 %v4453_v9, %v3749_v10  ;;  %v4417_v19 = vld [vmem:[#allocation3 + $0x44c] sm:$0xf]  ;;  %v3861_v28 = vld [vmem:[#allocation3 + $0x658] sm:$0xf0] }
  0xce   :  { %1764 = vmatpush.bf16.msrb.mxu2 %v3224_v39  ;;  %1777 = vmatpush.bf16.msrb.mxu3 %v3352_v46  ;;  %v4397_v39 = vld [vmem:[#allocation3 + $0x3ac] sm:$0xf]  ;;  %v3653_v46 = vld [vmem:[#allocation3 + $0x4b8] sm:$0xf0] }
  0xcf   :  { %1739 = vmatpush.bf16.msrb.mxu0 %v3844_v53  ;;  %v3528_v52 = vor.u32 %v4397_v39, %v3525_v40  ;;  %v3656_v53 = vor.u32 %v4429_v43, %v3653_v46  ;;  %v4381_v39 = vld [vmem:[#allocation3 + $0x32c] sm:$0xf]  ;;  %v3461_v40 = vld [vmem:[#allocation3 + $0x338] sm:$0xf0] }
  0xd0   :  { %1752 = vmatpush.bf16.msrb.mxu1 %v3080_v56  ;;  %v3509_v56 = vld [vmem:[#allocation3 + $0x398] sm:$0xf0]  ;;  %v4413_v43 = vld [vmem:[#allocation3 + $0x42c] sm:$0xf] }
  0xd1   :  { %v3589_v46 = vld [vmem:[#allocation3 + $0x438] sm:$0xf0] }
  0xd2   :  { %1765 = vmatpush.bf16.msrb.mxu2 %v3208_v57  ;;  %1778 = vmatpush.bf16.msrb.mxu3 %v3336_v61  ;;  %v4425_v57 = vld [vmem:[#allocation3 + $0x48c] sm:$0xf]  ;;  %v3717_v48 = vld [vmem:[#allocation3 + $0x538] sm:$0xf0] }
  0xd3   :  { %1740 = vmatpush.bf16.msrb.mxu0 %v3828_v6  ;;  %v4489_v61 = vld [vmem:[#allocation3 + $0x68c] sm:$0xf]  ;;  %v3845_v51 = vld [vmem:[#allocation3 + $0x638] sm:$0xf0] }
  0xd4   :  { %1753 = vmatpush.bf16.msrb.mxu1 %v3064_v12  ;;  %v4817_v0 = vpop.f32.mrf.mxu1  ;;  %v3896_v6 = vor.u32 %v4489_v61, %v3893_v62  ;;  %v3877_v12 = vld [vmem:[#allocation3 + $0x678] sm:$0xf0]  ;;  %v4441_v61 = vld [vmem:[#allocation3 + $0x50c] sm:$0xf] }
  0xd5   :  { %v4815_v63 = vpop.f32.mrf.mxu0  ;;  %v3701_v62 = vld [vmem:[#allocation3 + $0x518] sm:$0xf0] }
  0xd6   :  { %1766 = vmatpush.bf16.msrb.mxu2 %v3192_v13  ;;  %1779 = vmatpush.bf16.msrb.mxu3 %v3320_v17  ;;  %v4822_v13 = vld [vmem:[%s5282_s2] sm:$0xf]  ;;  %v4385_v17 = vld [vmem:[#allocation3 + $0x34c] sm:$0xf]  ;;  %v3704_v10 = vor.u32 %v4441_v61, %v3701_v62 }
  0xd7   :  { %1785 = vmatpush.bf16.msra.mxu0 %v3560_v18  ;;  %1754 = vmatmul.bf16.vlgmr.msrb.gmra.mxu1 %v4768_v21  ;;  %v3640_v21 = vor.u32 %v4425_v57, %v3637_v59  ;;  %v3477_v18 = vld [vmem:[#allocation3 + $0x358] sm:$0xf0]  ;;  %v320_v30 = vperm.slane %v4822_v13, 0  ;;  %v4409_v57 = vld [vmem:[#allocation3 + $0x40c] sm:$0xf] }
  0xd8   :  { %1798 = vmatpush.bf16.msra.mxu1 %v3688_v20  ;;  %1741 = vmatmul.bf16.vlgmr.msrb.gmra.mxu0 %v4781_v38  ;;  %v3480_v31 = vor.u32 %v4385_v17, %v3477_v18  ;;  %v4059_v17 = vld [vmem:[#allocation5 + $0xe0] sm:$0xf]  ;;  %v4533_v18 = vld [vmem:[#allocation5 + $0xe4] sm:$0xf0]  ;;  %v4523_v61 = vld [vmem:[#allocation5 + $0x94] sm:$0xf0] }
  0xd9   :  { %1767 = vmatmul.bf16.vlgmr.msrb.gmra.mxu2 %v4770_v22  ;;  %1780 = vmatmul.bf16.vlgmr.msrb.gmra.mxu3 %v4760_v5  ;;  %v3765_v22 = vld [vmem:[#allocation3 + $0x598] sm:$0xf0]  ;;  %v3512_v5 = vor.u32 %v4393_v55, %v3509_v56  ;;  %v3720_v55 = vor.u32 %v4445_v47, %v3717_v48  ;;  %v3963_v47 = vld [vmem:[#allocation5 + $0x20] sm:$0xf]  ;;  %v4509_v48 = vld [vmem:[#allocation5 + $0x24] sm:$0xf0] }
  0xda   :  { %1811 = vmatpush.bf16.msra.mxu2 %v3816_v23  ;;  %1824 = vmatpush.bf16.msra.mxu3 %v3944_v27  ;;  %v3768_v1 = vor.u32 %v4457_v60, %v3765_v22  ;;  %v3880_v23 = vor.u32 %v4485_v11, %v3877_v12  ;;  %v4481_v27 = vld [vmem:[#allocation3 + $0x64c] sm:$0xf]  ;;  %v3445_v56 = vld [vmem:[#allocation3 + $0x318] sm:$0xf0]  ;;  %v1483_v60 = vadd.f32 %v4803_v34, %v320_v30  ;;  %v3979_v30 = vld [vmem:[#allocation5 + $0x40] sm:$0xf] }
  0xdb   :  { %1786 = vmatpush.bf16.msra.mxu0 %v3544_v33  ;;  %v3848_v22 = vor.u32 %v4477_v49, %v3845_v51 }
  0xdc   :  { %1799 = vmatpush.bf16.msra.mxu1 %v3672_v35  ;;  %v4824_v20 = vpop.f32.mrf.mxu2  ;;  %v4826_v29 = vpop.f32.mrf.mxu3  ;;  %v3608_v35 = vor.u32 %v4417_v19, %v3605_v24  ;;  %v1496_v11 = vadd.f32 %v4805_v36, %v1483_v60  ;;  %v3987_v36 = vld [vmem:[#allocation5 + $0x50] sm:$0xf]  ;;  %v4515_v24 = vld [vmem:[#allocation5 + $0x54] sm:$0xf0] }
  0xdd   :  { %v1536_v32 = vpop.f32.mrf.mxu0  ;;  %v1549_v33 = vpop.f32.mrf.mxu1 }
  0xde   :  { %1812 = vmatpush.bf16.msra.mxu2 %v3800_v37  ;;  %1825 = vmatpush.bf16.msra.mxu3 %v3928_v44  ;;  %v3736_v37 = vor.u32 %v4449_v25, %v3733_v26  ;;  %v3864_v44 = vor.u32 %v4481_v27, %v3861_v28  ;;  %v1509_v19 = vadd.f32 %v4807_v45, %v1496_v11  ;;  %v4051_v26 = vld [vmem:[#allocation5 + $0xd0] sm:$0xf]  ;;  %v4531_v27 = vld [vmem:[#allocation5 + $0xd4] sm:$0xf0]  ;;  %v4043_v32 = vld [vmem:[#allocation5 + $0xc0] sm:$0xf] }
  0xdf   :  { %1787 = vmatpush.bf16.msra.mxu0 %v3528_v52  ;;  %v3464_v52 = vor.u32 %v4381_v39, %v3461_v40  ;;  %v4060_v25 = vor.u32 %v4533_v18, %v4059_v17  ;;  %v3988_v45 = vor.u32 %v4515_v24, %v3987_v36  ;;  %v4529_v33 = vld [vmem:[#allocation5 + $0xc4] sm:$0xf0]  ;;  %v4511_v39 = vld [vmem:[#allocation5 + $0x34] sm:$0xf0]  ;;  %v4534_v11 = vld [vmem:[#allocation5 + $0xf4] sm:$0xf] }
  0xe0   :  { %1800 = vmatpush.bf16.msra.mxu1 %v3656_v53  ;;  %v4377_v53 = vld [vmem:[#allocation3 + $0x30c] sm:$0xf]  ;;  %v1522_v28 = vadd.f32 %v4809_v50, %v1509_v19  ;;  %v4044_v40 = vor.u32 %v4529_v33, %v4043_v32  ;;  %v4527_v50 = vld [vmem:[#allocation5 + $0xb4] sm:$0xf0]  ;;  %v4516_v17 = vld [vmem:[#allocation5 + $0x64] sm:$0xf] }
  0xe1   :  { %v3448_v4 = vor.u32 %v4377_v53, %v3445_v56  ;;  %v4525_v53 = vld [vmem:[#allocation5 + $0xa4] sm:$0xf0]  ;;  %v3964_v56 = vor.u32 %v4509_v48, %v3963_v47  ;;  %v3997_v18 = vld [vmem:[#allocation5 + $0x68] sm:$0xf0] }
  0xe2   :  { %1813 = vmatpush.bf16.msra.mxu2 %v3784_v54  ;;  %1826 = vmatpush.bf16.msra.mxu3 %v3912_v58  ;;  %v3592_v54 = vor.u32 %v4413_v43, %v3589_v46  ;;  %v3573_v58 = vld [vmem:[#allocation3 + $0x418] sm:$0xf0]  ;;  %v4035_v43 = vld [vmem:[#allocation5 + $0xb0] sm:$0xf]  ;;  %v4061_v36 = vld [vmem:[#allocation5 + $0xe8] sm:$0xf0] }
  0xe3   :  { %1788 = vmatpush.bf16.msra.mxu0 %v3512_v5  ;;  %v4473_v5 = vld [vmem:[#allocation3 + $0x60c] sm:$0xf]  ;;  %v3576_v9 = vor.u32 %v4409_v57, %v3573_v58  ;;  %v4036_v49 = vor.u32 %v4527_v50, %v4035_v43  ;;  %v4507_v58 = vld [vmem:[#allocation5 + $0x14] sm:$0xf0]  ;;  %v4549_v33 = vld [vmem:[#allocation5 + $0x164] sm:$0xf0] }
  0xe4   :  { %1801 = vmatpush.bf16.msra.mxu1 %v3640_v21  ;;  %v1562_v59 = vpop.f32.mrf.mxu2  ;;  %v3829_v21 = vld [vmem:[#allocation3 + $0x618] sm:$0xf0]  ;;  %v1575_v3 = vpop.f32.mrf.mxu3  ;;  %v4512_v43 = vld [vmem:[#allocation5 + $0x44] sm:$0xf]  ;;  %v3981_v50 = vld [vmem:[#allocation5 + $0x48] sm:$0xf0] }
  0xe5   :  { %v3832_v34 = vor.u32 %v4473_v5, %v3829_v21  ;;  %v4045_v47 = vld [vmem:[#allocation5 + $0xc8] sm:$0xf0] }
  0xe6   :  { %1814 = vmatpush.bf16.msra.mxu2 %v3768_v1  ;;  %1827 = vmatpush.bf16.msra.mxu3 %v3896_v6  ;;  %v4003_v1 = vld [vmem:[#allocation5 + $0x70] sm:$0xf] }
  0xe7   :  { %1789 = vmatpush.bf16.msra.mxu0 %v3496_v14  ;;  %v4067_v6 = vld [vmem:[#allocation5 + $0xf0] sm:$0xf]  ;;  %v4004_v12 = vor.u32 %v4519_v2, %v4003_v1  ;;  %v3995_v14 = vld [vmem:[#allocation5 + $0x60] sm:$0xf]  ;;  %v4518_v2 = vld [vmem:[#allocation5 + $0x74] sm:$0xf] }
  0xe8   :  { %1802 = vmatpush.bf16.msra.mxu1 %v3624_v15  ;;  %v4517_v15 = vld [vmem:[#allocation5 + $0x64] sm:$0xf0]  ;;  %v3947_v1 = vld [vmem:[#allocation5] sm:$0xf] }
  0xea   :  { %1815 = vmatpush.bf16.msra.mxu2 %v3752_v16  ;;  %1828 = vmatpush.bf16.msra.mxu3 %v3880_v23  ;;  %v4068_v16 = vor.u32 %v4535_v8, %v4067_v6  ;;  %v3996_v23 = vor.u32 %v4517_v15, %v3995_v14  ;;  %v4005_v6 = vld [vmem:[#allocation5 + $0x78] sm:$0xf0]  ;;  %v4011_v8 = vld [vmem:[#allocation5 + $0x80] sm:$0xf] }
  0xeb   :  { %1790 = vmatpush.bf16.msra.mxu0 %v3480_v31  ;;  %v4513_v31 = vld [vmem:[#allocation5 + $0x44] sm:$0xf0]  ;;  %v4008_v15 = vor.u32 %v4518_v2, %v4005_v6 }
  0xec   :  { %1803 = vmatpush.bf16.msra.mxu1 %v3608_v35  ;;  %v1535_v35 = vadd.f32 %v4815_v63, %v1522_v28  ;;  %v4000_v28 = vor.u32 %v4516_v17, %v3997_v18 }
  0xee   :  { %1816 = vmatpush.bf16.msra.mxu2 %v3736_v37  ;;  %1829 = vmatpush.bf16.msra.mxu3 %v3864_v44  ;;  %v1548_v44 = vadd.f32 %v4817_v0, %v1535_v35  ;;  %v3955_v0 = vld [vmem:[#allocation5 + $0x10] sm:$0xf]  ;;  %v4530_v35 = vld [vmem:[#allocation5 + $0xd4] sm:$0xf] }
  0xef   :  { %1791 = vmatpush.bf16.msra.mxu0 %v3464_v52  ;;  %v4027_v52 = vld [vmem:[#allocation5 + $0xa0] sm:$0xf]  ;;  %v3956_v21 = vor.u32 %v4507_v58, %v3955_v0  ;;  %v3973_v0 = vld [vmem:[#allocation5 + $0x38] sm:$0xf0] }
  0xf0   :  { %1804 = vmatpush.bf16.msra.mxu1 %v3592_v54  ;;  %v1561_v54 = vadd.f32 %v4824_v20, %v1548_v44  ;;  %v4028_v59 = vor.u32 %v4525_v53, %v4027_v52  ;;  %v4505_v20 = vld [vmem:[#allocation5 + $0x4] sm:$0xf0]  ;;  %v4107_v52 = vld [vmem:[#allocation5 + $0x140] sm:$0xf] }
  0xf1   :  { %v3948_v14 = vor.u32 %v4505_v20, %v3947_v1  ;;  %v4545_v53 = vld [vmem:[#allocation5 + $0x144] sm:$0xf0]  ;;  %v3965_v20 = vld [vmem:[#allocation5 + $0x28] sm:$0xf0] }
  0xf2   :  { %1817 = vmatpush.bf16.msra.mxu2 %v3720_v55  ;;  %1830 = vmatpush.bf16.msra.mxu3 %v3848_v22  ;;  %v321_v55 = vperm.slane %v4822_v13, 1  ;;  %v4019_v22 = vld [vmem:[#allocation5 + $0x90] sm:$0xf]  ;;  %v1841_v62 = vmul.f32 0.2, %v1561_v54  ;;  %vm1837_vm0 = vcmp.gt.f32.partialorder %v1561_v54, 0.0 }
  0xf3   :  { %1792 = vmatpush.bf16.msra.mxu0 %v3448_v4  ;;  %v4020_v3 = vor.u32 %v4523_v61, %v4019_v22  ;;  %v4108_v22 = vor.u32 %v4545_v53, %v4107_v52  ;;  %v4546_v52 = vld [vmem:[#allocation5 + $0x154] sm:$0xf] }
  0xf4   :  { %1805 = vmatpush.bf16.msra.mxu1 %v3576_v9  ;;  %v1574_v5 = vadd.f32 %v4826_v29, %v321_v55  ;;  %v4521_v9 = vld [vmem:[#allocation5 + $0x84] sm:$0xf0]  ;;  %v3984_v55 = vor.u32 %v4512_v43, %v3981_v50 }
  0xf5   :  { %v1586_v37 = vpop.f32.mrf.mxu0  ;;  %v4012_v29 = vor.u32 %v4521_v9, %v4011_v8 }
  0xf6   :  { %1818 = vmatpush.bf16.msra.mxu2 %v3704_v10  ;;  %1831 = vmatpush.bf16.msra.mxu3 %v3832_v34  ;;  %v4069_v34 = vld [vmem:[#allocation5 + $0xf8] sm:$0xf0] }
  0xf7   :  { %2243 = vmatpush.bf16.msrb.mxu0 %v4004_v12  ;;  %1806 = vmatmul.bf16.vlgmr.msra.gmra.mxu1 %v4783_v41  ;;  %v3980_v41 = vor.u32 %v4513_v31, %v3979_v30  ;;  %v1587_v12 = vadd.f32 %v1586_v37, %v1574_v5  ;;  %v4072_v19 = vor.u32 %v4534_v11, %v4069_v34  ;;  %v4123_v30 = vld [vmem:[#allocation5 + $0x160] sm:$0xf]  ;;  %v4514_v31 = vld [vmem:[#allocation5 + $0x54] sm:$0xf]  ;;  %v4543_v5 = vld [vmem:[#allocation5 + $0x134] sm:$0xf0] }
  0xf8   :  { %1793 = vmatmul.bf16.vlgmr.msra.gmra.mxu0 %v4765_v7  ;;  %2256 = vmatpush.bf16.msrb.mxu1 %v4068_v16  ;;  %v4052_v7 = vor.u32 %v4531_v27, %v4051_v26  ;;  %v1845_v16 = vsel %vm1837_vm0, %v1561_v54, %v1841_v62  ;;  %v4551_v26 = vld [vmem:[#allocation5 + $0x174] sm:$0xf0]  ;;  %v4124_v37 = vor.u32 %v4549_v33, %v4123_v30  ;;  %v4099_v62 = vld [vmem:[#allocation5 + $0x130] sm:$0xf]  ;;  %v4541_v11 = vld [vmem:[#allocation5 + $0x124] sm:$0xf0] }
  0xf9   :  { %1819 = vmatmul.bf16.vlgmr.msra.gmra.mxu2 %v4785_v42  ;;  %1832 = vmatmul.bf16.vlgmr.msra.gmra.mxu3 %v4781_v38  ;;  %v3971_v42 = vld [vmem:[#allocation5 + $0x30] sm:$0xf]  ;;  %v1599_v38 = vpop.f32.mrf.mxu1  ;;  %v4846_v27 = vpack.c.bf16 %v1845_v16, %v1845_v16  ;;  %v4100_v6 = vor.u32 %v4543_v5, %v4099_v62  ;;  %v3957_v16 = vld [vmem:[#allocation5 + $0x18] sm:$0xf0]  ;;  %v4563_v5 = vld [vmem:[#allocation5 + $0x1d4] sm:$0xf0] }
  0xfa   :  { %v3972_v46 = vor.u32 %v4511_v39, %v3971_v42  ;;  %v1600_v24 = vadd.f32 %v1599_v38, %v1587_v12  ;;  %v4115_v39 = vld [vmem:[#allocation5 + $0x150] sm:$0xf] }
  0xfb   :  { %2244 = vmatpush.bf16.msrb.mxu0 %v3996_v23  ;;  %v4532_v23 = vld [vmem:[#allocation5 + $0xe4] sm:$0xf]  ;;  %v4179_v62 = vld [vmem:[#allocation5 + $0x1d0] sm:$0xf] }
  0xfc   :  { %2257 = vmatpush.bf16.msrb.mxu1 %v4060_v25  ;;  %v4839_v51 = vpop.f32.mrf.mxu2  ;;  %v4841_v63 = vpop.f32.mrf.mxu3  ;;  %v4131_v25 = vld [vmem:[#allocation5 + $0x170] sm:$0xf]  ;;  %v4064_v32 = vor.u32 %v4532_v23, %v4061_v36  ;;  %v4021_v23 = vld [vmem:[#allocation5 + $0x98] sm:$0xf0] }
  0xfd   :  { %v1588_v57 = vpop.f32.mrf.mxu0  ;;  %v1613_v42 = vadd.f32 %v4839_v51, %v1600_v24  ;;  %v4083_v24 = vld [vmem:[#allocation5 + $0x110] sm:$0xf] }
  0xfe   :  { %v4510_v57 = vld [vmem:[#allocation5 + $0x34] sm:$0xf] }
  0xff   :  { %2245 = vmatpush.bf16.msrb.mxu0 %v3988_v45  ;;  %v4132_v45 = vor.u32 %v4551_v26, %v4131_v25  ;;  %v4539_v25 = vld [vmem:[#allocation5 + $0x114] sm:$0xf0] }
 0x100   :  { %2258 = vmatpush.bf16.msrb.mxu1 %v4052_v7  ;;  %v3989_v7 = vld [vmem:[#allocation5 + $0x58] sm:$0xf0] }
 0x101   :  { %v1601_v60 = vpop.f32.mrf.mxu1  ;;  %2269 = vmatpush.bf16.msrb.mxu2 %v4132_v45  ;;  %v3992_v38 = vor.u32 %v4514_v31, %v3989_v7  ;;  %v3949_v45 = vld [vmem:[#allocation5 + $0x8] sm:$0xf0]  ;;  %v4520_v31 = vld [vmem:[#allocation5 + $0x84] sm:$0xf] }
 0x102   :  { %v4037_v60 = vld [vmem:[#allocation5 + $0xb8] sm:$0xf0]  ;;  %v4013_v7 = vld [vmem:[#allocation5 + $0x88] sm:$0xf0] }
 0x103   :  { %2246 = vmatpush.bf16.msrb.mxu0 %v3980_v41  ;;  %v4053_v41 = vld [vmem:[#allocation5 + $0xd8] sm:$0xf0] }
 0x104   :  { %2259 = vmatpush.bf16.msrb.mxu1 %v4044_v40  ;;  %v1614_v4 = vpop.f32.mrf.mxu2  ;;  %v1627_v10 = vpop.f32.mrf.mxu3  ;;  %v4547_v40 = vld [vmem:[#allocation5 + $0x154] sm:$0xf0]  ;;  %v4056_v44 = vor.u32 %v4530_v35, %v4053_v41  ;;  %v4075_v35 = vld [vmem:[#allocation5 + $0x100] sm:$0xf]  ;;  %v4537_v41 = vld [vmem:[#allocation5 + $0x104] sm:$0xf0] }
 0x105   :  { %2270 = vmatpush.bf16.msrb.mxu2 %v4124_v37  ;;  %v4116_v48 = vor.u32 %v4547_v40, %v4115_v39  ;;  %v4029_v4 = vld [vmem:[#allocation5 + $0xa8] sm:$0xf0]  ;;  %v4091_v10 = vld [vmem:[#allocation5 + $0x120] sm:$0xf]  ;;  %v4550_v39 = vld [vmem:[#allocation5 + $0x174] sm:$0xf]  ;;  %v4076_v43 = vor.u32 %v4537_v41, %v4075_v35 }
 0x106   :  { %v4092_v36 = vor.u32 %v4541_v11, %v4091_v10  ;;  %v4133_v40 = vld [vmem:[#allocation5 + $0x178] sm:$0xf0] }
 0x107   :  { %2247 = vmatpush.bf16.msrb.mxu0 %v3972_v46  ;;  %v4528_v46 = vld [vmem:[#allocation5 + $0xc4] sm:$0xf]  ;;  %v4136_v50 = vor.u32 %v4550_v39, %v4133_v40  ;;  %v4566_v40 = vld [vmem:[#allocation5 + $0x1f4] sm:$0xf] }
 0x108   :  { %2260 = vmatpush.bf16.msrb.mxu1 %v4036_v49  ;;  %v1626_v49 = vadd.f32 %v4841_v63, %v1613_v42  ;;  %v4048_v58 = vor.u32 %v4528_v46, %v4045_v47  ;;  %v3976_v63 = vor.u32 %v4510_v57, %v3973_v0  ;;  %v4125_v46 = vld [vmem:[#allocation5 + $0x168] sm:$0xf0]  ;;  %v4187_v57 = vld [vmem:[#allocation5 + $0x1e0] sm:$0xf]  ;;  %v4565_v0 = vld [vmem:[#allocation5 + $0x1e4] sm:$0xf0] }
 0x109   :  { %2271 = vmatpush.bf16.msrb.mxu2 %v4116_v48  ;;  %v4195_v48 = vld [vmem:[#allocation5 + $0x1f0] sm:$0xf] }
 0x10b   :  { %2248 = vmatpush.bf16.msrb.mxu0 %v3964_v56 }
 0x10c   :  { %2261 = vmatpush.bf16.msrb.mxu1 %v4028_v59  ;;  %v4526_v59 = vld [vmem:[#allocation5 + $0xb4] sm:$0xf] }
 0x10d   :  { %v4040_v2 = vor.u32 %v4526_v59, %v4037_v60  ;;  %2272 = vmatpush.bf16.msrb.mxu2 %v4108_v22  ;;  %v4188_v59 = vor.u32 %v4565_v0, %v4187_v57  ;;  %v4109_v60 = vld [vmem:[#allocation5 + $0x148] sm:$0xf0]  ;;  %v322_v22 = vperm.slane %v4822_v13, 2 }
 0x10f   :  { %2249 = vmatpush.bf16.msrb.mxu0 %v3956_v21  ;;  %v4508_v21 = vld [vmem:[#allocation5 + $0x24] sm:$0xf] }
 0x110   :  { %2262 = vmatpush.bf16.msrb.mxu1 %v4020_v3  ;;  %v4524_v3 = vld [vmem:[#allocation5 + $0xa4] sm:$0xf]  ;;  %v3968_v12 = vor.u32 %v4508_v21, %v3965_v20  ;;  %v4180_v21 = vor.u32 %v4563_v5, %v4179_v62  ;;  %v4101_v20 = vld [vmem:[#allocation5 + $0x138] sm:$0xf0]  ;;  %v4558_v62 = vld [vmem:[#allocation5 + $0x1b4] sm:$0xf] }
 0x111   :  { %v4032_v17 = vor.u32 %v4524_v3, %v4029_v4  ;;  %2273 = vmatpush.bf16.msrb.mxu2 %v4100_v6  ;;  %v4171_v3 = vld [vmem:[#allocation5 + $0x1c0] sm:$0xf]  ;;  %v4561_v4 = vld [vmem:[#allocation5 + $0x1c4] sm:$0xf0]  ;;  %v4540_v6 = vld [vmem:[#allocation5 + $0x124] sm:$0xf] }
 0x112   :  { %v4172_v11 = vor.u32 %v4561_v4, %v4171_v3  ;;  %v4165_v5 = vld [vmem:[#allocation5 + $0x1b8] sm:$0xf0]  ;;  %v323_v4 = vperm.slane %v4822_v13, 3 }
 0x113   :  { %2250 = vmatpush.bf16.msrb.mxu0 %v3948_v14 }
 0x114   :  { %2263 = vmatpush.bf16.msrb.mxu1 %v4012_v29  ;;  %v1651_v56 = vpop.f32.mrf.mxu1  ;;  %v4506_v29 = vld [vmem:[#allocation5 + $0x14] sm:$0xf] }
 0x115   :  { %v1638_v54 = vpop.f32.mrf.mxu0  ;;  %v3960_v26 = vor.u32 %v4506_v29, %v3957_v16  ;;  %2274 = vmatpush.bf16.msrb.mxu2 %v4092_v36  ;;  %v4163_v29 = vld [vmem:[#allocation5 + $0x1b0] sm:$0xf]  ;;  %v4559_v16 = vld [vmem:[#allocation5 + $0x1b4] sm:$0xf0] }
 0x116   :  { %2251 = vmatmul.bf16.vlgmr.msrb.gmra.mxu0 %v4846_v27  ;;  %v1639_v51 = vadd.f32 %v1638_v54, %v1626_v49  ;;  %v4567_v49 = vld [vmem:[#allocation5 + $0x1f4] sm:$0xf0]  ;;  %v4117_v54 = vld [vmem:[#allocation5 + $0x158] sm:$0xf0] }
 0x117   :  { %2295 = vmatpush.bf16.msra.mxu0 %v4008_v15  ;;  %v4196_v53 = vor.u32 %v4567_v49, %v4195_v48 }
 0x118   :  { %2308 = vmatpush.bf16.msra.mxu1 %v4072_v19  ;;  %v1652_v61 = vadd.f32 %v1651_v56, %v1639_v51  ;;  %v4522_v19 = vld [vmem:[#allocation5 + $0x94] sm:$0xf] }
 0x119   :  { %v4024_v30 = vor.u32 %v4522_v19, %v4021_v23  ;;  %2282 = vmatpush.bf16.msrb.mxu3 %v4196_v53  ;;  %v4164_v23 = vor.u32 %v4559_v16, %v4163_v29 }
 0x11a   :  { %vm1838_vm1 = vcmp.gt.f32.partialorder %v1652_v61, 0.0  ;;  %v1842_v1 = vmul.f32 0.2, %v1652_v61 }
 0x11b   :  { %2296 = vmatpush.bf16.msra.mxu0 %v4000_v28  ;;  %v4504_v28 = vld [vmem:[#allocation5 + $0x4] sm:$0xf] }
 0x11c   :  { %2309 = vmatpush.bf16.msra.mxu1 %v4064_v32  ;;  %v1846_v8 = vsel %vm1838_vm1, %v1652_v61, %v1842_v1  ;;  %v4851_v9 = vpop.f32.mrf.mxu2  ;;  %v4853_v14 = vpop.f32.mrf.mxu3  ;;  %v4084_v32 = vor.u32 %v4539_v25, %v4083_v24  ;;  %v3952_v37 = vor.u32 %v4504_v28, %v3949_v45  ;;  %v4542_v1 = vld [vmem:[#allocation5 + $0x134] sm:$0xf]  ;;  %v4155_v25 = vld [vmem:[#allocation5 + $0x1a0] sm:$0xf]  ;;  %v4536_v28 = vld [vmem:[#allocation5 + $0x104] sm:$0xf] }
 0x11d   :  { %v1850_v34 = vpack.c.bf16 %v1846_v8, %v1846_v8  ;;  %v1640_v15 = vpop.f32.mrf.mxu0  ;;  %v1653_v18 = vpop.f32.mrf.mxu1  ;;  %2283 = vmatpush.bf16.msrb.mxu3 %v4188_v59  ;;  %v1665_v8 = vadd.f32 %v4851_v9, %v322_v22  ;;  %v4557_v9 = vld [vmem:[#allocation5 + $0x1a4] sm:$0xf0]  ;;  %v4077_v45 = vld [vmem:[#allocation5 + $0x108] sm:$0xf0] }
 0x11e   :  { %2275 = vmatpush.bf16.msrb.mxu2 %v4084_v32  ;;  %v4085_v18 = vld [vmem:[#allocation5 + $0x118] sm:$0xf0] }
 0x11f   :  { %2297 = vmatpush.bf16.msra.mxu0 %v3992_v38  ;;  %2264 = vmatmul.bf16.vlgmr.msrb.gmra.mxu1 %v1850_v34  ;;  %v4016_v38 = vor.u32 %v4520_v31, %v4013_v7  ;;  %v1678_v19 = vadd.f32 %v4853_v14, %v1665_v8  ;;  %v4156_v31 = vor.u32 %v4557_v9, %v4155_v25  ;;  %v4555_v14 = vld [vmem:[#allocation5 + $0x194] sm:$0xf0]  ;;  %v4149_v8 = vld [vmem:[#allocation5 + $0x198] sm:$0xf0] }
 0x120   :  { %2310 = vmatpush.bf16.msra.mxu1 %v4056_v44  ;;  %v4548_v44 = vld [vmem:[#allocation5 + $0x164] sm:$0xf]  ;;  %v4080_v7 = vor.u32 %v4536_v28, %v4077_v45 }
 0x121   :  { %v4128_v47 = vor.u32 %v4548_v44, %v4125_v46  ;;  %2284 = vmatpush.bf16.msrb.mxu3 %v4180_v21  ;;  %v4564_v46 = vld [vmem:[#allocation5 + $0x1e4] sm:$0xf] }
 0x122   :  { %2276 = vmatpush.bf16.msrb.mxu2 %v4076_v43  ;;  %v4556_v21 = vld [vmem:[#allocation5 + $0x1a4] sm:$0xf] }
 0x123   :  { %2298 = vmatpush.bf16.msra.mxu0 %v3984_v55  ;;  %v4120_v55 = vor.u32 %v4546_v52, %v4117_v54 }
 0x124   :  { %2311 = vmatpush.bf16.msra.mxu1 %v4048_v58  ;;  %v1666_v33 = vpop.f32.mrf.mxu2  ;;  %v1679_v42 = vpop.f32.mrf.mxu3  ;;  %v4544_v58 = vld [vmem:[#allocation5 + $0x144] sm:$0xf] }
 0x125   :  { %2285 = vmatpush.bf16.msrb.mxu3 %v4172_v11  ;;  %v4147_v33 = vld [vmem:[#allocation5 + $0x190] sm:$0xf]  ;;  %v4553_v42 = vld [vmem:[#allocation5 + $0x184] sm:$0xf0] }
 0x126   :  { %2321 = vmatpush.bf16.msra.mxu2 %v4136_v50  ;;  %v4148_v35 = vor.u32 %v4555_v14, %v4147_v33  ;;  %v1917_v33 = vld [vmem:[%s5284_s4] sm:$0x3] }
 0x127   :  { %2299 = vmatpush.bf16.msra.mxu0 %v3976_v63 }
 0x128   :  { %2312 = vmatpush.bf16.msra.mxu1 %v4040_v2  ;;  %v4104_v2 = vor.u32 %v4542_v1, %v4101_v20  ;;  %v4157_v1 = vld [vmem:[#allocation5 + $0x1a8] sm:$0xf0] }
 0x129   :  { %2286 = vmatpush.bf16.msrb.mxu3 %v4164_v23  ;;  %v4160_v3 = vor.u32 %v4556_v21, %v4157_v1  ;;  %v2373_v21 = vld [vmem:[%s5285_s5 + $0xd0] sm:$0xff] }
 0x12a   :  { %2322 = vmatpush.bf16.msra.mxu2 %v4128_v47  ;;  %v4189_v47 = vld [vmem:[#allocation5 + $0x1e8] sm:$0xf0] }
 0x12b   :  { %2300 = vmatpush.bf16.msra.mxu0 %v3968_v12  ;;  %v4192_v49 = vor.u32 %v4564_v46, %v4189_v47  ;;  %v4980_v1 = vld [vmem:[%s5285_s5 + $0x10] sm:$0xff] }
 0x12c   :  { %2313 = vmatpush.bf16.msra.mxu1 %v4032_v17  ;;  %v4538_v17 = vld [vmem:[#allocation5 + $0x114] sm:$0xf] }
 0x12d   :  { %v4088_v24 = vor.u32 %v4538_v17, %v4085_v18  ;;  %2287 = vmatpush.bf16.msrb.mxu3 %v4156_v31 }
 0x12e   :  { %2323 = vmatpush.bf16.msra.mxu2 %v4120_v55  ;;  %v4562_v55 = vld [vmem:[#allocation5 + $0x1d4] sm:$0xf] }
 0x12f   :  { %2301 = vmatpush.bf16.msra.mxu0 %v3960_v26 }
 0x130   :  { %2314 = vmatpush.bf16.msra.mxu1 %v4024_v30 }
 0x131   :  { %2288 = vmatpush.bf16.msrb.mxu3 %v4148_v35  ;;  %v1919_v35 = vperm.slane %v1917_v33, 0 }
 0x133   :  { %2302 = vmatpush.bf16.msra.mxu0 %v3952_v37  ;;  %v4139_v37 = vld [vmem:[#allocation5 + $0x180] sm:$0xf] }
 0x134   :  { %2315 = vmatpush.bf16.msra.mxu1 %v4016_v38  ;;  %v1703_v56 = vpop.f32.mrf.mxu1  ;;  %v4140_v39 = vor.u32 %v4553_v42, %v4139_v37  ;;  %v4197_v38 = vld [vmem:[#allocation5 + $0x1f8] sm:$0xf0] }
 0x135   :  { %v1690_v51 = vpop.f32.mrf.mxu0  ;;  %v4200_v43 = vor.u32 %v4566_v40, %v4197_v38  ;;  %v1920_v40 = vperm.slane %v1917_v33, 1 }
 0x136   :  { %2303 = vmatmul.bf16.vlgmr.msra.gmra.mxu0 %v4846_v27  ;;  %v4112_v27 = vor.u32 %v4544_v58, %v4109_v60  ;;  %v1691_v30 = vadd.f32 %v1690_v51, %v1678_v19  ;;  %2289 = vmatpush.bf16.msrb.mxu3 %v4140_v39  ;;  %v4181_v51 = vld [vmem:[#allocation5 + $0x1d8] sm:$0xf0]  ;;  %v4560_v60 = vld [vmem:[#allocation5 + $0x1c4] sm:$0xf] }
 0x137   :  { %2316 = vmatmul.bf16.vlgmr.msra.gmra.mxu1 %v1850_v34  ;;  %v4093_v34 = vld [vmem:[#allocation5 + $0x128] sm:$0xf0]  ;;  %v4184_v57 = vor.u32 %v4562_v55, %v4181_v51  ;;  %v4905_v51 = vld [vmem:[%s5285_s5 + $0x48] sm:$0xff] }
 0x138   :  { %2324 = vmatpush.bf16.msra.mxu2 %v4112_v27  ;;  %v4096_v15 = vor.u32 %v4540_v6, %v4093_v34  ;;  %v1704_v32 = vadd.f32 %v1703_v56, %v1691_v30  ;;  %v4173_v27 = vld [vmem:[#allocation5 + $0x1c8] sm:$0xf0]  ;;  %v4554_v6 = vld [vmem:[#allocation5 + $0x194] sm:$0xf] }
 0x139   :  { %v4899_v55 = vld [vmem:[%s5285_s5 + $0x50] sm:$0xff] }
 0x13a   :  { %2334 = vmatpush.bf16.msra.mxu3 %v4200_v43 }
 0x13c   :  { %v1716_v61 = vpop.f32.mrf.mxu2  ;;  %v1729_v63 = vpop.f32.mrf.mxu3  ;;  %2325 = vmatpush.bf16.msra.mxu2 %v4104_v2 }
 0x13d   :  { %v1692_v10 = vpop.f32.mrf.mxu0  ;;  %v1705_v12 = vpop.f32.mrf.mxu1  ;;  %v1717_v41 = vadd.f32 %v1716_v61, %v1704_v32  ;;  %v4176_v61 = vor.u32 %v4560_v60, %v4173_v27  ;;  %v4940_v60 = vld [vmem:[%s5285_s5 + $0xe8] sm:$0xff] }
 0x13e   :  { %2335 = vmatpush.bf16.msra.mxu3 %v4192_v49  ;;  %v4152_v10 = vor.u32 %v4554_v6, %v4149_v8  ;;  %v4552_v12 = vld [vmem:[#allocation5 + $0x184] sm:$0xf]  ;;  %v2370_v8 = vld [vmem:[%s5285_s5 + $0xb8] sm:$0xff] }
 0x13f   :  { %v1730_v50 = vadd.f32 %v1729_v63, %v1717_v41  ;;  %v4168_v63 = vor.u32 %v4558_v62, %v4165_v5  ;;  %v4875_v49 = vld [vmem:[%s5285_s5 + $0x70] sm:$0xff]  ;;  %v4946_v27 = vld [vmem:[%s5285_s5 + $0x28] sm:$0xff]  ;;  %v4964_v62 = vld [vmem:[%s5285_s5 + $0xd8] sm:$0xff] }
 0x140   :  { %2326 = vmatpush.bf16.msra.mxu2 %v4096_v15  ;;  %v4141_v15 = vld [vmem:[#allocation5 + $0x188] sm:$0xf0] }
 0x141   :  { %v4144_v29 = vor.u32 %v4552_v12, %v4141_v15  ;;  %v4970_v5 = vld [vmem:[%s5285_s5 + $0x18] sm:$0xff] }
 0x142   :  { %2336 = vmatpush.bf16.msra.mxu3 %v4184_v57  ;;  %v4918_v57 = vld [vmem:[%s5285_s5 + $0x38] sm:$0xff] }
 0x143   :  { %v2366_v15 = vld [vmem:[%s5285_s5 + $0x98] sm:$0xff] }
 0x144   :  { %v1718_v36 = vpop.f32.mrf.mxu2  ;;  %v1731_v26 = vpop.f32.mrf.mxu3  ;;  %2327 = vmatpush.bf16.msra.mxu2 %v4088_v24 }
 0x146   :  { %2337 = vmatpush.bf16.msra.mxu3 %v4176_v61  ;;  %v4958_v61 = vld [vmem:[%s5285_s5 + $0x20] sm:$0xff] }
 0x148   :  { %2328 = vmatpush.bf16.msra.mxu2 %v4080_v7 }
 0x14a   :  { %2338 = vmatpush.bf16.msra.mxu3 %v4168_v63 }
 0x14e   :  { %2339 = vmatpush.bf16.msra.mxu3 %v4160_v3  ;;  %v4996_v3 = vld [vmem:[%s5285_s5] sm:$0xff] }
 0x152   :  { %2340 = vmatpush.bf16.msra.mxu3 %v4152_v10  ;;  %v2369_v10 = vld [vmem:[%s5285_s5 + $0xb0] sm:$0xff] }
 0x154   :  { %v1755_v52 = vpop.f32.mrf.mxu1 }
 0x155   :  { %v1742_v44 = vpop.f32.mrf.mxu0  ;;  %v1756_v11 = vadd.f32 %v1755_v52, %v323_v4  ;;  %v4881_v52 = vld [vmem:[%s5285_s5 + $0x68] sm:$0xff]  ;;  %v2371_v4 = vld [vmem:[%s5285_s5 + $0xc0] sm:$0xff] }
 0x156   :  { %v1743_v48 = vadd.f32 %v1742_v44, %v1730_v50  ;;  %2341 = vmatpush.bf16.msra.mxu3 %v4144_v29  ;;  %v2365_v29 = vld [vmem:[%s5285_s5 + $0x90] sm:$0xff] }
 0x158   :  { %vm1839_vm2 = vcmp.gt.f32.partialorder %v1743_v48, 0.0  ;;  %v1843_v53 = vmul.f32 0.2, %v1743_v48 }
 0x15a   :  { %v1847_v54 = vsel %vm1839_vm2, %v1743_v48, %v1843_v53  ;;  %v4870_v48 = vld [vmem:[%s5285_s5 + $0x78] sm:$0xff]  ;;  %v4887_v53 = vld [vmem:[%s5285_s5 + $0x60] sm:$0xff]  ;;  %vm3041_vm2 = vcmask 7168  }
 0x15b   :  { %v1851_v56 = vpack.c.bf16 %v1847_v54, %v1847_v54  ;;  %2382 = vmatpush.msrb.mxu0 %v4870_v48  ;;  %v4894_v54 = vld [vmem:[%s5285_s5 + $0x58] sm:$0xff] }
 0x15c   :  { %v1768_v0 = vpop.f32.mrf.mxu2  ;;  %v1781_v58 = vpop.f32.mrf.mxu3 }
 0x15d   :  { %2277 = vmatmul.bf16.vlgmr.msrb.gmra.mxu2 %v1851_v56  ;;  %v1744_v59 = vpop.f32.mrf.mxu0  ;;  %v1757_v22 = vpop.f32.mrf.mxu1  ;;  %v1769_v34 = vadd.f32 %v1768_v0, %v1756_v11  ;;  %2383 = vmatpush.msrb.mxu0 %v4875_v49  ;;  %v4923_v0 = vld [vmem:[%s5285_s5 + $0xf8] sm:$0xff]  ;;  %v2368_v11 = vld [vmem:[%s5285_s5 + $0xa8] sm:$0xff] }
 0x15e   :  { %2402 = vmatpush.msrb.mxu1 %v4923_v0  ;;  %v4934_v59 = vld [vmem:[%s5285_s5 + $0xf0] sm:$0xff]  ;;  %v4952_v22 = vld [vmem:[%s5285_s5 + $0xe0] sm:$0xff] }
 0x15f   :  { %v1782_v16 = vadd.f32 %v1781_v58, %v1769_v34  ;;  %2384 = vmatpush.msrb.mxu0 %v4881_v52  ;;  %v4929_v58 = vld [vmem:[%s5285_s5 + $0x30] sm:$0xff]  ;;  %v2367_v34 = vld [vmem:[%s5285_s5 + $0xa0] sm:$0xff] }
 0x160   :  { %2403 = vmatpush.msrb.mxu1 %v4934_v59 }
 0x161   :  { %2385 = vmatpush.msrb.mxu0 %v4887_v53 }
 0x162   :  { %2404 = vmatpush.msrb.mxu1 %v4940_v60 }
 0x163   :  { %2386 = vmatpush.msrb.mxu0 %v4894_v54 }
 0x164   :  { %v1770_v20 = vpop.f32.mrf.mxu2  ;;  %v1783_v2 = vpop.f32.mrf.mxu3  ;;  %2405 = vmatpush.msrb.mxu1 %v4952_v22 }
 0x165   :  { %2387 = vmatpush.msrb.mxu0 %v4899_v55  ;;  %v4987_v20 = vld [vmem:[%s5285_s5 + $0x8] sm:$0xff] }
 0x166   :  { %2406 = vmatpush.msrb.mxu1 %v4964_v62  ;;  %v2372_v2 = vld [vmem:[%s5285_s5 + $0xc8] sm:$0xff] }
 0x167   :  { %2388 = vmatpush.msrb.mxu0 %v4905_v51 }
 0x168   :  { %2407 = vmatpush.msrb.mxu1 %v2373_v21 }
 0x16a   :  { %2408 = vmatpush.msrb.mxu1 %v2372_v2 }
 0x16c   :  { %2409 = vmatpush.msrb.mxu1 %v2371_v4 }
 0x16d   :  { %2329 = vmatmul.bf16.vlgmr.msra.gmra.mxu2 %v1851_v56  ;;  %v4911_v56 = vld [vmem:[%s5285_s5 + $0x40] sm:$0xff] }
 0x16e   :  { %2389 = vmatpush.msrb.mxu0 %v4911_v56  ;;  %2410 = vmatpush.msrb.mxu1 %v2370_v8 }
 0x170   :  { %2390 = vmatpush.msrb.mxu0 %v4918_v57  ;;  %2411 = vmatpush.msrb.mxu1 %v2369_v10 }
 0x172   :  { %2391 = vmatpush.msrb.mxu0 %v4929_v58  ;;  %2412 = vmatpush.msrb.mxu1 %v2368_v11 }
 0x174   :  { %v1807_v18 = vpop.f32.mrf.mxu1  ;;  %2392 = vmatpush.msrb.mxu0 %v4946_v27  ;;  %2413 = vmatpush.msrb.mxu1 %v2367_v34 }
 0x175   :  { %v1794_v17 = vpop.f32.mrf.mxu0 }
 0x176   :  { %v1795_v19 = vadd.f32 %v1794_v17, %v1782_v16  ;;  %2393 = vmatpush.msrb.mxu0 %v4958_v61  ;;  %2414 = vmatpush.msrb.mxu1 %v2366_v15  ;;  %v5023_v16 = vld [vmem:[%s5285_s5 + $0x88] sm:$0xff]  ;;  %v5029_v17 = vld [vmem:[%s5285_s5 + $0x80] sm:$0xff] }
 0x178   :  { %v1808_v23 = vadd.f32 %v1807_v18, %v1795_v19  ;;  %2394 = vmatpush.msrb.mxu0 %v4970_v5  ;;  %2415 = vmatpush.msrb.mxu1 %v2365_v29 }
 0x17a   :  { %2395 = vmatpush.msrb.mxu0 %v4980_v1  ;;  %2416 = vmatpush.msrb.mxu1 %v5023_v16 }
 0x17c   :  { %v1820_v36 = vpop.f32.mrf.mxu2  ;;  %v1833_v13 = vpop.f32.mrf.mxu3  ;;  %2396 = vmatpush.msrb.mxu0 %v4987_v20  ;;  %2417 = vmatpush.msrb.mxu1 %v5029_v17 }
 0x17d   :  { %v1821_v24 = vadd.f32 %v1820_v36, %v1808_v23  ;;  %v1796_v25 = vpop.f32.mrf.mxu0  ;;  %v1809_v9 = vpop.f32.mrf.mxu1 }
 0x17e   :  { %2397 = vmatpush.msrb.mxu0 %v4996_v3 }
 0x17f   :  { %v1834_v26 = vadd.f32 %v1833_v13, %v1821_v24 }
 0x181   :  { %vm1840_vm3 = vcmp.gt.f32.partialorder %v1834_v26, 0.0  ;;  %v1844_v28 = vmul.f32 0.2, %v1834_v26 }
 0x183   :  { %v1848_v45 = vsel %vm1840_vm3, %v1834_v26, %v1844_v28  ;;  %v5043_v28 = vld [vmem:[%s5286_s6] sm:$0xff] }
 0x184   :  { %v1852_v30 = vpack.c.bf16 %v1848_v45, %v1848_v45  ;;  %v1822_v31 = vpop.f32.mrf.mxu2  ;;  %v1835_v7 = vpop.f32.mrf.mxu3  ;;  %2432 = vst [vmem:[#allocation1] ss:$2 sm:$0xff] %v5043_v28 }
 0x186   :  { %2290 = vmatmul.bf16.vlgmr.msrb.gmra.mxu3 %v1852_v30 }
 0x18b   :  { %v2433_v45 = vld.sshfl [vmem:[#allocation1] sm:$0xff pattern:$0x75316420] }
 0x18c   :  { %4201 = vmatpush.msk.msrb.mxu2 %vm2439_vm4, %v2433_v45  ;;  %v4577_v45 = vld [vmem:[%s5289_s9 + $0x48] sm:$0xff] }
 0x18e   :  { %2490 = vmatpush.msra.mxu2 %v4870_v48 }
 0x190   :  { %2491 = vmatpush.msra.mxu2 %v4875_v49 }
 0x192   :  { %2492 = vmatpush.msra.mxu2 %v4881_v52 }
 0x193   :  { %v2252_v32 = vpop.f32.mrf.mxu0 }
 0x194   :  { %v2253_v41 = vadd.f32 %v2252_v32, %v1919_v35  ;;  %2493 = vmatpush.msra.mxu2 %v4887_v53 }
 0x196   :  { %2342 = vmatmul.bf16.vlgmr.msra.gmra.mxu3 %v1852_v30  ;;  %v2434_v30 = vld.sshfl [vmem:[#allocation1 + $0x8] sm:$0xff pattern:$0x75316420]  ;;  %2494 = vmatpush.msra.mxu2 %v4894_v54 }
 0x197   :  { %4203 = vmatpush.msk.msrb.mxu3 %vm2439_vm4, %v2434_v30  ;;  %2552 = vst [vmem:[#allocation1] ss:$2 sm:$0xff] %v5043_v28  ;;  %v4568_v30 = vld [vmem:[%s5289_s9] sm:$0xff] }
 0x198   :  { %2495 = vmatpush.msra.mxu2 %v4899_v55 }
 0x199   :  { %2510 = vmatpush.msra.mxu3 %v4923_v0 }
 0x19a   :  { %2496 = vmatpush.msra.mxu2 %v4905_v51 }
 0x19b   :  { %v2254_v14 = vpop.f32.mrf.mxu0  ;;  %2511 = vmatpush.msra.mxu3 %v4934_v59 }
 0x19c   :  { %v2265_v37 = vpop.f32.mrf.mxu1  ;;  %2497 = vmatpush.msra.mxu2 %v4911_v56 }
 0x19d   :  { %v4863_v42 = vadd.f32 %v2265_v37, %v2253_v41  ;;  %2512 = vmatpush.msra.mxu3 %v4940_v60 }
 0x19e   :  { %2498 = vmatpush.msra.mxu2 %v4918_v57  ;;  %v2553_v55 = vld.sshfl [vmem:[#allocation1] sm:$0xff pattern:$0x75316420]  ;;  %v2554_v51 = vld.sshfl [vmem:[#allocation1 + $0x8] sm:$0xff pattern:$0x75316420] }
 0x19f   :  { %2513 = vmatpush.msra.mxu3 %v4952_v22  ;;  %4205 = vmatpush.msk.msra.mxu0 %vm2439_vm4, %v2553_v55  ;;  %2602 = vst [vmem:[#allocation1] ss:$2 sm:$0xff] %v5043_v28  ;;  %v4569_v28 = vld [vmem:[%s5289_s9 + $0x8] sm:$0xff] }
 0x1a0   :  { %2499 = vmatpush.msra.mxu2 %v4929_v58 }
 0x1a1   :  { %2514 = vmatpush.msra.mxu3 %v4964_v62 }
 0x1a2   :  { %2500 = vmatpush.msra.mxu2 %v4946_v27 }
 0x1a3   :  { %2515 = vmatpush.msra.mxu3 %v2373_v21  ;;  %v4582_v21 = vld [vmem:[%s5289_s9 + $0x70] sm:$0xff] }
 0x1a4   :  { %v2267_v39 = vpop.f32.mrf.mxu1  ;;  %2501 = vmatpush.msra.mxu2 %v4958_v61 }
 0x1a5   :  { %2516 = vmatpush.msra.mxu3 %v2372_v2 }
 0x1a6   :  { %2502 = vmatpush.msra.mxu2 %v4970_v5  ;;  %v2604_v59 = vld.sshfl [vmem:[#allocation1 + $0x8] sm:$0xff pattern:$0x75316420]  ;;  %v2603_v60 = vld.sshfl [vmem:[#allocation1] sm:$0xff pattern:$0x75316420] }
 0x1a7   :  { %2517 = vmatpush.msra.mxu3 %v2371_v4  ;;  %v4583_v5 = vld [vmem:[%s5289_s9 + $0x78] sm:$0xff] }
 0x1a8   :  { %2503 = vmatpush.msra.mxu2 %v4980_v1  ;;  %2813 = vmatpush.bf16.msra.mxu1 %v4583_v5  ;;  %v4581_v1 = vld [vmem:[%s5289_s9 + $0x68] sm:$0xff] }
 0x1a9   :  { %2518 = vmatpush.msra.mxu3 %v2370_v8  ;;  %v2380_v8 = vld [vmem:[%s5287_s7] sm:$0x1] }
 0x1aa   :  { %2504 = vmatpush.msra.mxu2 %v4987_v20 }
 0x1ab   :  { %2519 = vmatpush.msra.mxu3 %v2369_v10 }
 0x1ac   :  { %2505 = vmatpush.msra.mxu2 %v4996_v3  ;;  %2814 = vmatpush.bf16.msra.mxu1 %v4582_v21 }
 0x1ad   :  { %2520 = vmatpush.msra.mxu3 %v2368_v11 }
 0x1af   :  { %2521 = vmatpush.msra.mxu3 %v2367_v34  ;;  %v4575_v34 = vld [vmem:[%s5289_s9 + $0x38] sm:$0xff] }
 0x1b0   :  { %2815 = vmatpush.bf16.msra.mxu1 %v4581_v1 }
 0x1b1   :  { %2522 = vmatpush.msra.mxu3 %v2366_v15  ;;  %v2381_v15 = vld [vmem:[%s5288_s8] sm:$0x1] }
 0x1b3   :  { %v2304_v38 = vpop.f32.mrf.mxu0  ;;  %2523 = vmatpush.msra.mxu3 %v2365_v29 }
 0x1b4   :  { %v2305_v43 = vadd.f32 %v2304_v38, %v1920_v40  ;;  %v2317_v50 = vpop.f32.mrf.mxu1 }
 0x1b5   :  { %2524 = vmatpush.msra.mxu3 %v5023_v16  ;;  %v4574_v16 = vld [vmem:[%s5289_s9 + $0x30] sm:$0xff] }
 0x1b6   :  { %v4865_v44 = vadd.f32 %v2317_v50, %v2305_v43 }
 0x1b7   :  { %2525 = vmatpush.msra.mxu3 %v5029_v17 }
 0x1bb   :  { %v2306_v46 = vpop.f32.mrf.mxu0 }
 0x1bc   :  { %v2319_v47 = vpop.f32.mrf.mxu1 }
 0x1e0   :  { %v2278_v63 = vpop.f32.mrf.mxu2 }
 0x1e1   :  { %v2279_v19 = vadd.f32 %v2278_v63, %v4863_v42 }
 0x1e8   :  { %v2280_v6 = vpop.f32.mrf.mxu2 }
 0x1f0   :  { %v2330_v12 = vpop.f32.mrf.mxu2 }
 0x1f1   :  { %v2331_v13 = vadd.f32 %v2330_v12, %v4865_v44 }
 0x1f8   :  { %v2332_v18 = vpop.f32.mrf.mxu2 }
 0x1f9   :  { %v4573_v18 = vld [vmem:[%s5289_s9 + $0x28] sm:$0xff] }
 0x209   :  { %v2291_v23 = vpop.f32.mrf.mxu3 }
 0x20a   :  { %v5033_v36 = vadd.f32 %v2291_v23, %v2279_v19  ;;  %v4572_v19 = vld [vmem:[%s5289_s9 + $0x20] sm:$0xff] }
 0x20b   :  { %v4580_v23 = vld [vmem:[%s5289_s9 + $0x60] sm:$0xff] }
 0x20c   :  { %2398 = vmatmul.f32.vlgmr.msrb.gmra.mxu0 %v5033_v36  ;;  %2816 = vmatpush.bf16.msra.mxu1 %v4580_v23 }
 0x20d   :  { %4209 = vmatpush.msk.msrb.mxu0 %vm2439_vm4, %v2603_v60 }
 0x211   :  { %v2293_v24 = vpop.f32.mrf.mxu3 }
 0x212   :  { %v4571_v24 = vld [vmem:[%s5289_s9 + $0x18] sm:$0xff] }
 0x219   :  { %v2343_v25 = vpop.f32.mrf.mxu3 }
 0x21a   :  { %v5037_v9 = vadd.f32 %v2343_v25, %v2331_v13  ;;  %v4579_v13 = vld [vmem:[%s5289_s9 + $0x58] sm:$0xff]  ;;  %v4570_v25 = vld [vmem:[%s5289_s9 + $0x10] sm:$0xff] }
 0x21b   :  { %2817 = vmatpush.bf16.msra.mxu1 %v4579_v13 }
 0x21c   :  { %2418 = vmatmul.f32.vlgmr.msrb.gmra.mxu1 %v5037_v9 }
 0x221   :  { %v2345_v26 = vpop.f32.mrf.mxu3 }
 0x222   :  { %v4578_v26 = vld [vmem:[%s5289_s9 + $0x50] sm:$0xff] }
 0x223   :  { %2818 = vmatpush.bf16.msra.mxu1 %v4578_v26 }
 0x227   :  { %2819 = vmatpush.bf16.msra.mxu1 %v4577_v45 }
 0x289   :  { %v2399_v31 = vpop.f32.mrf.mxu0 }
 0x299   :  { %v2419_v7 = vpop.f32.mrf.mxu1 }
 0x29a   :  { %v2420_v32 = vadd.f32 %v2419_v7, %v2399_v31  ;;  %v4576_v31 = vld [vmem:[%s5289_s9 + $0x40] sm:$0xff]  ;;  %v5144_v7 = vld [vmem:[%s5291_s11 + $0x78] sm:$0xff] }
 0x29b   :  { %2820 = vmatpush.bf16.msra.mxu1 %v4576_v31  ;;  %v3010_v31 = vld [vmem:[%s5295_s15 + $0x70] sm:$0xff] }
 0x29c   :  { %v2423_v33 = vsel %vm2422_vm5, %v2420_v32, 0.0  ;;  %v5149_v32 = vld [vmem:[%s5291_s11 + $0x70] sm:$0xff] }
 0x29d   :  { %v2424_v14 = vrot.slane %v2423_v33, 4 }
 0x29f   :  { %v2425_v35 = vadd.f32 %v2424_v14, %v2423_v33  ;;  %v5155_v33 = vld [vmem:[%s5291_s11 + $0x68] sm:$0xff]  ;;  %v5161_v14 = vld [vmem:[%s5291_s11 + $0x60] sm:$0xff] }
 0x2a1   :  { %v2426_v41 = vrot.slane %v2425_v35, 2 }
 0x2a3   :  { %v2427_v37 = vadd.f32 %v2426_v41, %v2425_v35  ;;  %v2837_v35 = vld [vmem:[%s5291_s11 + $0x58] sm:$0xff]  ;;  %v2836_v41 = vld [vmem:[%s5291_s11 + $0x50] sm:$0xff] }
 0x2a5   :  { %v2428_v42 = vrot.slane %v2427_v37, 1 }
 0x2a7   :  { %v2429_v39 = vadd.f32 %v2428_v42, %v2427_v37  ;;  %v2835_v37 = vld [vmem:[%s5291_s11 + $0x48] sm:$0xff] }
 0x2a9   :  { %v2430_v40 = vmul.f32 0.010204081, %v2429_v39  ;;  %v2834_v39 = vld [vmem:[%s5291_s11 + $0x40] sm:$0xff] }
 0x2ab   :  { %4202 = vmatmul.msk.f32.vlgmr.msrb.gmra.mxu2 %vm2435_vm6, %v2430_v40  ;;  %4204 = vmatmul.msk.f32.vlgmr.msrb.gmra.mxu3 %vm2435_vm6, %v2430_v40 }
 0x2ac   :  { %4207 = vmatpush.msk.msrb.mxu2 %vm2439_vm4, %v2554_v51  ;;  %4211 = vmatpush.msk.msrb.mxu3 %vm2439_vm4, %v2604_v59 }
 0x32e   :  { %v2461_v38 = vpop.f32.mrf.mxu2  ;;  %v2481_v43 = vpop.f32.mrf.mxu3 }
 0x32f   :  { %v2484_v50 = vperm.slane %v2461_v38, 0  ;;  %v2485_v44 = vperm.slane %v2481_v43, 0  ;;  %v2832_v38 = vld [vmem:[%s5291_s11 + $0x30] sm:$0xff] }
 0x331   :  { %v2486_v46 = vsub.f32 %v5033_v36, %v2484_v50  ;;  %v2487_v47 = vsub.f32 %v5037_v9, %v2485_v44  ;;  %v2831_v44 = vld [vmem:[%s5291_s11 + $0x28] sm:$0xff] }
 0x333   :  { %v2488_v48 = vmul.f32 %v2486_v46, %v2486_v46  ;;  %v2489_v49 = vmul.f32 %v2487_v47, %v2487_v47 }
 0x335   :  { %2506 = vmatmul.f32.vlgmr.msra.gmra.mxu2 %v2488_v48  ;;  %2526 = vmatmul.f32.vlgmr.msra.gmra.mxu3 %v2489_v49  ;;  %v2830_v48 = vld [vmem:[%s5291_s11 + $0x20] sm:$0xff] }
 0x336   :  { %2845 = vmatpush.msra.mxu2 %v5144_v7 }
 0x338   :  { %2846 = vmatpush.msra.mxu2 %v5149_v32 }
 0x33a   :  { %2847 = vmatpush.msra.mxu2 %v5155_v33 }
 0x33c   :  { %2848 = vmatpush.msra.mxu2 %v5161_v14 }
 0x33e   :  { %2849 = vmatpush.msra.mxu2 %v2837_v35 }
 0x340   :  { %2850 = vmatpush.msra.mxu2 %v2836_v41 }
 0x342   :  { %2851 = vmatpush.msra.mxu2 %v2835_v37 }
 0x344   :  { %2852 = vmatpush.msra.mxu2 %v2834_v39 }
 0x3b8   :  { %v2507_v52 = vpop.f32.mrf.mxu2  ;;  %v2527_v53 = vpop.f32.mrf.mxu3 }
 0x3b9   :  { %v2528_v54 = vadd.f32 %v2527_v53, %v2507_v52 }
 0x3bb   :  { %v2530_v56 = vsel %vm2422_vm5, %v2528_v54, 0.0  ;;  %v2829_v54 = vld [vmem:[%s5291_s11 + $0x18] sm:$0xff] }
 0x3bc   :  { %v2531_v57 = vrot.slane %v2530_v56, 4 }
 0x3be   :  { %v2532_v0 = vadd.f32 %v2531_v57, %v2530_v56 }
 0x3c0   :  { %v2533_v58 = vrot.slane %v2532_v0, 2 }
 0x3c2   :  { %v2534_v27 = vadd.f32 %v2533_v58, %v2532_v0 }
 0x3c4   :  { %v2535_v22 = vrot.slane %v2534_v27, 1 }
 0x3c6   :  { %v2536_v61 = vadd.f32 %v2535_v22, %v2534_v27  ;;  %v2828_v22 = vld [vmem:[%s5291_s11 + $0x10] sm:$0xff] }
 0x3c8   :  { %v2537_v62 = vmul.f32 0.010204081, %v2536_v61  ;;  %v2826_v61 = vld [vmem:[%s5291_s11] sm:$0xff] }
 0x3ca   :  { %v2538_v63 = vadd.f32 1e-05, %v2537_v62  ;;  %v4590_v62 = vld [vmem:[%s5290_s10] ss:$0 sm:$0xff] }
 0x3cc   :  { %4592 = vrsqrt.f32 %v2538_v63  ;;  %vm2545_vm8 = vweird.f32 %v2538_v63 }
 0x3d2   :  { %v4593_v20 = vpop.eup %4592 }
 0x3d3   :  { %v2540_v2 = vmul.f32 %v4593_v20, %v2538_v63  ;;  %vm2546_vm7 = vweird.f32 %v4593_v20 }
 0x3d4   :  { %vm2547_vm9 = vmor %vm2545_vm8, %vm2546_vm7 }
 0x3d5   :  { %v2541_v3 = vmul.f32 %v4593_v20, %v2540_v2 }
 0x3d7   :  { %v2542_v4 = vmul.f32 0.5, %v2541_v3  ;;  %v2842_v3 = vld [vmem:[%s5292_s12] sm:$0xff] }
 0x3d8   :  { %2893 = vmatpush.msra.mxu3 %v2842_v3 }
 0x3d9   :  { %v2543_v6 = vsub.f32 1.5, %v2542_v4 }
 0x3db   :  { %v2544_v10 = vmul.f32 %v4593_v20, %v2543_v6 }
 0x3dd   :  { %v2548_v11 = vsel %vm2547_vm9, %v4593_v20, %v2544_v10 }
 0x3de   :  { %v2549_v12 = vmul.f32 %v2548_v11, %v2380_v8 }
 0x3e0   :  { %4206 = vmatmul.msk.f32.vlgmr.msra.gmra.mxu0 %vm2435_vm6, %v2549_v12  ;;  %4208 = vmatmul.msk.f32.vlgmr.msrb.gmra.mxu2 %vm2435_vm6, %v2549_v12  ;;  %v2550_v29 = vmul.f32 %v2549_v12, %v2430_v40  ;;  %v2833_v40 = vld [vmem:[%s5291_s11 + $0x38] sm:$0xff] }
 0x3e1   :  { %2800 = vmatpush.bf16.msra.mxu0 %v4575_v34  ;;  %2853 = vmatpush.msra.mxu2 %v2833_v40 }
 0x3e2   :  { %v2551_v17 = vsub.f32 %v2381_v15, %v2550_v29 }
 0x3e3   :  { %2854 = vmatpush.msra.mxu2 %v2832_v38 }
 0x3e4   :  { %4212 = vmatmul.msk.f32.vlgmr.msrb.gmra.mxu3 %vm2435_vm6, %v2551_v17 }
 0x3e5   :  { %2801 = vmatpush.bf16.msra.mxu0 %v4574_v16  ;;  %2855 = vmatpush.msra.mxu2 %v2831_v44 }
 0x3e6   :  { %2901 = vmatpush.msrb.mxu3 %v5144_v7 }
 0x3e7   :  { %2856 = vmatpush.msra.mxu2 %v2830_v48 }
 0x3e8   :  { %4210 = vmatmul.msk.f32.vlgmr.msrb.gmra.mxu0 %vm2435_vm6, %v2551_v17  ;;  %2902 = vmatpush.msrb.mxu3 %v5149_v32  ;;  %v3009_v32 = vld [vmem:[%s5295_s15 + $0x68] sm:$0xff] }
 0x3e9   :  { %2802 = vmatpush.bf16.msra.mxu0 %v4573_v18  ;;  %2857 = vmatpush.msra.mxu2 %v2829_v54 }
 0x3ea   :  { %2903 = vmatpush.msrb.mxu3 %v5155_v33 }
 0x3eb   :  { %2858 = vmatpush.msra.mxu2 %v2828_v22 }
 0x3ec   :  { %2904 = vmatpush.msrb.mxu3 %v5161_v14  ;;  %v3008_v14 = vld [vmem:[%s5295_s15 + $0x60] sm:$0xff] }
 0x3ed   :  { %2803 = vmatpush.bf16.msra.mxu0 %v4572_v19 }
 0x3ee   :  { %2905 = vmatpush.msrb.mxu3 %v2837_v35 }
 0x3f0   :  { %2906 = vmatpush.msrb.mxu3 %v2836_v41  ;;  %v3007_v41 = vld [vmem:[%s5295_s15 + $0x58] sm:$0xff] }
 0x3f1   :  { %2804 = vmatpush.bf16.msra.mxu0 %v4571_v24 }
 0x3f2   :  { %2907 = vmatpush.msrb.mxu3 %v2835_v37  ;;  %v3006_v37 = vld [vmem:[%s5295_s15 + $0x50] sm:$0xff] }
 0x3f4   :  { %2908 = vmatpush.msrb.mxu3 %v2834_v39  ;;  %v3004_v39 = vld [vmem:[%s5295_s15 + $0x40] sm:$0xff] }
 0x3f5   :  { %2805 = vmatpush.bf16.msra.mxu0 %v4570_v25 }
 0x3f6   :  { %2909 = vmatpush.msrb.mxu3 %v2833_v40 }
 0x3f8   :  { %2910 = vmatpush.msrb.mxu3 %v2832_v38  ;;  %v3003_v38 = vld [vmem:[%s5295_s15 + $0x38] sm:$0xff] }
 0x3f9   :  { %2806 = vmatpush.bf16.msra.mxu0 %v4569_v28 }
 0x3fa   :  { %2911 = vmatpush.msrb.mxu3 %v2831_v44 }
 0x3fc   :  { %2912 = vmatpush.msrb.mxu3 %v2830_v48 }
 0x3fd   :  { %2807 = vmatpush.bf16.msra.mxu0 %v4568_v30  ;;  %v3011_v30 = vld [vmem:[%s5295_s15 + $0x78] sm:$0xff] }
 0x3fe   :  { %2913 = vmatpush.msrb.mxu3 %v2829_v54  ;;  %3016 = vmatpush.msrb.mxu1 %v3011_v30  ;;  %v2844_v54 = vld [vmem:[%s5294_s14] sm:$0x1] }
 0x400   :  { %2914 = vmatpush.msrb.mxu3 %v2828_v22  ;;  %3017 = vmatpush.msrb.mxu1 %v3010_v31 }
 0x401   :  { %2984 = vmatpush.msrb.mxu0 %v2842_v3 }
 0x402   :  { %3018 = vmatpush.msrb.mxu1 %v3009_v32 }
 0x404   :  { %3019 = vmatpush.msrb.mxu1 %v3008_v14 }
 0x406   :  { %3020 = vmatpush.msrb.mxu1 %v3007_v41 }
 0x408   :  { %3021 = vmatpush.msrb.mxu1 %v3006_v37 }
 0x45d   :  { %v2579_v42 = vpop.f32.mrf.mxu0 }
 0x45e   :  { %v2652_v43 = vperm.slane %v2579_v42, 0  ;;  %v3005_v42 = vld [vmem:[%s5295_s15 + $0x48] sm:$0xff] }
 0x45f   :  { %3022 = vmatpush.msrb.mxu1 %v3005_v42 }
 0x460   :  { %v2654_v49 = vmul.f32 %v2652_v43, %v5033_v36 }
 0x461   :  { %3023 = vmatpush.msrb.mxu1 %v3004_v39 }
 0x463   :  { %v2599_v50 = vpop.f32.mrf.mxu2  ;;  %3024 = vmatpush.msrb.mxu1 %v3003_v38 }
 0x464   :  { %v2653_v46 = vperm.slane %v2599_v50, 0  ;;  %v3002_v50 = vld [vmem:[%s5295_s15 + $0x30] sm:$0xff] }
 0x465   :  { %v2629_v47 = vpop.f32.mrf.mxu0  ;;  %3025 = vmatpush.msrb.mxu1 %v3002_v50 }
 0x466   :  { %v2656_v52 = vperm.slane %v2629_v47, 0  ;;  %v2655_v55 = vmul.f32 %v2653_v46, %v5037_v9  ;;  %v2827_v9 = vld [vmem:[%s5291_s11 + $0x8] sm:$0xff] }
 0x467   :  { %v2649_v53 = vpop.f32.mrf.mxu3  ;;  %2859 = vmatpush.msra.mxu2 %v2827_v9  ;;  %2915 = vmatpush.msrb.mxu3 %v2827_v9 }
 0x468   :  { %v2658_v51 = vadd.f32 %v2656_v52, %v2654_v49  ;;  %v2657_v56 = vperm.slane %v2649_v53, 0  ;;  %v2843_v49 = vld [vmem:[%s5293_s13] sm:$0x1] }
 0x469   :  { %2860 = vmatpush.msra.mxu2 %v2826_v61  ;;  %2916 = vmatpush.msrb.mxu3 %v2826_v61 }
 0x46a   :  { %vm2660_vm10 = vcmp.gt.f32.partialorder %v2658_v51, 0.0  ;;  %v2662_v57 = vmul.f32 0.2, %v2658_v51  ;;  %v2659_v0 = vadd.f32 %v2657_v56, %v2655_v55  ;;  %v3001_v56 = vld [vmem:[%s5295_s15 + $0x28] sm:$0xff] }
 0x46b   :  { %2961 = vmatpush.msrb.mxu2 %v2842_v3  ;;  %3026 = vmatpush.msrb.mxu1 %v3001_v56 }
 0x46c   :  { %v2664_v58 = vsel %vm2660_vm10, %v2658_v51, %v2662_v57  ;;  %vm2661_vm11 = vcmp.gt.f32.partialorder %v2659_v0, 0.0  ;;  %v2663_v59 = vmul.f32 0.2, %v2659_v0  ;;  %v3000_v57 = vld [vmem:[%s5295_s15 + $0x20] sm:$0xff] }
 0x46d   :  { %v2666_v36 = vpack.c.bf16 %v2664_v58, %v2664_v58  ;;  %3027 = vmatpush.msrb.mxu1 %v3000_v57  ;;  %v2998_v58 = vld [vmem:[%s5295_s15 + $0x10] sm:$0xff] }
 0x46e   :  { %v2665_v60 = vsel %vm2661_vm11, %v2659_v0, %v2663_v59  ;;  %v2999_v0 = vld [vmem:[%s5295_s15 + $0x18] sm:$0xff]  ;;  %v2997_v59 = vld [vmem:[%s5295_s15 + $0x8] sm:$0xff] }
 0x46f   :  { %v2667_v27 = vpack.c.bf16 %v2665_v60, %v2665_v60  ;;  %2808 = vmatmul.bf16.vlgmr.msra.gmra.mxu0 %v2666_v36  ;;  %3028 = vmatpush.msrb.mxu1 %v2999_v0  ;;  %v2996_v36 = vld [vmem:[%s5295_s15] sm:$0xff] }
 0x471   :  { %2821 = vmatmul.bf16.vlgmr.msra.gmra.mxu1 %v2667_v27 }
 0x472   :  { %3029 = vmatpush.msrb.mxu1 %v2998_v58 }
 0x474   :  { %3030 = vmatpush.msrb.mxu1 %v2997_v59 }
 0x476   :  { %3031 = vmatpush.msrb.mxu1 %v2996_v36 }
 0x4ec   :  { %v2809_v5 = vpop.f32.mrf.mxu0 }
 0x4ed   :  { %v2810_v63 = vadd.f32 %v4590_v62, %v2809_v5 }
 0x4ee   :  { %v2822_v21 = vpop.f32.mrf.mxu1 }
 0x4ef   :  { %v5206_v1 = vadd.f32 %v2822_v21, %v2810_v63  ;;  %v4591_v21 = vld [vmem:[#allocation2] ss:$0 sm:$0xff] }
 0x4f1   :  { %2861 = vmatmul.f32.vlgmr.msra.gmra.mxu2 %v5206_v1 }
 0x4f4   :  { %v2811_v20 = vpop.f32.mrf.mxu0 }
 0x4f6   :  { %v2824_v2 = vpop.f32.mrf.mxu1 }
 0x574   :  { %v2862_v4 = vpop.f32.mrf.mxu2 }
 0x575   :  { %v2866_v6 = vsel %vm2865_vm12, %v2862_v4, 0.0 }
 0x576   :  { %v2867_v8 = vrot.slane %v2866_v6, 4 }
 0x578   :  { %v2868_v10 = vadd.f32 %v2867_v8, %v2866_v6 }
 0x57a   :  { %v2869_v11 = vrot.slane %v2868_v10, 2 }
 0x57c   :  { %v2870_v34 = vadd.f32 %v2869_v11, %v2868_v10 }
 0x57e   :  { %v2871_v12 = vrot.slane %v2870_v34, 1 }
 0x580   :  { %v2872_v15 = vadd.f32 %v2871_v12, %v2870_v34 }
 0x582   :  { %v2873_v29 = vmul.f32 0.03125, %v2872_v15 }
 0x584   :  { %4277 = vmatmul.msk.f32.vlgmr.msra.gmra.mxu3 %vm2874_vm13, %v2873_v29 }
 0x607   :  { %v2895_v16 = vpop.f32.mrf.mxu3 }
 0x608   :  { %v2898_v17 = vperm.slane %v2895_v16, 0 }
 0x60a   :  { %v2899_v18 = vsub.f32 %v5206_v1, %v2898_v17 }
 0x60c   :  { %v2900_v19 = vmul.f32 %v2899_v18, %v2899_v18 }
 0x60e   :  { %2917 = vmatmul.f32.vlgmr.msrb.gmra.mxu3 %v2900_v19 }
 0x691   :  { %v2918_v23 = vpop.f32.mrf.mxu3 }
 0x692   :  { %v2921_v24 = vsel %vm2865_vm12, %v2918_v23, 0.0 }
 0x693   :  { %v2922_v13 = vrot.slane %v2921_v24, 4 }
 0x695   :  { %v2923_v25 = vadd.f32 %v2922_v13, %v2921_v24 }
 0x697   :  { %v2924_v26 = vrot.slane %v2923_v25, 2 }
 0x699   :  { %v2925_v28 = vadd.f32 %v2924_v26, %v2923_v25 }
 0x69b   :  { %v2926_v45 = vrot.slane %v2925_v28, 1 }
 0x69d   :  { %v2927_v7 = vadd.f32 %v2926_v45, %v2925_v28 }
 0x69f   :  { %v2928_v33 = vmul.f32 0.03125, %v2927_v7 }
 0x6a1   :  { %v2929_v35 = vadd.f32 1e-05, %v2928_v33 }
 0x6a3   :  { %4594 = vrsqrt.f32 %v2929_v35  ;;  %vm2936_vm15 = vweird.f32 %v2929_v35 }
 0x6a9   :  { %v4595_v40 = vpop.eup %4594 }
 0x6aa   :  { %v2931_v43 = vmul.f32 %v4595_v40, %v2929_v35  ;;  %vm2937_vm14 = vweird.f32 %v4595_v40 }
 0x6ab   :  { %vm2938_vm0 = vmor %vm2936_vm15, %vm2937_vm14 }
 0x6ac   :  { %v2932_v44 = vmul.f32 %v4595_v40, %v2931_v43 }
 0x6ae   :  { %v2933_v46 = vmul.f32 0.5, %v2932_v44 }
 0x6b0   :  { %v2934_v47 = vsub.f32 1.5, %v2933_v46 }
 0x6b2   :  { %v2935_v48 = vmul.f32 %v4595_v40, %v2934_v47 }
 0x6b4   :  { %v2939_v52 = vsel %vm2938_vm0, %v4595_v40, %v2935_v48 }
 0x6b5   :  { %v2940_v53 = vmul.f32 %v2939_v52, %v2843_v49 }
 0x6b7   :  { %4278 = vmatmul.msk.f32.vlgmr.msrb.gmra.mxu2 %vm2874_vm13, %v2940_v53  ;;  %v2941_v55 = vmul.f32 %v2940_v53, %v2873_v29 }
 0x6b9   :  { %v2942_v51 = vsub.f32 %v2844_v54, %v2941_v55 }
 0x6bb   :  { %4279 = vmatmul.msk.f32.vlgmr.msrb.gmra.mxu0 %vm2874_vm13, %v2942_v51 }
 0x738   :  { %v2986_v60 = vpop.f32.mrf.mxu0 }
 0x739   :  { %v2991_v9 = vperm.slane %v2986_v60, 0 }
 0x73a   :  { %v2963_v27 = vpop.f32.mrf.mxu2 }
 0x73b   :  { %v2989_v22 = vperm.slane %v2963_v27, 0 }
 0x73d   :  { %v2990_v61 = vmul.f32 %v2989_v22, %v5206_v1 }
 0x73f   :  { %v2992_v62 = vadd.f32 %v2991_v9, %v2990_v61 }
 0x741   :  { %vm2993_vm1 = vcmp.gt.f32.partialorder %v2992_v62, 0.0  ;;  %v2994_v5 = vmul.f32 0.2, %v2992_v62 }
 0x743   :  { %v2995_v63 = vsel %vm2993_vm1, %v2992_v62, %v2994_v5 }
 0x744   :  { %3032 = vmatmul.f32.vlgmr.msrb.gmra.mxu1 %v2995_v63 }
 0x7c1   :  { %v3033_v20 = vpop.f32.mrf.mxu1 }
 0x7c2   :  { %v3034_v2 = vadd.f32 %v4591_v21, %v3033_v20 }
 0x7c4   :  { %v3036_v3 = vsub.f32 0.0, %v3034_v2 }
 0x7c6   :  { %v3037_v4 = vmul.f32 1.442695, %v3036_v3 }
 0x7c8   :  { %4596 = vpow2.f32 %v3037_v4 }
 0x7ce   :  { %v4597_v6 = vpop.eup %4596 }
 0x7cf   :  { %v3039_v8 = vadd.f32 1.0, %v4597_v6 }
 0x7d1   :  { %4598 = vrcp.f32 %v3039_v8 }
 0x7d7   :  { %v4599_v10 = vpop.eup %4598 }
 0x7d8   :  { %3042 = vst.msk [vmem:[%s5297_s17] sm:$0xff] %vm3041_vm2, %v4599_v10 }
 0x7d9   :  { %3047 = vsyncpa [#allocation4], 1 }
 0x7da   :  { %3048 = vsyncpa [#allocation6], 1 }

</bundles_post_ra>
